<compile_context>
chip_gen: v7x
topology: tpu7x:2x2x1
jax: 0.10.0
libtpu: 0.0.40
codegen_flags: <defaults>
</compile_context>

<pallas_src>
import functools
import math

import jax
import jax.numpy as jnp
from jax.experimental import pallas as pl
from jax.experimental.pallas import tpu as pltpu


# ----------------------------- architecture constants -----------------------
H = 256                       # LSTMWithSelfAttention hidden dim (fixed by module)
SE_R = 16                     # SE bottleneck slab width (se1's real 8 zero-padded)
OUT_PAD = 128                 # lane-padded width of the final logits slab
HALO = 8                      # sublane-aligned top halo of the shared conv scratch
K1, P1 = 8, 4                 # conv1 kernel / padding (im2col built in wrapper)
K2, P2 = 5, 2
K3, P3 = 3, 1
K4, P4 = 3, 1
C1, C2 = 128, 256             # conv channel counts (fixed by module)

# row offsets inside the packed conv2..4 im2col weight slab
R2A, R2B = 0, K2 * C1                  # [0,   640)
R3A, R3B = R2B, R2B + K3 * C2          # [640, 1408)
R4A, R4B = R3B, R3B + K4 * C2          # [1408,2176)

# bias-slab row indices
(B_AU, B_T1, B_T2, B_LI, B_LG, B_LO,
 B_C1, B_C2, B_C3, B_C4,
 B_SE1A, B_SE1B, B_SE2A, B_SE2B, B_SE3A, B_SE3B, B_SE4A, B_SE4B,
 B_FC1, B_FC2, B_FC3, B_OUTW, B_CSUM) = range(23)
B_ROWS = 24


# ---------------------------------------------------------------------------
# The single fused kernel: whole forward pass, everything resident in VMEM.
# ---------------------------------------------------------------------------
def _fused_forward_kernel(au_last_ref, tenc_ref, patches1_ref,
                          front_w, lstm_w, conv1_w, conv234_w,
                          se_a, se_b, fc1b_w, fc23_w, bias_ref,
                          out_ref, padbuf):
    f32, bf16 = jnp.float32, jnp.bfloat16
    au_dim = au_last_ref.shape[1]
    latent = tenc_ref.shape[1]
    L = patches1_ref.shape[0]                   # conv length (T+1), constant across layers

    bias = bias_ref[...]                        # [B_ROWS, 256] f32, loaded once

    def brow(i, w=256):
        return bias[i:i + 1, :w]

    def mm(x, w):                               # bf16 MXU matmul, f32 accumulation
        return jnp.dot(x.astype(bf16), w.astype(bf16), preferred_element_type=f32)

    # ---------------- attention-LSTM branch (only the last time row matters) ----
    t_h = mm(tenc_ref[...], front_w[au_dim:au_dim + latent, :]) + brow(B_T1, latent)
    t_h = t_h * jax.nn.sigmoid(t_h)                                   # SiLU (f32)
    t_emb = mm(t_h, front_w[au_dim + latent:au_dim + 2 * latent, :]) + brow(B_T2, latent)
    au_e = mm(au_last_ref[...], front_w[0:au_dim, :]) + brow(B_AU, latent)
    pe = au_e + t_emb                                                 # [1, latent]

    # single LSTM-cell step, zero initial state, forget gate pruned (c0 == 0)
    gates = mm(pe, lstm_w[...])                                       # [1, 3H]: i | g | o
    i_g = jax.nn.sigmoid(gates[:, 0:H] + brow(B_LI))
    g_g = jnp.tanh(gates[:, H:2 * H] + brow(B_LG))
    o_g = jax.nn.sigmoid(gates[:, 2 * H:3 * H] + brow(B_LO))
    h_last = o_g * jnp.tanh(i_g * g_g)                                # [1, H]

    # SelfAttention softmax over a length-1 axis == 1.0  =>  branch collapses to
    # the scalar s = h_last . out_w ; the fc1 attention-half is s * colsum(fc1a)
    # (out_b is folded into the fc1 bias in prepare_params).  dropout = identity.
    s = jnp.sum(h_last * brow(B_OUTW), axis=1, keepdims=True)         # [1, 1]
    z_x = s * brow(B_CSUM)                                            # [1, 256]

    # ---------------- conv + squeeze-excite branch, lane-dense [L, C] layout ----
    # one-time zeroing of the halo rows of the shared padded-input scratch
    rows = padbuf.shape[0]
    padbuf[0:HALO, :] = jnp.zeros((HALO, padbuf.shape[1]), f32)
    padbuf[HALO + 8:rows, :] = jnp.zeros((rows - HALO - 8, padbuf.shape[1]), f32)

    def conv_im2col(y, w, b_row, K, p):
        cin = y.shape[1]
        padbuf[HALO:HALO + L, 0:cin] = y                              # aligned store
        pieces = [padbuf[HALO - p + k:HALO - p + k + L, 0:cin] for k in range(K)]
        patches = jnp.concatenate(pieces, axis=1)                     # [L, K*cin]
        return jnp.maximum(mm(patches, w) + b_row, 0.0)

    def squeeze_excite(y, a_w, b_w, ba_row, bb_row):
        c = y.shape[1]
        pooled = jnp.mean(y, axis=0, keepdims=True)                   # [1, C]
        z = jnp.maximum(mm(pooled, a_w) + bias[ba_row:ba_row + 1, :SE_R], 0.0)
        sc = jax.nn.sigmoid(mm(z, b_w) + bias[bb_row:bb_row + 1, :])  # [1, 256]
        return y * sc[:, 0:c]

    # conv1: im2col patches were prepared in the wrapper (raw input = data)
    y = jnp.maximum(mm(patches1_ref[...], conv1_w[...]) + brow(B_C1, C1), 0.0)    # [L, 128]
    y = squeeze_excite(y, se_a[0:C1, :],            se_b[0:SE_R, :],          B_SE1A, B_SE1B)
    y = conv_im2col(y, conv234_w[R2A:R2B, :], brow(B_C2), K2, P2)                 # [L, 256]
    y = squeeze_excite(y, se_a[C1:C1 + C2, :],      se_b[SE_R:2 * SE_R, :],   B_SE2A, B_SE2B)
    y = conv_im2col(y, conv234_w[R3A:R3B, :], brow(B_C3), K3, P3)                 # [L, 256]
    y = squeeze_excite(y, se_a[C1 + C2:C1 + 2 * C2, :], se_b[2 * SE_R:3 * SE_R, :], B_SE3A, B_SE3B)
    y = conv_im2col(y, conv234_w[R4A:R4B, :], brow(B_C4), K4, P4)                 # [L, 256]
    y = squeeze_excite(y, se_a[C1 + 2 * C2:C1 + 3 * C2, :], se_b[3 * SE_R:4 * SE_R, :], B_SE4A, B_SE4B)

    y_pool = jnp.mean(y, axis=0, keepdims=True)                       # GAP -> [1, 256]

    # ---------------- final FC stack (fc1 attention-half already folded) --------
    z = z_x + mm(y_pool, fc1b_w[...]) + brow(B_FC1)                   # [1, 256]
    z = mm(z, fc23_w[0:H, :]) + brow(B_FC2, OUT_PAD)                  # [1, 128]
    out_ref[...] = mm(z, fc23_w[H:H + OUT_PAD, :]) + brow(B_FC3, OUT_PAD)   # [1, 128]


# ---------------------------------------------------------------------------
# JAX-side glue (under jit): mask, timestep embedding, conv1 im2col, launch.
# ---------------------------------------------------------------------------
def timestep_embedding(timesteps, dim, max_period=10000.0):
    half = dim // 2
    freqs = jnp.exp(-math.log(max_period) * jnp.arange(half, dtype=jnp.float32) / half)
    args = timesteps[:, None].astype(jnp.float32) * freqs[None]
    emb = jnp.concatenate([jnp.cos(args), jnp.sin(args)], axis=-1)
    if dim % 2:
        emb = jnp.concatenate([emb, jnp.zeros_like(emb[:, :1])], axis=-1)
    return emb


def _vmem_spec():
    return pl.BlockSpec(memory_space=pltpu.MemorySpace.VMEM)


@functools.partial(jax.jit, static_argnums=(4,))
def personality_forward(prepared, action_units, lengths, timesteps, nb_classes):
    B, T, au_dim = action_units.shape
    assert B == 1, "PyTorch forward only composes for batch size 1"
    assert nb_classes <= OUT_PAD
    latent = prepared["lstm_w"].shape[0]

    # source mask + last-row / conv1 im2col prep (layout plumbing, tiny)
    x_m = jnp.where(jnp.arange(T)[:, None] >= lengths[0], 0.0,
                    action_units[0].astype(jnp.float32))              # [T, au]
    au_last = x_m[T - 1:T, :]                                         # [1, au]
    L1 = T + 2 * P1 - K1 + 1                                          # conv output length
    xp = jnp.pad(x_m, ((P1, P1), (0, 0)))
    patches1 = jnp.concatenate([xp[k:k + L1, :] for k in range(K1)], axis=1)   # [L1, K1*au]
    t_enc = timestep_embedding(timesteps, latent)                     # [1, latent]

    assert L1 >= 8, "conv length must cover the aligned halo scheme"
    pad_rows = ((HALO + L1 + max(P2, P3, P4) + 7) // 8) * 8           # shared scratch rows

    data = (au_last, t_enc.astype(jnp.float32), patches1)
    weights = (prepared["front_w"], prepared["lstm_w"], prepared["conv1_w"],
               prepared["conv234_w"], prepared["se_a"], prepared["se_b"],
               prepared["fc1b_w"], prepared["fc23_w"], prepared["bias"])

    out_padded = pl.pallas_call(
        _fused_forward_kernel,
        out_shape=jax.ShapeDtypeStruct((1, OUT_PAD), jnp.float32),
        in_specs=[_vmem_spec()] * (len(data) + len(weights)),
        out_specs=_vmem_spec(),
        scratch_shapes=[pltpu.VMEM((pad_rows, C2), jnp.float32)],     # shared conv pad buffer
    )(*data, *weights)
    return out_padded[:, :nb_classes]


# ---------------------------------------------------------------------------
# Parameter handling: PyTorch layouts -> packed, kernel-ready slabs (done once).
# ---------------------------------------------------------------------------
def prepare_params(p):
    f32, bf16 = jnp.float32, jnp.bfloat16
    latent, au_dim = p["au_emb_w"].shape
    nb = p["fc3_w"].shape[0]
    assert nb <= OUT_PAD

    # front-end (au_emb / time MLP) weights, stacked on rows (kept f32: tiny, aligned slices)
    front_w = jnp.concatenate([p["au_emb_w"].T, p["time1_w"].T, p["time2_w"].T], axis=0)

    # LSTM: PyTorch gate order i,f,g,o; forget gate is dead because c0 == 0
    w_ih = p["lstm_w_ih"]                                   # [4H, latent]
    b4 = p["lstm_b_ih"] + p["lstm_b_hh"]
    lstm_w = jnp.concatenate([w_ih[:H], w_ih[2 * H:3 * H], w_ih[3 * H:]], axis=0).T  # [latent, 3H]
    lstm_b_i, lstm_b_g, lstm_b_o = b4[:H], b4[2 * H:3 * H], b4[3 * H:]

    def im2col_w(w):                                        # [Cout, Cin, K] -> [K*Cin, Cout]
        co, ci, k = w.shape
        return jnp.transpose(w, (2, 1, 0)).reshape(k * ci, co)

    conv1_w = im2col_w(p["conv1_w"])                        # [K1*au, 128]
    conv234_w = jnp.concatenate(
        [im2col_w(p["conv2_w"]), im2col_w(p["conv3_w"]), im2col_w(p["conv4_w"])], axis=0)

    def pad_cols(a, n):
        return jnp.pad(a, ((0, 0), (0, n - a.shape[1])))

    def pad_rows(a, n):
        return jnp.pad(a, ((0, n - a.shape[0]), (0, 0)))

    # squeeze-excite slabs (se1 bottleneck 8 zero-padded to SE_R=16, exact math)
    se_a = jnp.concatenate([pad_cols(p["se1_fc1_w"].T, SE_R),
                            p["se2_fc1_w"].T, p["se3_fc1_w"].T, p["se4_fc1_w"].T], axis=0)
    se_b = jnp.concatenate([pad_cols(pad_rows(p["se1_fc2_w"].T, SE_R), C2),
                            p["se2_fc2_w"].T, p["se3_fc2_w"].T, p["se4_fc2_w"].T], axis=0)

    # final FC stack; the attention half of fc1 is folded into s * colsum
    fc1_t = p["fc1_w"].T                                    # [512, 256]
    colsum = jnp.sum(fc1_t[:H], axis=0)                     # [256]   (x_feat is s broadcast)
    fc1b_w = fc1_t[H:]                                      # [256, 256]
    fc1_b_eff = p["fc1_b"] + p["out_b"][0] * colsum
    fc3_w = jnp.pad(p["fc3_w"].T, ((0, 0), (0, OUT_PAD - nb)))          # [128, 128]
    fc23_w = jnp.concatenate([p["fc2_w"].T, fc3_w], axis=0)             # [384, 128]

    def row256(v):
        v = jnp.asarray(v, f32).reshape(-1)
        return jnp.pad(v, (0, 256 - v.shape[0]))

    bias_rows = [
        row256(p["au_emb_b"]), row256(p["time1_b"]), row256(p["time2_b"]),
        row256(lstm_b_i), row256(lstm_b_g), row256(lstm_b_o),
        row256(p["conv1_b"]), row256(p["conv2_b"]), row256(p["conv3_b"]), row256(p["conv4_b"]),
        row256(p["se1_fc1_b"]), row256(p["se1_fc2_b"]),
        row256(p["se2_fc1_b"]), row256(p["se2_fc2_b"]),
        row256(p["se3_fc1_b"]), row256(p["se3_fc2_b"]),
        row256(p["se4_fc1_b"]), row256(p["se4_fc2_b"]),
        row256(fc1_b_eff), row256(p["fc2_b"]),
        row256(jnp.pad(p["fc3_b"], (0, OUT_PAD - nb))),
        row256(p["out_w"].reshape(-1)),                     # output_layer weight as a row
        row256(colsum),                                     # colsum(fc1a)
        jnp.zeros((256,), f32),                             # pad to B_ROWS
    ]
    bias = jnp.stack(bias_rows, axis=0)                     # [24, 256] f32

    # attn_w1 / attn_w2 are intentionally not packed: the length-1 softmax makes
    # them provably irrelevant to the output.
    return dict(
        front_w=front_w.astype(f32),
        lstm_w=lstm_w.astype(bf16),
        conv1_w=conv1_w.astype(bf16),
        conv234_w=conv234_w.astype(bf16),
        se_a=se_a.astype(bf16),
        se_b=se_b.astype(bf16),
        fc1b_w=fc1b_w.astype(bf16),
        fc23_w=fc23_w.astype(bf16),
        bias=bias.astype(f32),
    )


# ---------------------------------------------------------------------------
# Pure-JAX reference of the ORIGINAL (unpruned) PyTorch forward, f32.
# ---------------------------------------------------------------------------
def forward_reference(p, action_units, lengths, timesteps, latent_dim):
    with jax.default_matmul_precision("float32"):
        B, T, au = action_units.shape
        mask = jnp.arange(T)[None, :] >= lengths[:, None]
        x_m = jnp.where(mask[:, :, None], 0.0, action_units)

        packed = jnp.einsum("bta,la->btl", x_m, p["au_emb_w"]) + p["au_emb_b"]
        tenc = timestep_embedding(timesteps, latent_dim)
        th = tenc @ p["time1_w"].T + p["time1_b"]
        th = th * jax.nn.sigmoid(th)
        temb = th @ p["time2_w"].T + p["time2_b"]
        packed = packed + temb[:, None, :]                  # B == 1 broadcast as in torch

        # nn.LSTM(latent, 256) is seq-first: [1,T,latent] = (seq=1, batch=T)
        xx = packed[0]
        gates = xx @ p["lstm_w_ih"].T + (p["lstm_b_ih"] + p["lstm_b_hh"])
        i = jax.nn.sigmoid(gates[:, 0:H]); f = jax.nn.sigmoid(gates[:, H:2 * H])
        g = jnp.tanh(gates[:, 2 * H:3 * H]); o = jax.nn.sigmoid(gates[:, 3 * H:4 * H])
        c = f * 0.0 + i * g                                 # c0 == 0
        h = o * jnp.tanh(c)
        h_last = h[T - 1:T]

        inputs = h_last[None]                               # [1, 1, H]
        hT = jnp.transpose(inputs, (0, 2, 1))
        score = jnp.tanh(jnp.einsum("ah,bhm->bam", p["attn_w1"], hT))
        attw = jax.nn.softmax(jnp.einsum("ha,bam->bhm", p["attn_w2"], score), axis=2)
        emb = jnp.einsum("bhm,bmk->bhk", attw, inputs)      # [1, H, H]
        x_att = jnp.einsum("bhk,ok->bho", emb, p["out_w"]) + p["out_b"]
        x_feat = x_att[:, :, 0]                             # [1, H]

        y = jnp.transpose(x_m, (0, 2, 1))                   # [B, au, T]

        def conv(v, w, b, pad):
            o_ = jax.lax.conv_general_dilated(v, w, (1,), [(pad, pad)],
                                              dimension_numbers=("NCH", "OIH", "NCH"))
            return o_ + b[None, :, None]

        def se(v, w1, b1, w2, b2):
            pooled = jnp.mean(v, axis=2)
            zz = jax.nn.relu(pooled @ w1.T + b1)
            ss = jax.nn.sigmoid(zz @ w2.T + b2)
            return v * ss[:, :, None]

        y = jax.nn.relu(conv(y, p["conv1_w"], p["conv1_b"], P1))
        y = se(y, p["se1_fc1_w"], p["se1_fc1_b"], p["se1_fc2_w"], p["se1_fc2_b"])
        y = jax.nn.relu(conv(y, p["conv2_w"], p["conv2_b"], P2))
        y = se(y, p["se2_fc1_w"], p["se2_fc1_b"], p["se2_fc2_w"], p["se2_fc2_b"])
        y = jax.nn.relu(conv(y, p["conv3_w"], p["conv3_b"], P3))
        y = se(y, p["se3_fc1_w"], p["se3_fc1_b"], p["se3_fc2_w"], p["se3_fc2_b"])
        y = jax.nn.relu(conv(y, p["conv4_w"], p["conv4_b"], P4))
        y = se(y, p["se4_fc1_w"], p["se4_fc1_b"], p["se4_fc2_w"], p["se4_fc2_b"])
        y = jnp.mean(y, axis=2)                             # GAP -> [B, 256]

        feat = jnp.concatenate([x_feat, y], axis=1)         # [1, 512]
        z = feat @ p["fc1_w"].T + p["fc1_b"]
        z = z @ p["fc2_w"].T + p["fc2_b"]
        return z @ p["fc3_w"].T + p["fc3_b"]


# ---------------------------------------------------------------------------
# Deterministic PyTorch-layout parameters (Linear [out,in], Conv1d [Cout,Cin,K]).
# ---------------------------------------------------------------------------
def init_params(key, au_dim, latent, alength, nb_classes, attn_hidden=256):
    ks = iter(jax.random.split(key, 64))

    def nrm(shape, scale=0.1):
        return scale * jax.random.normal(next(ks), shape, jnp.float32)

    p = {}
    p["au_emb_w"], p["au_emb_b"] = nrm((latent, au_dim)), nrm((latent,))
    p["time1_w"], p["time1_b"] = nrm((latent, latent)), nrm((latent,))
    p["time2_w"], p["time2_b"] = nrm((latent, latent)), nrm((latent,))
    p["lstm_w_ih"] = nrm((4 * attn_hidden, latent))         # w_hh never affects output (seq len 1)
    p["lstm_b_ih"] = nrm((4 * attn_hidden,))
    p["lstm_b_hh"] = nrm((4 * attn_hidden,))
    p["attn_w1"] = nrm((alength, attn_hidden))              # killed by length-1 softmax
    p["attn_w2"] = nrm((attn_hidden, alength))              # killed by length-1 softmax
    p["out_w"], p["out_b"] = nrm((1, attn_hidden)), nrm((1,))
    p["conv1_w"], p["conv1_b"] = nrm((C1, au_dim, K1)), nrm((C1,))
    p["conv2_w"], p["conv2_b"] = nrm((C2, C1, K2)), nrm((C2,))
    p["conv3_w"], p["conv3_b"] = nrm((C2, C2, K3)), nrm((C2,))
    p["conv4_w"], p["conv4_b"] = nrm((C2, C2, K4)), nrm((C2,))
    p["se1_fc1_w"], p["se1_fc1_b"] = nrm((C1 // 16, C1)), nrm((C1 // 16,))
    p["se1_fc2_w"], p["se1_fc2_b"] = nrm((C1, C1 // 16)), nrm((C1,))
    for i in (2, 3, 4):
        p[f"se{i}_fc1_w"], p[f"se{i}_fc1_b"] = nrm((C2 // 16, C2)), nrm((C2 // 16,))
        p[f"se{i}_fc2_w"], p[f"se{i}_fc2_b"] = nrm((C2, C2 // 16)), nrm((C2,))
    p["fc1_w"], p["fc1_b"] = nrm((256, 512)), nrm((256,))
    p["fc2_w"], p["fc2_b"] = nrm((128, 256)), nrm((128,))
    p["fc3_w"], p["fc3_b"] = nrm((nb_classes, 128)), nrm((nb_classes,))
    return p


if __name__ == "__main__":
    # Scaled-down hyper-params (structure identical to the PyTorch module):
    AU_DIM = 8          # == max_nb_variables (conv1 input channels must match)
    LATENT = 32         # latent_dim / time_embed_dim
    MAX_SEQ = 16        # max_seq_length == max_timesteps == alength
    NB_CLASSES = 25

    key = jax.random.PRNGKey(0)
    kp, kx, kt = jax.random.split(key, 3)
    raw = init_params(kp, AU_DIM, LATENT, MAX_SEQ, NB_CLASSES)
    # Make all weights exactly bf16-representable so the bf16-streamed kernel and
    # the f32 reference operate on identical weights.
    params = jax.tree_util.tree_map(
        lambda a: a.astype(jnp.bfloat16).astype(jnp.float32), raw)
    prepared = prepare_params(params)            # packed once, outside jit

    action_units = jax.random.normal(kx, (1, MAX_SEQ, AU_DIM), jnp.float32)
    lengths = jnp.array([12], dtype=jnp.int32)
    timesteps = jax.random.uniform(kt, (1,), jnp.float32) * 10.0

    out = personality_forward(prepared, action_units, lengths, timesteps, NB_CLASSES)
    out = jax.block_until_ready(out)
    assert out.shape == (1, NB_CLASSES) and out.dtype == jnp.float32

    ref = forward_reference(params, action_units, lengths, timesteps, LATENT)
    err = float(jnp.max(jnp.abs(out - ref)))
    tol = 5e-2 + 5e-2 * float(jnp.max(jnp.abs(ref)))       # bf16 activation-cast budget
    assert err <= tol, f"kernel mismatch: max_abs_err={err} tol={tol}"
    print("KERNEL_OK")
</pallas_src>

<mosaic_0001>
module attributes {stable_mosaic.version = 11 : i64} {
  func.func @_fused_forward_kernel(%arg0: memref<1x8xf32, #tpu.memory_space<vmem>>, %arg1: memref<1x32xf32, #tpu.memory_space<vmem>>, %arg2: memref<17x64xf32, #tpu.memory_space<vmem>>, %arg3: memref<72x32xf32, #tpu.memory_space<vmem>>, %arg4: memref<32x768xbf16, #tpu.memory_space<vmem>>, %arg5: memref<64x128xbf16, #tpu.memory_space<vmem>>, %arg6: memref<2176x256xbf16, #tpu.memory_space<vmem>>, %arg7: memref<896x16xbf16, #tpu.memory_space<vmem>>, %arg8: memref<64x256xbf16, #tpu.memory_space<vmem>>, %arg9: memref<256x256xbf16, #tpu.memory_space<vmem>>, %arg10: memref<384x128xbf16, #tpu.memory_space<vmem>>, %arg11: memref<24x256xf32, #tpu.memory_space<vmem>>, %arg12: memref<1x128xf32, #tpu.memory_space<vmem>>, %arg13: memref<32x256xf32, #tpu.memory_space<vmem>>) attributes {dimension_semantics = [], scalar_prefetch = 0 : i64, scratch_operands = 1 : i64, tpu.core_type = #tpu.core_type<tc>} {
    %c0 = arith.constant 0 : index
    %c0_0 = arith.constant 0 : index
    %0 = vector.load %arg11[%c0, %c0_0] : memref<24x256xf32, #tpu.memory_space<vmem>>, vector<24x256xf32>
    %c0_1 = arith.constant 0 : index
    %c0_2 = arith.constant 0 : index
    %1 = vector.load %arg1[%c0_1, %c0_2] : memref<1x32xf32, #tpu.memory_space<vmem>>, vector<1x32xf32>
    %c8 = arith.constant 8 : index
    %c0_3 = arith.constant 0 : index
    %2 = vector.load %arg3[%c8, %c0_3] : memref<72x32xf32, #tpu.memory_space<vmem>>, vector<32x32xf32>
    %3 = arith.truncf %1 : vector<1x32xf32> to vector<1x32xbf16>
    %4 = arith.truncf %2 : vector<32x32xf32> to vector<32x32xbf16>
    %cst = arith.constant dense<0.000000e+00> : vector<1x32xf32>
    %5 = tpu.matmul %3, %4, %cst {dimension_numbers = #tpu.dot_dimension_numbers<[1], [0], [0], [1], [0, 0, 1, 1], [], []>} : vector<1x32xbf16>, vector<32x32xbf16>, vector<1x32xf32> -> vector<1x32xf32>
    %6 = vector.extract_strided_slice %0 {offsets = [1, 0], sizes = [1, 32], strides = [1, 1]} : vector<24x256xf32> to vector<1x32xf32>
    %7 = arith.addf %5, %6 : vector<1x32xf32>
    %8 = arith.negf %7 : vector<1x32xf32>
    %9 = math.exp %8 : vector<1x32xf32>
    %cst_4 = arith.constant 1.000000e+00 : f32
    %10 = vector.broadcast %cst_4 : f32 to vector<1x32xf32>
    %11 = arith.addf %10, %9 : vector<1x32xf32>
    %12 = arith.divf %10, %11 : vector<1x32xf32>
    %13 = arith.mulf %7, %12 : vector<1x32xf32>
    %c40 = arith.constant 40 : index
    %c0_5 = arith.constant 0 : index
    %14 = vector.load %arg3[%c40, %c0_5] : memref<72x32xf32, #tpu.memory_space<vmem>>, vector<32x32xf32>
    %15 = arith.truncf %13 : vector<1x32xf32> to vector<1x32xbf16>
    %16 = arith.truncf %14 : vector<32x32xf32> to vector<32x32xbf16>
    %cst_6 = arith.constant dense<0.000000e+00> : vector<1x32xf32>
    %17 = tpu.matmul %15, %16, %cst_6 {dimension_numbers = #tpu.dot_dimension_numbers<[1], [0], [0], [1], [0, 0, 1, 1], [], []>} : vector<1x32xbf16>, vector<32x32xbf16>, vector<1x32xf32> -> vector<1x32xf32>
    %18 = vector.extract_strided_slice %0 {offsets = [2, 0], sizes = [1, 32], strides = [1, 1]} : vector<24x256xf32> to vector<1x32xf32>
    %19 = arith.addf %17, %18 : vector<1x32xf32>
    %c0_7 = arith.constant 0 : index
    %c0_8 = arith.constant 0 : index
    %20 = vector.load %arg0[%c0_7, %c0_8] : memref<1x8xf32, #tpu.memory_space<vmem>>, vector<1x8xf32>
    %c0_9 = arith.constant 0 : index
    %c0_10 = arith.constant 0 : index
    %21 = vector.load %arg3[%c0_9, %c0_10] : memref<72x32xf32, #tpu.memory_space<vmem>>, vector<8x32xf32>
    %22 = arith.truncf %20 : vector<1x8xf32> to vector<1x8xbf16>
    %23 = arith.truncf %21 : vector<8x32xf32> to vector<8x32xbf16>
    %cst_11 = arith.constant dense<0.000000e+00> : vector<1x32xf32>
    %24 = tpu.matmul %22, %23, %cst_11 {dimension_numbers = #tpu.dot_dimension_numbers<[1], [0], [0], [1], [0, 0, 1, 1], [], []>} : vector<1x8xbf16>, vector<8x32xbf16>, vector<1x32xf32> -> vector<1x32xf32>
    %25 = vector.extract_strided_slice %0 {offsets = [0, 0], sizes = [1, 32], strides = [1, 1]} : vector<24x256xf32> to vector<1x32xf32>
    %26 = arith.addf %24, %25 : vector<1x32xf32>
    %27 = arith.addf %26, %19 : vector<1x32xf32>
    %c0_12 = arith.constant 0 : index
    %c0_13 = arith.constant 0 : index
    %28 = vector.load %arg4[%c0_12, %c0_13] : memref<32x768xbf16, #tpu.memory_space<vmem>>, vector<32x768xbf16>
    %29 = arith.truncf %27 : vector<1x32xf32> to vector<1x32xbf16>
    %cst_14 = arith.constant dense<0.000000e+00> : vector<1x768xf32>
    %30 = tpu.matmul %29, %28, %cst_14 {dimension_numbers = #tpu.dot_dimension_numbers<[1], [0], [0], [1], [0, 0, 1, 1], [], []>} : vector<1x32xbf16>, vector<32x768xbf16>, vector<1x768xf32> -> vector<1x768xf32>
    %31 = vector.extract_strided_slice %30 {offsets = [0, 0], sizes = [1, 256], strides = [1, 1]} : vector<1x768xf32> to vector<1x256xf32>
    %32 = vector.extract_strided_slice %0 {offsets = [3, 0], sizes = [1, 256], strides = [1, 1]} : vector<24x256xf32> to vector<1x256xf32>
    %33 = arith.addf %31, %32 : vector<1x256xf32>
    %34 = arith.negf %33 : vector<1x256xf32>
    %35 = math.exp %34 : vector<1x256xf32>
    %cst_15 = arith.constant 1.000000e+00 : f32
    %36 = vector.broadcast %cst_15 : f32 to vector<1x256xf32>
    %37 = arith.addf %36, %35 : vector<1x256xf32>
    %38 = arith.divf %36, %37 : vector<1x256xf32>
    %39 = vector.extract_strided_slice %30 {offsets = [0, 256], sizes = [1, 256], strides = [1, 1]} : vector<1x768xf32> to vector<1x256xf32>
    %40 = vector.extract_strided_slice %0 {offsets = [4, 0], sizes = [1, 256], strides = [1, 1]} : vector<24x256xf32> to vector<1x256xf32>
    %41 = arith.addf %39, %40 : vector<1x256xf32>
    %42 = math.tanh %41 : vector<1x256xf32>
    %43 = vector.extract_strided_slice %30 {offsets = [0, 512], sizes = [1, 256], strides = [1, 1]} : vector<1x768xf32> to vector<1x256xf32>
    %44 = vector.extract_strided_slice %0 {offsets = [5, 0], sizes = [1, 256], strides = [1, 1]} : vector<24x256xf32> to vector<1x256xf32>
    %45 = arith.addf %43, %44 : vector<1x256xf32>
    %46 = arith.negf %45 : vector<1x256xf32>
    %47 = math.exp %46 : vector<1x256xf32>
    %cst_16 = arith.constant 1.000000e+00 : f32
    %48 = vector.broadcast %cst_16 : f32 to vector<1x256xf32>
    %49 = arith.addf %48, %47 : vector<1x256xf32>
    %50 = arith.divf %48, %49 : vector<1x256xf32>
    %51 = arith.mulf %38, %42 : vector<1x256xf32>
    %52 = math.tanh %51 : vector<1x256xf32>
    %53 = arith.mulf %50, %52 : vector<1x256xf32>
    %54 = vector.extract_strided_slice %0 {offsets = [21, 0], sizes = [1, 256], strides = [1, 1]} : vector<24x256xf32> to vector<1x256xf32>
    %55 = arith.mulf %53, %54 : vector<1x256xf32>
    %cst_17 = arith.constant dense<0.000000e+00> : vector<1xf32>
    %56 = vector.multi_reduction <add>, %55, %cst_17 [1] : vector<1x256xf32> to vector<1xf32>
    %57 = vector.shape_cast %56 : vector<1xf32> to vector<1x1xf32>
    %58 = vector.extract_strided_slice %0 {offsets = [22, 0], sizes = [1, 256], strides = [1, 1]} : vector<24x256xf32> to vector<1x256xf32>
    %59 = vector.broadcast %57 : vector<1x1xf32> to vector<1x256xf32>
    %60 = arith.mulf %59, %58 : vector<1x256xf32>
    %cst_18 = arith.constant 0.000000e+00 : f32
    %61 = vector.broadcast %cst_18 : f32 to vector<8x256xf32>
    %c0_19 = arith.constant 0 : index
    %c0_20 = arith.constant 0 : index
    %62 = vector.load %arg13[%c0_19, %c0_20] : memref<32x256xf32, #tpu.memory_space<vmem>>, vector<8x256xf32>
    tpu.vector_store %arg13[%c0_19, %c0_20], %61 {strides = array<i32>} : memref<32x256xf32, #tpu.memory_space<vmem>>, vector<8x256xf32>,
    %cst_21 = arith.constant 0.000000e+00 : f32
    %63 = vector.broadcast %cst_21 : f32 to vector<16x256xf32>
    %c16 = arith.constant 16 : index
    %c0_22 = arith.constant 0 : index
    %64 = vector.load %arg13[%c16, %c0_22] : memref<32x256xf32, #tpu.memory_space<vmem>>, vector<16x256xf32>
    tpu.vector_store %arg13[%c16, %c0_22], %63 {strides = array<i32>} : memref<32x256xf32, #tpu.memory_space<vmem>>, vector<16x256xf32>,
    %c0_23 = arith.constant 0 : index
    %c0_24 = arith.constant 0 : index
    %65 = vector.load %arg2[%c0_23, %c0_24] : memref<17x64xf32, #tpu.memory_space<vmem>>, vector<17x64xf32>
    %c0_25 = arith.constant 0 : index
    %c0_26 = arith.constant 0 : index
    %66 = vector.load %arg5[%c0_25, %c0_26] : memref<64x128xbf16, #tpu.memory_space<vmem>>, vector<64x128xbf16>
    %67 = arith.truncf %65 : vector<17x64xf32> to vector<17x64xbf16>
    %cst_27 = arith.constant dense<0.000000e+00> : vector<17x128xf32>
    %68 = tpu.matmul %67, %66, %cst_27 {dimension_numbers = #tpu.dot_dimension_numbers<[1], [0], [0], [1], [0, 0, 1, 1], [], []>} : vector<17x64xbf16>, vector<64x128xbf16>, vector<17x128xf32> -> vector<17x128xf32>
    %69 = vector.extract_strided_slice %0 {offsets = [6, 0], sizes = [1, 128], strides = [1, 1]} : vector<24x256xf32> to vector<1x128xf32>
    %70 = vector.broadcast %69 : vector<1x128xf32> to vector<17x128xf32>
    %71 = arith.addf %68, %70 : vector<17x128xf32>
    %cst_28 = arith.constant 0.000000e+00 : f32
    %72 = vector.broadcast %cst_28 : f32 to vector<17x128xf32>
    %73 = arith.maximumf %71, %72 : vector<17x128xf32>
    %c0_29 = arith.constant 0 : index
    %c0_30 = arith.constant 0 : index
    %74 = vector.load %arg7[%c0_29, %c0_30] : memref<896x16xbf16, #tpu.memory_space<vmem>>, vector<128x16xbf16>
    %c0_31 = arith.constant 0 : index
    %c0_32 = arith.constant 0 : index
    %75 = vector.load %arg8[%c0_31, %c0_32] : memref<64x256xbf16, #tpu.memory_space<vmem>>, vector<16x256xbf16>
    %cst_33 = arith.constant dense<0.000000e+00> : vector<128xf32>
    %76 = vector.multi_reduction <add>, %73, %cst_33 [0] : vector<17x128xf32> to vector<128xf32>
    %77 = vector.shape_cast %76 : vector<128xf32> to vector<1x128xf32>
    %cst_34 = arith.constant 1.700000e+01 : f32
    %78 = vector.broadcast %cst_34 : f32 to vector<1x128xf32>
    %79 = arith.divf %77, %78 : vector<1x128xf32>
    %80 = arith.truncf %79 : vector<1x128xf32> to vector<1x128xbf16>
    %cst_35 = arith.constant dense<0.000000e+00> : vector<1x16xf32>
    %81 = tpu.matmul %80, %74, %cst_35 {dimension_numbers = #tpu.dot_dimension_numbers<[1], [0], [0], [1], [0, 0, 1, 1], [], []>} : vector<1x128xbf16>, vector<128x16xbf16>, vector<1x16xf32> -> vector<1x16xf32>
    %82 = vector.extract_strided_slice %0 {offsets = [10, 0], sizes = [1, 16], strides = [1, 1]} : vector<24x256xf32> to vector<1x16xf32>
    %83 = arith.addf %81, %82 : vector<1x16xf32>
    %cst_36 = arith.constant 0.000000e+00 : f32
    %84 = vector.broadcast %cst_36 : f32 to vector<1x16xf32>
    %85 = arith.maximumf %83, %84 : vector<1x16xf32>
    %86 = arith.truncf %85 : vector<1x16xf32> to vector<1x16xbf16>
    %cst_37 = arith.constant dense<0.000000e+00> : vector<1x256xf32>
    %87 = tpu.matmul %86, %75, %cst_37 {dimension_numbers = #tpu.dot_dimension_numbers<[1], [0], [0], [1], [0, 0, 1, 1], [], []>} : vector<1x16xbf16>, vector<16x256xbf16>, vector<1x256xf32> -> vector<1x256xf32>
    %88 = vector.extract_strided_slice %0 {offsets = [11, 0], sizes = [1, 256], strides = [1, 1]} : vector<24x256xf32> to vector<1x256xf32>
    %89 = arith.addf %87, %88 : vector<1x256xf32>
    %90 = arith.negf %89 : vector<1x256xf32>
    %91 = math.exp %90 : vector<1x256xf32>
    %cst_38 = arith.constant 1.000000e+00 : f32
    %92 = vector.broadcast %cst_38 : f32 to vector<1x256xf32>
    %93 = arith.addf %92, %91 : vector<1x256xf32>
    %94 = arith.divf %92, %93 : vector<1x256xf32>
    %95 = vector.extract_strided_slice %94 {offsets = [0, 0], sizes = [1, 128], strides = [1, 1]} : vector<1x256xf32> to vector<1x128xf32>
    %96 = vector.broadcast %95 : vector<1x128xf32> to vector<17x128xf32>
    %97 = arith.mulf %73, %96 : vector<17x128xf32>
    %c0_39 = arith.constant 0 : index
    %c0_40 = arith.constant 0 : index
    %98 = vector.load %arg6[%c0_39, %c0_40] : memref<2176x256xbf16, #tpu.memory_space<vmem>>, vector<640x256xbf16>
    %99 = vector.extract_strided_slice %0 {offsets = [7, 0], sizes = [1, 256], strides = [1, 1]} : vector<24x256xf32> to vector<1x256xf32>
    %c8_41 = arith.constant 8 : index
    %c0_42 = arith.constant 0 : index
    %100 = vector.load %arg13[%c8_41, %c0_42] : memref<32x256xf32, #tpu.memory_space<vmem>>, vector<17x128xf32>
    tpu.vector_store %arg13[%c8_41, %c0_42], %97 {strides = array<i32>} : memref<32x256xf32, #tpu.memory_space<vmem>>, vector<17x128xf32>,
    %c6 = arith.constant 6 : index
    %c0_43 = arith.constant 0 : index
    %101 = vector.load %arg13[%c6, %c0_43] : memref<32x256xf32, #tpu.memory_space<vmem>>, vector<17x128xf32>
    %c7 = arith.constant 7 : index
    %c0_44 = arith.constant 0 : index
    %102 = vector.load %arg13[%c7, %c0_44] : memref<32x256xf32, #tpu.memory_space<vmem>>, vector<17x128xf32>
    %c8_45 = arith.constant 8 : index
    %c0_46 = arith.constant 0 : index
    %103 = vector.load %arg13[%c8_45, %c0_46] : memref<32x256xf32, #tpu.memory_space<vmem>>, vector<17x128xf32>
    %c9 = arith.constant 9 : index
    %c0_47 = arith.constant 0 : index
    %104 = vector.load %arg13[%c9, %c0_47] : memref<32x256xf32, #tpu.memory_space<vmem>>, vector<17x128xf32>
    %c10 = arith.constant 10 : index
    %c0_48 = arith.constant 0 : index
    %105 = vector.load %arg13[%c10, %c0_48] : memref<32x256xf32, #tpu.memory_space<vmem>>, vector<17x128xf32>
    %106 = tpu.concatenate %101, %102, %103, %104, %105 in 1 : vector<17x128xf32>, vector<17x128xf32>, vector<17x128xf32>, vector<17x128xf32>, vector<17x128xf32> -> vector<17x640xf32>
    %107 = arith.truncf %106 : vector<17x640xf32> to vector<17x640xbf16>
    %cst_49 = arith.constant dense<0.000000e+00> : vector<17x256xf32>
    %108 = tpu.matmul %107, %98, %cst_49 {dimension_numbers = #tpu.dot_dimension_numbers<[1], [0], [0], [1], [0, 0, 1, 1], [], []>} : vector<17x640xbf16>, vector<640x256xbf16>, vector<17x256xf32> -> vector<17x256xf32>
    %109 = vector.broadcast %99 : vector<1x256xf32> to vector<17x256xf32>
    %110 = arith.addf %108, %109 : vector<17x256xf32>
    %cst_50 = arith.constant 0.000000e+00 : f32
    %111 = vector.broadcast %cst_50 : f32 to vector<17x256xf32>
    %112 = arith.maximumf %110, %111 : vector<17x256xf32>
    %c128 = arith.constant 128 : index
    %c0_51 = arith.constant 0 : index
    %113 = vector.load %arg7[%c128, %c0_51] : memref<896x16xbf16, #tpu.memory_space<vmem>>, vector<256x16xbf16>
    %c16_52 = arith.constant 16 : index
    %c0_53 = arith.constant 0 : index
    %114 = vector.load %arg8[%c16_52, %c0_53] : memref<64x256xbf16, #tpu.memory_space<vmem>>, vector<16x256xbf16>
    %cst_54 = arith.constant dense<0.000000e+00> : vector<256xf32>
    %115 = vector.multi_reduction <add>, %112, %cst_54 [0] : vector<17x256xf32> to vector<256xf32>
    %116 = vector.shape_cast %115 : vector<256xf32> to vector<1x256xf32>
    %cst_55 = arith.constant 1.700000e+01 : f32
    %117 = vector.broadcast %cst_55 : f32 to vector<1x256xf32>
    %118 = arith.divf %116, %117 : vector<1x256xf32>
    %119 = arith.truncf %118 : vector<1x256xf32> to vector<1x256xbf16>
    %cst_56 = arith.constant dense<0.000000e+00> : vector<1x16xf32>
    %120 = tpu.matmul %119, %113, %cst_56 {dimension_numbers = #tpu.dot_dimension_numbers<[1], [0], [0], [1], [0, 0, 1, 1], [], []>} : vector<1x256xbf16>, vector<256x16xbf16>, vector<1x16xf32> -> vector<1x16xf32>
    %121 = vector.extract_strided_slice %0 {offsets = [12, 0], sizes = [1, 16], strides = [1, 1]} : vector<24x256xf32> to vector<1x16xf32>
    %122 = arith.addf %120, %121 : vector<1x16xf32>
    %cst_57 = arith.constant 0.000000e+00 : f32
    %123 = vector.broadcast %cst_57 : f32 to vector<1x16xf32>
    %124 = arith.maximumf %122, %123 : vector<1x16xf32>
    %125 = arith.truncf %124 : vector<1x16xf32> to vector<1x16xbf16>
    %cst_58 = arith.constant dense<0.000000e+00> : vector<1x256xf32>
    %126 = tpu.matmul %125, %114, %cst_58 {dimension_numbers = #tpu.dot_dimension_numbers<[1], [0], [0], [1], [0, 0, 1, 1], [], []>} : vector<1x16xbf16>, vector<16x256xbf16>, vector<1x256xf32> -> vector<1x256xf32>
    %127 = vector.extract_strided_slice %0 {offsets = [13, 0], sizes = [1, 256], strides = [1, 1]} : vector<24x256xf32> to vector<1x256xf32>
    %128 = arith.addf %126, %127 : vector<1x256xf32>
    %129 = arith.negf %128 : vector<1x256xf32>
    %130 = math.exp %129 : vector<1x256xf32>
    %cst_59 = arith.constant 1.000000e+00 : f32
    %131 = vector.broadcast %cst_59 : f32 to vector<1x256xf32>
    %132 = arith.addf %131, %130 : vector<1x256xf32>
    %133 = arith.divf %131, %132 : vector<1x256xf32>
    %134 = vector.broadcast %133 : vector<1x256xf32> to vector<17x256xf32>
    %135 = arith.mulf %112, %134 : vector<17x256xf32>
    %c640 = arith.constant 640 : index
    %c0_60 = arith.constant 0 : index
    %136 = vector.load %arg6[%c640, %c0_60] : memref<2176x256xbf16, #tpu.memory_space<vmem>>, vector<768x256xbf16>
    %137 = vector.extract_strided_slice %0 {offsets = [8, 0], sizes = [1, 256], strides = [1, 1]} : vector<24x256xf32> to vector<1x256xf32>
    %c8_61 = arith.constant 8 : index
    %c0_62 = arith.constant 0 : index
    %138 = vector.load %arg13[%c8_61, %c0_62] : memref<32x256xf32, #tpu.memory_space<vmem>>, vector<17x256xf32>
    tpu.vector_store %arg13[%c8_61, %c0_62], %135 {strides = array<i32>} : memref<32x256xf32, #tpu.memory_space<vmem>>, vector<17x256xf32>,
    %c7_63 = arith.constant 7 : index
    %c0_64 = arith.constant 0 : index
    %139 = vector.load %arg13[%c7_63, %c0_64] : memref<32x256xf32, #tpu.memory_space<vmem>>, vector<17x256xf32>
    %c8_65 = arith.constant 8 : index
    %c0_66 = arith.constant 0 : index
    %140 = vector.load %arg13[%c8_65, %c0_66] : memref<32x256xf32, #tpu.memory_space<vmem>>, vector<17x256xf32>
    %c9_67 = arith.constant 9 : index
    %c0_68 = arith.constant 0 : index
    %141 = vector.load %arg13[%c9_67, %c0_68] : memref<32x256xf32, #tpu.memory_space<vmem>>, vector<17x256xf32>
    %142 = tpu.concatenate %139, %140, %141 in 1 : vector<17x256xf32>, vector<17x256xf32>, vector<17x256xf32> -> vector<17x768xf32>
    %143 = arith.truncf %142 : vector<17x768xf32> to vector<17x768xbf16>
    %cst_69 = arith.constant dense<0.000000e+00> : vector<17x256xf32>
    %144 = tpu.matmul %143, %136, %cst_69 {dimension_numbers = #tpu.dot_dimension_numbers<[1], [0], [0], [1], [0, 0, 1, 1], [], []>} : vector<17x768xbf16>, vector<768x256xbf16>, vector<17x256xf32> -> vector<17x256xf32>
    %145 = vector.broadcast %137 : vector<1x256xf32> to vector<17x256xf32>
    %146 = arith.addf %144, %145 : vector<17x256xf32>
    %cst_70 = arith.constant 0.000000e+00 : f32
    %147 = vector.broadcast %cst_70 : f32 to vector<17x256xf32>
    %148 = arith.maximumf %146, %147 : vector<17x256xf32>
    %c384 = arith.constant 384 : index
    %c0_71 = arith.constant 0 : index
    %149 = vector.load %arg7[%c384, %c0_71] : memref<896x16xbf16, #tpu.memory_space<vmem>>, vector<256x16xbf16>
    %c32 = arith.constant 32 : index
    %c0_72 = arith.constant 0 : index
    %150 = vector.load %arg8[%c32, %c0_72] : memref<64x256xbf16, #tpu.memory_space<vmem>>, vector<16x256xbf16>
    %cst_73 = arith.constant dense<0.000000e+00> : vector<256xf32>
    %151 = vector.multi_reduction <add>, %148, %cst_73 [0] : vector<17x256xf32> to vector<256xf32>
    %152 = vector.shape_cast %151 : vector<256xf32> to vector<1x256xf32>
    %cst_74 = arith.constant 1.700000e+01 : f32
    %153 = vector.broadcast %cst_74 : f32 to vector<1x256xf32>
    %154 = arith.divf %152, %153 : vector<1x256xf32>
    %155 = arith.truncf %154 : vector<1x256xf32> to vector<1x256xbf16>
    %cst_75 = arith.constant dense<0.000000e+00> : vector<1x16xf32>
    %156 = tpu.matmul %155, %149, %cst_75 {dimension_numbers = #tpu.dot_dimension_numbers<[1], [0], [0], [1], [0, 0, 1, 1], [], []>} : vector<1x256xbf16>, vector<256x16xbf16>, vector<1x16xf32> -> vector<1x16xf32>
    %157 = vector.extract_strided_slice %0 {offsets = [14, 0], sizes = [1, 16], strides = [1, 1]} : vector<24x256xf32> to vector<1x16xf32>
    %158 = arith.addf %156, %157 : vector<1x16xf32>
    %cst_76 = arith.constant 0.000000e+00 : f32
    %159 = vector.broadcast %cst_76 : f32 to vector<1x16xf32>
    %160 = arith.maximumf %158, %159 : vector<1x16xf32>
    %161 = arith.truncf %160 : vector<1x16xf32> to vector<1x16xbf16>
    %cst_77 = arith.constant dense<0.000000e+00> : vector<1x256xf32>
    %162 = tpu.matmul %161, %150, %cst_77 {dimension_numbers = #tpu.dot_dimension_numbers<[1], [0], [0], [1], [0, 0, 1, 1], [], []>} : vector<1x16xbf16>, vector<16x256xbf16>, vector<1x256xf32> -> vector<1x256xf32>
    %163 = vector.extract_strided_slice %0 {offsets = [15, 0], sizes = [1, 256], strides = [1, 1]} : vector<24x256xf32> to vector<1x256xf32>
    %164 = arith.addf %162, %163 : vector<1x256xf32>
    %165 = arith.negf %164 : vector<1x256xf32>
    %166 = math.exp %165 : vector<1x256xf32>
    %cst_78 = arith.constant 1.000000e+00 : f32
    %167 = vector.broadcast %cst_78 : f32 to vector<1x256xf32>
    %168 = arith.addf %167, %166 : vector<1x256xf32>
    %169 = arith.divf %167, %168 : vector<1x256xf32>
    %170 = vector.broadcast %169 : vector<1x256xf32> to vector<17x256xf32>
    %171 = arith.mulf %148, %170 : vector<17x256xf32>
    %c1408 = arith.constant 1408 : index
    %c0_79 = arith.constant 0 : index
    %172 = vector.load %arg6[%c1408, %c0_79] : memref<2176x256xbf16, #tpu.memory_space<vmem>>, vector<768x256xbf16>
    %173 = vector.extract_strided_slice %0 {offsets = [9, 0], sizes = [1, 256], strides = [1, 1]} : vector<24x256xf32> to vector<1x256xf32>
    %c8_80 = arith.constant 8 : index
    %c0_81 = arith.constant 0 : index
    %174 = vector.load %arg13[%c8_80, %c0_81] : memref<32x256xf32, #tpu.memory_space<vmem>>, vector<17x256xf32>
    tpu.vector_store %arg13[%c8_80, %c0_81], %171 {strides = array<i32>} : memref<32x256xf32, #tpu.memory_space<vmem>>, vector<17x256xf32>,
    %c7_82 = arith.constant 7 : index
    %c0_83 = arith.constant 0 : index
    %175 = vector.load %arg13[%c7_82, %c0_83] : memref<32x256xf32, #tpu.memory_space<vmem>>, vector<17x256xf32>
    %c8_84 = arith.constant 8 : index
    %c0_85 = arith.constant 0 : index
    %176 = vector.load %arg13[%c8_84, %c0_85] : memref<32x256xf32, #tpu.memory_space<vmem>>, vector<17x256xf32>
    %c9_86 = arith.constant 9 : index
    %c0_87 = arith.constant 0 : index
    %177 = vector.load %arg13[%c9_86, %c0_87] : memref<32x256xf32, #tpu.memory_space<vmem>>, vector<17x256xf32>
    %178 = tpu.concatenate %175, %176, %177 in 1 : vector<17x256xf32>, vector<17x256xf32>, vector<17x256xf32> -> vector<17x768xf32>
    %179 = arith.truncf %178 : vector<17x768xf32> to vector<17x768xbf16>
    %cst_88 = arith.constant dense<0.000000e+00> : vector<17x256xf32>
    %180 = tpu.matmul %179, %172, %cst_88 {dimension_numbers = #tpu.dot_dimension_numbers<[1], [0], [0], [1], [0, 0, 1, 1], [], []>} : vector<17x768xbf16>, vector<768x256xbf16>, vector<17x256xf32> -> vector<17x256xf32>
    %181 = vector.broadcast %173 : vector<1x256xf32> to vector<17x256xf32>
    %182 = arith.addf %180, %181 : vector<17x256xf32>
    %cst_89 = arith.constant 0.000000e+00 : f32
    %183 = vector.broadcast %cst_89 : f32 to vector<17x256xf32>
    %184 = arith.maximumf %182, %183 : vector<17x256xf32>
    %c640_90 = arith.constant 640 : index
    %c0_91 = arith.constant 0 : index
    %185 = vector.load %arg7[%c640_90, %c0_91] : memref<896x16xbf16, #tpu.memory_space<vmem>>, vector<256x16xbf16>
    %c48 = arith.constant 48 : index
    %c0_92 = arith.constant 0 : index
    %186 = vector.load %arg8[%c48, %c0_92] : memref<64x256xbf16, #tpu.memory_space<vmem>>, vector<16x256xbf16>
    %cst_93 = arith.constant dense<0.000000e+00> : vector<256xf32>
    %187 = vector.multi_reduction <add>, %184, %cst_93 [0] : vector<17x256xf32> to vector<256xf32>
    %188 = vector.shape_cast %187 : vector<256xf32> to vector<1x256xf32>
    %cst_94 = arith.constant 1.700000e+01 : f32
    %189 = vector.broadcast %cst_94 : f32 to vector<1x256xf32>
    %190 = arith.divf %188, %189 : vector<1x256xf32>
    %191 = arith.truncf %190 : vector<1x256xf32> to vector<1x256xbf16>
    %cst_95 = arith.constant dense<0.000000e+00> : vector<1x16xf32>
    %192 = tpu.matmul %191, %185, %cst_95 {dimension_numbers = #tpu.dot_dimension_numbers<[1], [0], [0], [1], [0, 0, 1, 1], [], []>} : vector<1x256xbf16>, vector<256x16xbf16>, vector<1x16xf32> -> vector<1x16xf32>
    %193 = vector.extract_strided_slice %0 {offsets = [16, 0], sizes = [1, 16], strides = [1, 1]} : vector<24x256xf32> to vector<1x16xf32>
    %194 = arith.addf %192, %193 : vector<1x16xf32>
    %cst_96 = arith.constant 0.000000e+00 : f32
    %195 = vector.broadcast %cst_96 : f32 to vector<1x16xf32>
    %196 = arith.maximumf %194, %195 : vector<1x16xf32>
    %197 = arith.truncf %196 : vector<1x16xf32> to vector<1x16xbf16>
    %cst_97 = arith.constant dense<0.000000e+00> : vector<1x256xf32>
    %198 = tpu.matmul %197, %186, %cst_97 {dimension_numbers = #tpu.dot_dimension_numbers<[1], [0], [0], [1], [0, 0, 1, 1], [], []>} : vector<1x16xbf16>, vector<16x256xbf16>, vector<1x256xf32> -> vector<1x256xf32>
    %199 = vector.extract_strided_slice %0 {offsets = [17, 0], sizes = [1, 256], strides = [1, 1]} : vector<24x256xf32> to vector<1x256xf32>
    %200 = arith.addf %198, %199 : vector<1x256xf32>
    %201 = arith.negf %200 : vector<1x256xf32>
    %202 = math.exp %201 : vector<1x256xf32>
    %cst_98 = arith.constant 1.000000e+00 : f32
    %203 = vector.broadcast %cst_98 : f32 to vector<1x256xf32>
    %204 = arith.addf %203, %202 : vector<1x256xf32>
    %205 = arith.divf %203, %204 : vector<1x256xf32>
    %206 = vector.broadcast %205 : vector<1x256xf32> to vector<17x256xf32>
    %207 = arith.mulf %184, %206 : vector<17x256xf32>
    %cst_99 = arith.constant dense<0.000000e+00> : vector<256xf32>
    %208 = vector.multi_reduction <add>, %207, %cst_99 [0] : vector<17x256xf32> to vector<256xf32>
    %209 = vector.shape_cast %208 : vector<256xf32> to vector<1x256xf32>
    %cst_100 = arith.constant 1.700000e+01 : f32
    %210 = vector.broadcast %cst_100 : f32 to vector<1x256xf32>
    %211 = arith.divf %209, %210 : vector<1x256xf32>
    %c0_101 = arith.constant 0 : index
    %c0_102 = arith.constant 0 : index
    %212 = vector.load %arg9[%c0_101, %c0_102] : memref<256x256xbf16, #tpu.memory_space<vmem>>, vector<256x256xbf16>
    %213 = arith.truncf %211 : vector<1x256xf32> to vector<1x256xbf16>
    %cst_103 = arith.constant dense<0.000000e+00> : vector<1x256xf32>
    %214 = tpu.matmul %213, %212, %cst_103 {dimension_numbers = #tpu.dot_dimension_numbers<[1], [0], [0], [1], [0, 0, 1, 1], [], []>} : vector<1x256xbf16>, vector<256x256xbf16>, vector<1x256xf32> -> vector<1x256xf32>
    %215 = arith.addf %60, %214 : vector<1x256xf32>
    %216 = vector.extract_strided_slice %0 {offsets = [18, 0], sizes = [1, 256], strides = [1, 1]} : vector<24x256xf32> to vector<1x256xf32>
    %217 = arith.addf %215, %216 : vector<1x256xf32>
    %c0_104 = arith.constant 0 : index
    %c0_105 = arith.constant 0 : index
    %218 = vector.load %arg10[%c0_104, %c0_105] : memref<384x128xbf16, #tpu.memory_space<vmem>>, vector<256x128xbf16>
    %219 = arith.truncf %217 : vector<1x256xf32> to vector<1x256xbf16>
    %cst_106 = arith.constant dense<0.000000e+00> : vector<1x128xf32>
    %220 = tpu.matmul %219, %218, %cst_106 {dimension_numbers = #tpu.dot_dimension_numbers<[1], [0], [0], [1], [0, 0, 1, 1], [], []>} : vector<1x256xbf16>, vector<256x128xbf16>, vector<1x128xf32> -> vector<1x128xf32>
    %221 = vector.extract_strided_slice %0 {offsets = [19, 0], sizes = [1, 128], strides = [1, 1]} : vector<24x256xf32> to vector<1x128xf32>
    %222 = arith.addf %220, %221 : vector<1x128xf32>
    %c256 = arith.constant 256 : index
    %c0_107 = arith.constant 0 : index
    %223 = vector.load %arg10[%c256, %c0_107] : memref<384x128xbf16, #tpu.memory_space<vmem>>, vector<128x128xbf16>
    %224 = arith.truncf %222 : vector<1x128xf32> to vector<1x128xbf16>
    %cst_108 = arith.constant dense<0.000000e+00> : vector<1x128xf32>
    %225 = tpu.matmul %224, %223, %cst_108 {dimension_numbers = #tpu.dot_dimension_numbers<[1], [0], [0], [1], [0, 0, 1, 1], [], []>} : vector<1x128xbf16>, vector<128x128xbf16>, vector<1x128xf32> -> vector<1x128xf32>
    %226 = vector.extract_strided_slice %0 {offsets = [20, 0], sizes = [1, 128], strides = [1, 1]} : vector<24x256xf32> to vector<1x128xf32>
    %227 = arith.addf %225, %226 : vector<1x128xf32>
    %c0_109 = arith.constant 0 : index
    %c0_110 = arith.constant 0 : index
    %228 = vector.load %arg12[%c0_109, %c0_110] : memref<1x128xf32, #tpu.memory_space<vmem>>, vector<1x128xf32>
    tpu.vector_store %arg12[%c0_109, %c0_110], %227 {strides = array<i32>} : memref<1x128xf32, #tpu.memory_space<vmem>>, vector<1x128xf32>,
    return
  }
}

</mosaic_0001>

<bundles_post_ra>
// kernel: personality_forward.1
= control target key start
LH: loop header
LB: loop body
LE: loop exit
PB: predicated region body
PF: predicated region fallthrough
CT: control target
= control target key end

     0   :  { %17 = vsyncpa [#allocation4], 0  ;;  %s7212_s0 = inlined_call_operand.vmem [shape: f32[1,8], index: 0, kind: input, shape index: {}]   ;;  %s7213_s1 = inlined_call_operand.vmem [shape: f32[1,32], index: 1, kind: input, shape index: {}]   ;;  %s7214_s2 = inlined_call_operand.vmem [shape: f32[17,64], index: 2, kind: input, shape index: {}]   ;;  %s7215_s3 = inlined_call_operand.vmem [shape: f32[72,32], index: 3, kind: input, shape index: {}]   ;;  %s7216_s4 = inlined_call_operand.hbm [shape: bf16[32,768], index: 4, kind: input, shape index: {}]   ;;  %s7217_s5 = inlined_call_operand.hbm [shape: bf16[64,128], index: 5, kind: input, shape index: {}]   ;;  %s7218_s6 = inlined_call_operand.hbm [shape: bf16[2176,256], index: 6, kind: input, shape index: {}]   ;;  %s7219_s7 = inlined_call_operand.vmem [shape: bf16[896,16], index: 7, kind: input, shape index: {}]   ;;  %s7220_s8 = inlined_call_operand.hbm [shape: bf16[64,256], index: 8, kind: input, shape index: {}]   ;;  %s7221_s9 = inlined_call_operand.hbm [shape: bf16[256,256], index: 9, kind: input, shape index: {}]   ;;  %s7222_s10 = inlined_call_operand.hbm [shape: bf16[384,128], index: 10, kind: input, shape index: {}]   ;;  %s7223_s11 = inlined_call_operand.hbm [shape: f32[24,256], index: 11, kind: input, shape index: {}]   ;;  %s7224_s12 = inlined_call_operand.hbm [shape: f32[1,128], index: 12, kind: output, shape index: {}]  }
   0x1   :  { %18 = vsyncpa [#allocation7], 0 }
   0x2   :  { %19 = vsyncpa [#allocation10], 0 }
   0x3   :  { %20 = vsyncpa [#allocation13], 0 }
   0x4   :  { %21 = vsyncpa [#allocation5], 0  ;;  %s6429_s21 = smov [#allocation6]   ;;  %s6243_s25 = scalar_lea.hbm %s7217_s5, 512 }
   0x5   :  { %s47_s22 = sshll.u32 %s6429_s21, 4  ;;  %p6244_p0 = scmp.ne.s32.totalorder %s7217_s5, %s6243_s25  ;;  %s48_s22 = int_to_ptr.vmem [resolvable:$true] %s47_s22 }
   0x6   :  { %p6247_p1 = scmp.lt.u32.totalorder %s6243_s25, %s7217_s5 }
   0x8   :  { %p6249_p2 = pnand %p6247_p1, %p6244_p0 }
   0xa   :  { %6252 = shalt.err (!%p6249_p2)
}
   0xb   :  { %s6253_s30 = scalar_lea.vmem %s48_s22, 512  ;;  %p6258_p4 = scmp.lt.s32.totalorder %s48_s22, %s48_s22 }
   0xc   :  { %p6254_p3 = scmp.ne.s32.totalorder %s48_s22, %s6253_s30  ;;  %p6259_p5 = scmp.lt.s32.totalorder %s6253_s30, %s6253_s30 }
   0xe   :  { %p6260_p6 = por %p6259_p5, %p6258_p4 }
  0x10   :  { %p6261_p7 = pnand %p6260_p6, %p6254_p3 }
  0x12   :  { %6264 = shalt.err (!%p6261_p7)
}
  0x13   :  { %s6430_s13 = smov 64   ;;  %s6431_s14 = smov 4  }
  0x14   :  { %53 = dma.hbm_to_vmem [thread:$0]  %s7217_s5, 512, %s48_s22, [#allocation7], %s6430_s13, %s6430_s13, %s6431_s14  }
  0x15   :  { %s6432_s17 = smov [#allocation9]   ;;  %s6433_s19 = smov [#allocation12]  }
  0x16   :  { %s73_s18 = sshll.u32 %s6432_s17, 4  ;;  %s97_s20 = sshll.u32 %s6433_s19, 4  ;;  %s74_s18 = int_to_ptr.vmem [resolvable:$true] %s73_s18  ;;  %s98_s20 = int_to_ptr.vmem [resolvable:$true] %s97_s20 }
  0x17   :  { %s6265_s24 = scalar_lea.hbm %s7220_s8, 1024 }
  0x18   :  { %p6266_p8 = scmp.ne.s32.totalorder %s7220_s8, %s6265_s24  ;;  %p6269_p9 = scmp.lt.u32.totalorder %s6265_s24, %s7220_s8 }
  0x1a   :  { %p6271_p10 = pnand %p6269_p9, %p6266_p8 }
  0x1c   :  { %6274 = shalt.err (!%p6271_p10)
}
  0x1d   :  { %s6275_s5 = scalar_lea.vmem %s74_s18, 1024  ;;  %p6280_p12 = scmp.lt.s32.totalorder %s74_s18, %s74_s18 }
  0x1e   :  { %p6276_p11 = scmp.ne.s32.totalorder %s74_s18, %s6275_s5  ;;  %p6281_p13 = scmp.lt.s32.totalorder %s6275_s5, %s6275_s5 }
  0x20   :  { %p6282_p0 = por %p6281_p13, %p6280_p12 }
  0x22   :  { %p6283_p1 = pnand %p6282_p0, %p6276_p11 }
  0x24   :  { %6286 = shalt.err (!%p6283_p1)
}
  0x25   :  { %s6434_s22 = smov 128   ;;  %s6435_s29 = smov 8  }
  0x26   :  { %79 = dma.hbm_to_vmem [thread:$0]  %s7220_s8, 1024, %s74_s18, [#allocation10], %s6434_s22, %s6434_s22, %s6435_s29  }
  0x27   :  { %s6287_s19 = scalar_lea.hbm %s7222_s10, 3072 }
  0x28   :  { %p6288_p2 = scmp.ne.s32.totalorder %s7222_s10, %s6287_s19  ;;  %p6291_p3 = scmp.lt.u32.totalorder %s6287_s19, %s7222_s10 }
  0x2a   :  { %p6293_p4 = pnand %p6291_p3, %p6288_p2 }
  0x2c   :  { %6296 = shalt.err (!%p6293_p4)
}
  0x2d   :  { %s6297_s26 = scalar_lea.vmem %s98_s20, 3072  ;;  %p6302_p6 = scmp.lt.s32.totalorder %s98_s20, %s98_s20 }
  0x2e   :  { %p6298_p5 = scmp.ne.s32.totalorder %s98_s20, %s6297_s26  ;;  %p6303_p7 = scmp.lt.s32.totalorder %s6297_s26, %s6297_s26 }
  0x30   :  { %p6304_p8 = por %p6303_p7, %p6302_p6 }
  0x32   :  { %p6305_p9 = pnand %p6304_p8, %p6298_p5 }
  0x34   :  { %6308 = shalt.err (!%p6305_p9)
}
  0x35   :  { %103 = dma.hbm_to_vmem [thread:$0]  %s7222_s10, 3072, %s98_s20, [#allocation13], %s6430_s13, %s6430_s13, %s6431_s14  }
  0x36   :  { %s6436_s27 = smov [#allocation3]   ;;  %s6309_s15 = scalar_lea.hbm %s7216_s4, 1536 }
  0x37   :  { %s35_s28 = sshll.u32 %s6436_s27, 4  ;;  %p6310_p10 = scmp.ne.s32.totalorder %s7216_s4, %s6309_s15  ;;  %s36_s28 = int_to_ptr.vmem [resolvable:$true] %s35_s28 }
  0x38   :  { %p6313_p11 = scmp.lt.u32.totalorder %s6309_s15, %s7216_s4 }
  0x3a   :  { %p6315_p12 = pnand %p6313_p11, %p6310_p10 }
  0x3c   :  { %6318 = shalt.err (!%p6315_p12)
}
  0x3d   :  { %s6319_s23 = scalar_lea.vmem %s36_s28, 1536  ;;  %p6324_p0 = scmp.lt.s32.totalorder %s36_s28, %s36_s28 }
  0x3e   :  { %p6320_p13 = scmp.ne.s32.totalorder %s36_s28, %s6319_s23  ;;  %p6325_p1 = scmp.lt.s32.totalorder %s6319_s23, %s6319_s23 }
  0x40   :  { %p6326_p2 = por %p6325_p1, %p6324_p0 }
  0x42   :  { %p6327_p3 = pnand %p6326_p2, %p6320_p13 }
  0x44   :  { %6330 = shalt.err (!%p6327_p3)
}
  0x45   :  { %s6437_s10 = smov 384   ;;  %s6438_s13 = smov 24  }
  0x46   :  { %41 = dma.hbm_to_vmem [thread:$0]  %s7216_s4, 1536, %s36_s28, [#allocation4], %s6437_s10, %s6437_s10, %s6438_s13  }
  0x47   :  { %s6439_s24 = smov [#allocation8]   ;;  %s6440_s26 = smov [#allocation11]  }
  0x48   :  { %s59_s25 = sshll.u32 %s6439_s24, 4  ;;  %s85_s8 = sshll.u32 %s6440_s26, 4  ;;  %s60_s25 = int_to_ptr.vmem [resolvable:$true] %s59_s25  ;;  %s6570_s8 = int_to_ptr.vmem [resolvable:$true] %s85_s8 }
  0x49   :  { %s6331_s5 = scalar_lea.hbm %s7218_s6, 34816 }
  0x4a   :  { %p6332_p4 = scmp.ne.s32.totalorder %s7218_s6, %s6331_s5  ;;  %p6335_p5 = scmp.lt.u32.totalorder %s6331_s5, %s7218_s6 }
  0x4c   :  { %p6337_p6 = pnand %p6335_p5, %p6332_p4 }
  0x4e   :  { %6340 = shalt.err (!%p6337_p6)
}
  0x4f   :  { %s6341_s4 = scalar_lea.vmem %s60_s25, 34816  ;;  %p6346_p8 = scmp.lt.s32.totalorder %s60_s25, %s60_s25 }
  0x50   :  { %p6342_p7 = scmp.ne.s32.totalorder %s60_s25, %s6341_s4  ;;  %p6347_p9 = scmp.lt.s32.totalorder %s6341_s4, %s6341_s4 }
  0x52   :  { %p6348_p10 = por %p6347_p9, %p6346_p8 }
  0x54   :  { %p6349_p11 = pnand %p6348_p10, %p6342_p7 }
  0x56   :  { %6352 = shalt.err (!%p6349_p11)
}
  0x57   :  { %65 = dma.hbm_to_vmem [thread:$0]  %s7218_s6, 34816, %s60_s25, [#allocation7], %s6434_s22, %s6434_s22, %s6435_s29  }
  0x58   :  { %s6353_s10 = scalar_lea.hbm %s7221_s9, 4096 }
  0x59   :  { %p6354_p12 = scmp.ne.s32.totalorder %s7221_s9, %s6353_s10  ;;  %p6357_p13 = scmp.lt.u32.totalorder %s6353_s10, %s7221_s9 }
  0x5b   :  { %p6359_p0 = pnand %p6357_p13, %p6354_p12 }
  0x5d   :  { %6362 = shalt.err (!%p6359_p0)
}
  0x5e   :  { %s6363_s26 = scalar_lea.vmem %s6570_s8, 4096  ;;  %p6368_p2 = scmp.lt.s32.totalorder %s6570_s8, %s6570_s8 }
  0x5f   :  { %p6364_p1 = scmp.ne.s32.totalorder %s6570_s8, %s6363_s26  ;;  %p6369_p3 = scmp.lt.s32.totalorder %s6363_s26, %s6363_s26 }
  0x61   :  { %p6370_p4 = por %p6369_p3, %p6368_p2 }
  0x63   :  { %p6371_p5 = pnand %p6370_p4, %p6364_p1 }
  0x65   :  { %6374 = shalt.err (!%p6371_p5)
}
  0x66   :  { %91 = dma.hbm_to_vmem [thread:$0]  %s7221_s9, 4096, %s6570_s8, [#allocation10], %s6434_s22, %s6434_s22, %s6435_s29  }
  0x67   :  { %s6441_s18 = smov [#allocation14]   ;;  %s6375_s15 = scalar_lea.hbm %s7223_s11, 768 }
  0x68   :  { %s109_s27 = sshll.u32 %s6441_s18, 4  ;;  %p6376_p6 = scmp.ne.s32.totalorder %s7223_s11, %s6375_s15  ;;  %s110_s27 = int_to_ptr.vmem [resolvable:$true] %s109_s27 }
  0x69   :  { %p6379_p7 = scmp.lt.u32.totalorder %s6375_s15, %s7223_s11 }
  0x6b   :  { %p6381_p8 = pnand %p6379_p7, %p6376_p6 }
  0x6d   :  { %6384 = shalt.err (!%p6381_p8)
}
  0x6e   :  { %s6385_s19 = scalar_lea.vmem %s110_s27, 768  ;;  %p6390_p10 = scmp.lt.s32.totalorder %s110_s27, %s110_s27 }
  0x6f   :  { %p6386_p9 = scmp.ne.s32.totalorder %s110_s27, %s6385_s19  ;;  %p6391_p11 = scmp.lt.s32.totalorder %s6385_s19, %s6385_s19 }
  0x71   :  { %p6392_p12 = por %p6391_p11, %p6390_p10 }
  0x73   :  { %p6393_p13 = pnand %p6392_p12, %p6386_p9 }
  0x75   :  { %6396 = shalt.err (!%p6393_p13)
}
  0x76   :  { %s6442_s9 = smov 256   ;;  %s6443_s22 = smov 16  }
  0x77   :  { %115 = dma.hbm_to_vmem [thread:$0]  %s7223_s11, 768, %s110_s27, [#allocation13], %s6442_s9, %s6442_s9, %s6443_s22  }
  0x78   :  { %6419 = dma.done.wait [#allocation4], 1536  }
  0x79   :  { %6420 = vsyncadd [#allocation4], 4294965760 }
  0x7a   :  { %6421 = dma.done.wait [#allocation7], 35328  }
  0x7b   :  { %6422 = vsyncadd [#allocation7], 4294931968 }
  0x7c   :  { %6423 = dma.done.wait [#allocation10], 5120  }
  0x7d   :  { %6424 = vsyncadd [#allocation10], 4294962176 }
  0x7e   :  { %6425 = dma.done.wait [#allocation13], 3840  }
  0x7f   :  { %6426 = vsyncadd [#allocation13], 4294963456  ;;  %v6444_v0 = vmov 0.0   ;;  %vm6445_vm0 = vmmov 0   ;;  %v145_v1 = vld [vmem:[%s7215_s3 + $0x8] sm:$0xff]  ;;  %v146_v2 = vld [vmem:[%s7215_s3 + $0x10] sm:$0xff] }
  0x80   :  { %5446 = vmatprep.subr.bf16.mxu0 %v6444_v0  ;;  %581 = vst [vmem:[#allocation2] sm:$0xff] %v6444_v0  ;;  %582 = vst [vmem:[#allocation2 + $0x8] sm:$0xff] %v6444_v0  ;;  %5450 = vmatprep.mubr.msk.bf16.mxu0 %vm6445_vm0, %v6444_v0  ;;  %v147_v3 = vld [vmem:[%s7215_s3 + $0x18] sm:$0xff]  ;;  %v150_v4 = vpack.c.bf16 %v146_v2, %v145_v1  ;;  %v148_v5 = vld [vmem:[%s7215_s3 + $0x20] sm:$0xff]  ;;  %vm155_vm1 = vcmask 261120   ;;  %vm266_vm2 = vcmask 1043456  }
  0x81   :  { %585 = vst [vmem:[#allocation2 + $0x30] sm:$0xff] %v6444_v0  ;;  %586 = vst [vmem:[#allocation2 + $0x38] sm:$0xff] %v6444_v0  ;;  %5454 = vmatprep.subr.bf16.mxu1 %v6444_v0  ;;  %5458 = vmatprep.mubr.msk.bf16.mxu1 %vm6445_vm0, %v6444_v0  ;;  %v144_v6 = vld [vmem:[%s7213_s1] sm:$0x1]  ;;  %v151_v7 = vpack.c.bf16 %v148_v5, %v147_v3  ;;  %v206_v9 = vld [vmem:[%s7215_s3 + $0x28] sm:$0xff]  ;;  %vm262_vm3 = vcmask 64512  }
  0x82   :  { %5447 = vmatpush3.bf16.msra.mxu0 %v150_v4  ;;  %v149_v8 = vpack.c.bf16 %v144_v6, %v144_v6  ;;  %v207_v10 = vld [vmem:[%s7215_s3 + $0x30] sm:$0xff]  ;;  %v208_v12 = vld [vmem:[%s7215_s3 + $0x38] sm:$0xff]  ;;  %v209_v13 = vld [vmem:[%s7215_s3 + $0x40] sm:$0xff]  ;;  %v6446_v43 = vmov 0   ;;  %vm628_vm4 = vcmask 523264   ;;  %vm569_vm5 = vcmask 1040384  }
  0x83   :  { %5448 = vmatprep.subr.bf16.mxu0 %v6444_v0  ;;  %v211_v11 = vpack.c.bf16 %v207_v10, %v206_v9  ;;  %v212_v14 = vpack.c.bf16 %v209_v13, %v208_v12  ;;  %v5611_v15 = vld [vmem:[#allocation3] ss:$24 sps:$4 sm:$0xff]   ;;  %v5613_v16 = vld [vmem:[#allocation3 + $0x4] ss:$24 sps:$4 sm:$0xff]   ;;  %v5616_v33 = vld [vmem:[#allocation3 + $0x14] ss:$24 sps:$4 sm:$0xff]  }
  0x84   :  { %v6649_v17 = vld [vmem:[#allocation14] sm:$0xff]  ;;  %v5614_v37 = vld [vmem:[#allocation3 + $0x10] ss:$24 sps:$4 sm:$0xff]   ;;  %v5619_v38 = vld [vmem:[#allocation3 + $0x34] ss:$24 sps:$4 sm:$0xff]   ;;  %vm822_vm6 = vcmask 130048  }
  0x85   :  { %5455 = vmatpush3.bf16.msra.mxu1 %v211_v11  ;;  %v153_v18 = vrot.slane %v6649_v17, 1  ;;  %v259_v27 = vld [vmem:[%s7215_s3] sm:$0xff]  ;;  %v5617_v39 = vld [vmem:[#allocation3 + $0x30] ss:$24 sps:$4 sm:$0xff]   ;;  %v213_v44 = vrot.slane %v6649_v17, 2  ;;  %v5632_v61 = vld [vmem:[#allocation6 + $0x18] sm:$0xff]  }
  0x86   :  { %5449 = vmatpush3.bf16.msra.mxu0 %v151_v7  ;;  %5456 = vmatprep.subr.bf16.mxu1 %v6444_v0  ;;  %v261_v28 = vpack.c.bf16 %v259_v27, %v259_v27  ;;  %v258_v35 = vld [vmem:[%s7212_s0] sm:$0x1]  ;;  %v5622_v40 = vld [vmem:[#allocation3 + $0x44] ss:$24 sps:$4 sm:$0xff]   ;;  %v5626_v54 = vld [vmem:[#allocation3 + $0x38] ss:$24 sps:$4 sm:$0xff]  }
  0x87   :  { %387 = vmatprep.subr.bf16.mxu0 %v5613_v16  ;;  %v6657_v34 = vld [vmem:[#allocation2] sm:$0xff]  ;;  %v260_v36 = vpack.c.bf16 %v258_v35, %v258_v35  ;;  %v5520_v45 = vadd.f32 %v213_v44, %v6649_v17  ;;  %v5628_v53 = vld [vmem:[#allocation3 + $0x3c] ss:$24 sps:$4 sm:$0xff]   ;;  %v588_v57 = vld [vmem:[%s7214_s2 + $0x8] sm:$0xff]  ;;  %v511_v9 = vrot.slane %v6649_v17, 3  ;;  %vm975_vm7 = vcmask 1046528  }
  0x88   :  { %v268_v32 = vsel %vm266_vm2, %v261_v28, 0  ;;  %v5620_v41 = vld [vmem:[#allocation3 + $0x40] ss:$24 sps:$4 sm:$0xff]   ;;  %v5625_v42 = vld [vmem:[#allocation3 + $0xc] ss:$24 sps:$4 sm:$0xff]   ;;  %v5631_v60 = vld [vmem:[#allocation6 + $0x10] sm:$0xff]  }
  0x89   :  { %5451 = vmatmul.mubr.msk.bf16.vlgmr.msra.gmra.mrb[0].mxu0 %vm155_vm1, %v149_v8  ;;  %5457 = vmatpush3.bf16.msra.mxu1 %v212_v14  ;;  %v5623_v50 = vld [vmem:[#allocation3 + $0x8] ss:$24 sps:$4 sm:$0xff]   ;;  %v589_v62 = vld [vmem:[%s7214_s2 + $0x10] sm:$0x1]  ;;  %v5636_v3 = vld [vmem:[%s7219_s7 + $0x18] sm:$0xff]   ;;  %v537_v14 = vrot.slane %v6649_v17, 5 }
  0x8a   :  { %5462 = vmatprep.subr.bf16.mxu1 %v6444_v0  ;;  %388 = vmatpush1.bf16.msra.mxu0 %v5611_v15  ;;  %v5629_v55 = vld [vmem:[#allocation6] sm:$0xff]   ;;  %v5630_v59 = vld [vmem:[#allocation6 + $0x8] sm:$0xff]   ;;  %v599_v63 = vpack.c.bf16 %v589_v62, %v589_v62  ;;  %v5635_v2 = vld [vmem:[%s7219_s7 + $0x10] sm:$0xff]   ;;  %vm985_vm8 = vcmask 1045504   ;;  %vm996_vm9 = vcmask 1044480  }
  0x8b   :  { %389 = vmatprep.subr.bf16.mxu0 %v5619_v38  ;;  %419 = vmatprep.mubr.bf16.mxu0 %v6446_v43  ;;  %v587_v56 = vld [vmem:[%s7214_s2] sm:$0xff]  ;;  %v5634_v1 = vld [vmem:[%s7219_s7 + $0x8] sm:$0xff]   ;;  %v5639_v6 = vld [vmem:[%s7219_s7 + $0x30] sm:$0xff]   ;;  %vm2088_vm10 = vsmask.f32 4352 }
  0x8c   :  { %v598_v58 = vpack.c.bf16 %v588_v57, %v587_v56  ;;  %v5633_v0 = vld [vmem:[%s7219_s7] sm:$0xff]   ;;  %v5638_v5 = vld [vmem:[%s7219_s7 + $0x28] sm:$0xff]   ;;  %v5640_v7 = vld [vmem:[%s7219_s7 + $0x38] sm:$0xff]  }
  0x8d   :  { %v5637_v4 = vld [vmem:[%s7219_s7 + $0x20] sm:$0xff]   ;;  %v6716_v8 = vld [vmem:[#allocation14 + $0x8] sm:$0xff] }
  0x8e   :  { %390 = vmatpush1.bf16.msra.mxu0 %v5617_v39  ;;  %v512_v10 = vrot.slane %v6716_v8, 3  ;;  %v530_v35 = vrot.slane %v6716_v8, 4 }
  0x8f   :  { %428 = vmatprep.subr.bf16.mxu0 %v5625_v42 }
 0x15c   :  { %v193_v19 = vpop.f32.mrb[0].mxu0 }
 0x15d   :  { %v194_v20 = vadd.f32 %v193_v19, %v153_v18  ;;  %v5452_v21 = vpop.f32.mrb[1].mxu0 }
 0x15e   :  { %v196_v22 = vpop.f32.mrb[2].mxu0 }
 0x15f   :  { %v4895_v23 = vmul.f32 -1.442695, %v194_v20  ;;  %v5453_v24 = vpop.f32.mrb[3].mxu0  ;;  %v538_v22 = vrot.slane %v6716_v8, 5 }
 0x161   :  { %6181 = vpow2.f32 %v4895_v23 }
 0x16b   :  { %v6182_v25 = vpop.eup %6181 }
 0x16c   :  { %v202_v26 = vadd.f32 1.0, %v6182_v25 }
 0x16e   :  { %6183 = vrcp.f32 %v202_v26 }
 0x178   :  { %v6184_v29 = vpop.eup %6183 }
 0x179   :  { %v205_v30 = vmul.f32 %v6184_v29, %v194_v20 }
 0x17b   :  { %v210_v31 = vpack.c.bf16 %v205_v30, %v205_v30  ;;  %v529_v30 = vrot.slane %v6649_v17, 4 }
 0x17d   :  { %5459 = vmatmul.mubr.msk.bf16.vlgmr.msra.gmra.mrb[0].mxu1 %vm155_vm1, %v210_v31 }
 0x17e   :  { %5463 = vmatpush3.bf16.msra.mxu1 %v268_v32  ;;  %5464 = vmatprep.mubr.msk.bf16.mxu1 %vm6445_vm0, %v6657_v34  ;;  %v600_v32 = vlaneseq }
 0x17f   :  { %469 = vmatprep.subr.bf16.mxu1 %v5616_v33 }
 0x180   :  { %v6724_v38 = vshrl.u32 %v600_v32, 7  ;;  %v5643_v32 = vld [vmem:[#allocation9 + $0x4] ss:$8 sps:$4 sm:$0xff]  }
 0x182   :  { %v602_v44 = vsub.s32 6, %v6724_v38 }
 0x189   :  { %5465 = vmatmul.mubr.msk.bf16.vlgmr.msra.gmra.mrb[0].mxu1 %vm262_vm3, %v260_v36 }
 0x18a   :  { %470 = vmatpush1.bf16.msra.mxu1 %v5614_v37  ;;  %501 = vmatprep.mubr.bf16.mxu1 %v6446_v43 }
 0x18b   :  { %471 = vmatprep.subr.bf16.mxu1 %v5622_v40 }
 0x18e   :  { %472 = vmatpush1.bf16.msra.mxu1 %v5620_v41 }
 0x18f   :  { %5480 = vmatprep.subr.bf16.mxu1 %v6657_v34 }
 0x25c   :  { %v304_v46 = vpop.f32.mrb[0].mxu1 }
 0x25d   :  { %v5521_v47 = vadd.f32 %v5520_v45, %v304_v46  ;;  %v5466_v48 = vpop.f32.mrb[1].mxu1  ;;  %v603_v46 = vrot.slane %v6649_v17, %v602_v44  ;;  %v5644_v44 = vld [vmem:[#allocation8] ss:$8 sps:$4 sm:$0xff]  }
 0x25e   :  { %v307_v49 = vpop.f32.mrb[2].mxu1 }
 0x25f   :  { %v323_v51 = vpack.c.bf16 %v5521_v47, %v5521_v47  ;;  %v5467_v52 = vpop.f32.mrb[3].mxu1 }
 0x261   :  { %4910 = vmatmul.mubr.msk.bf16.vlgmr.msra.gmra.mrb[4].mxu0 %vm155_vm1, %v323_v51  ;;  %4912 = vmatmul.mubr.msk.bf16.vlgmr.msra.gmra.mrb[4].mxu1 %vm155_vm1, %v323_v51 }
 0x262   :  { %429 = vmatpush1.bf16.msra.mxu0 %v5623_v50  ;;  %460 = vmatprep.mubr.bf16.mxu0 %v6446_v43 }
 0x263   :  { %430 = vmatprep.subr.bf16.mxu0 %v5628_v53  ;;  %5496 = vmatprep.mubr.msk.bf16.mxu1 %vm6445_vm0, %v6657_v34 }
 0x264   :  { %5481 = vmatpush3.bf16.msra.mxu1 %v5633_v0 }
 0x265   :  { %5482 = vmatprep.subr.bf16.mxu1 %v6657_v34 }
 0x266   :  { %431 = vmatpush1.bf16.msra.mxu0 %v5626_v54 }
 0x267   :  { %5468 = vmatprep.subr.bf16.mxu0 %v5629_v55 }
 0x268   :  { %5483 = vmatpush3.bf16.msra.mxu1 %v5634_v1 }
 0x269   :  { %4911 = vmatmul.mubr.msk.bf16.vlgmr.msra.gmra.mrb[8].mxu0 %vm155_vm1, %v323_v51  ;;  %5484 = vmatprep.subr.bf16.mxu1 %v6657_v34 }
 0x26a   :  { %5469 = vmatpush3.bf16.msra.mxu0 %v5629_v55  ;;  %5476 = vmatprep.mubr.msk.bf16.mxu0 %vm628_vm4, %v598_v58 }
 0x26b   :  { %5470 = vmatprep.subr.bf16.mxu0 %v5630_v59 }
 0x26c   :  { %5485 = vmatpush3.bf16.msra.mxu1 %v5635_v2 }
 0x26d   :  { %5486 = vmatprep.subr.bf16.mxu1 %v6657_v34 }
 0x26e   :  { %5471 = vmatpush3.bf16.msra.mxu0 %v5630_v59 }
 0x26f   :  { %5472 = vmatprep.subr.bf16.mxu0 %v5631_v60 }
 0x270   :  { %5487 = vmatpush3.bf16.msra.mxu1 %v5636_v3 }
 0x271   :  { %5488 = vmatprep.subr.bf16.mxu1 %v6657_v34 }
 0x272   :  { %5473 = vmatpush3.bf16.msra.mxu0 %v5631_v60 }
 0x273   :  { %5474 = vmatprep.subr.bf16.mxu0 %v5632_v61 }
 0x274   :  { %5489 = vmatpush3.bf16.msra.mxu1 %v5637_v4 }
 0x275   :  { %5490 = vmatprep.subr.bf16.mxu1 %v6657_v34 }
 0x276   :  { %5475 = vmatpush3.bf16.msra.mxu0 %v5632_v61 }
 0x277   :  { %826 = vmatprep.subr.bf16.mxu0 %v5643_v32  ;;  %v965_v32 = vld [vmem:[#allocation2] sm:$0x80] }
 0x278   :  { %5491 = vmatpush3.bf16.msra.mxu1 %v5638_v5 }
 0x279   :  { %5477 = vmatmul.mubr.msk.bf16.vlgmr.msra.gmra.mrb[12].mxu0 %vm628_vm4, %v599_v63  ;;  %5492 = vmatprep.subr.bf16.mxu1 %v6657_v34 }
 0x27a   :  { %858 = vmatprep.mubr.bf16.mxu0 %v6446_v43 }
 0x27c   :  { %5493 = vmatpush3.bf16.msra.mxu1 %v5639_v6 }
 0x27d   :  { %5494 = vmatprep.subr.bf16.mxu1 %v6657_v34 }
 0x280   :  { %5495 = vmatpush3.bf16.msra.mxu1 %v5640_v7  ;;  %v142_v7 = vld [vmem:[#allocation14 + $0x20] sm:$0xff] }
 0x334   :  { %v421_v11 = vpop.f32.mrb[4].mxu0  ;;  %v503_v12 = vpop.f32.mrb[4].mxu1 }
 0x335   :  { %v515_v13 = vadd.f32 %v511_v9, %v421_v11  ;;  %v423_v15 = vpop.f32.mrb[5].mxu0  ;;  %v505_v16 = vpop.f32.mrb[5].mxu1  ;;  %v541_v26 = vadd.f32 %v537_v14, %v503_v12 }
 0x336   :  { %v516_v18 = vadd.f32 %v512_v10, %v423_v15  ;;  %v425_v19 = vpop.f32.mrb[6].mxu0  ;;  %v507_v20 = vpop.f32.mrb[6].mxu1  ;;  %v542_v27 = vadd.f32 %v538_v22, %v505_v16  ;;  %v143_v10 = vld [vmem:[#allocation14 + $0x28] sm:$0xff] }
 0x337   :  { %v4913_v21 = vmul.f32 -1.442695, %v515_v13  ;;  %v426_v23 = vpop.f32.mrb[7].mxu0  ;;  %v508_v24 = vpop.f32.mrb[7].mxu1  ;;  %v4915_v29 = vmul.f32 -1.442695, %v541_v26 }
 0x338   :  { %v4914_v25 = vmul.f32 -1.442695, %v516_v18  ;;  %v4916_v34 = vmul.f32 -1.442695, %v542_v27  ;;  %v563_v13 = vrot.slane %v142_v7, 5  ;;  %v564_v19 = vrot.slane %v143_v10, 5 }
 0x339   :  { %6185 = vpow2.f32 %v4913_v21  ;;  %v5674_v7 = vld [vmem:[#allocation8 + $0xa0] ss:$8 sps:$4 sm:$0xff]   ;;  %v5677_v10 = vld [vmem:[#allocation8 + $0xb0] ss:$8 sps:$4 sm:$0xff]  }
 0x33a   :  { %6187 = vpow2.f32 %v4914_v25 }
 0x33b   :  { %6189 = vpow2.f32 %v4915_v29 }
 0x33c   :  { %v462_v28 = vpop.f32.mrb[8].mxu0  ;;  %6191 = vpow2.f32 %v4916_v34  ;;  %v6746_v34 = vld [vmem:[#allocation14 + $0x10] sm:$0xff] }
 0x33d   :  { %v464_v31 = vpop.f32.mrb[9].mxu0  ;;  %v533_v37 = vadd.f32 %v529_v30, %v462_v28 }
 0x33e   :  { %v466_v33 = vpop.f32.mrb[10].mxu0  ;;  %v534_v40 = vadd.f32 %v530_v35, %v464_v31  ;;  %v5641_v31 = vld [vmem:[#allocation9] ss:$8 sps:$4 sm:$0xff]   ;;  %v765_v35 = vrot.slane %v6746_v34, 2 }
 0x33f   :  { %v467_v36 = vpop.f32.mrb[11].mxu0  ;;  %6193 = vtanh.f32 %v533_v37  ;;  %827 = vmatpush1.bf16.msra.mxu0 %v5641_v31  ;;  %v5646_v33 = vld [vmem:[#allocation8 + $0x4] ss:$8 sps:$4 sm:$0xff]  }
 0x340   :  { %1469 = vmatprep.subr.bf16.mxu0 %v5646_v33 }
 0x343   :  { %v6186_v39 = vpop.eup %6185 }
 0x344   :  { %v523_v41 = vadd.f32 1.0, %v6186_v39  ;;  %v6188_v42 = vpop.eup %6187 }
 0x345   :  { %v524_v45 = vadd.f32 1.0, %v6188_v42  ;;  %v6190_v47 = vpop.eup %6189 }
 0x346   :  { %6195 = vrcp.f32 %v523_v41  ;;  %v6192_v49 = vpop.eup %6191  ;;  %v549_v52 = vadd.f32 1.0, %v6190_v47  ;;  %v5647_v47 = vld [vmem:[#allocation8 + $0x10] ss:$8 sps:$4 sm:$0xff]  }
 0x347   :  { %6197 = vtanh.f32 %v534_v40  ;;  %v550_v58 = vadd.f32 1.0, %v6192_v49  ;;  %v5650_v49 = vld [vmem:[#allocation8 + $0x20] ss:$8 sps:$4 sm:$0xff]  }
 0x348   :  { %6199 = vrcp.f32 %v524_v45 }
 0x349   :  { %v6194_v55 = vpop.eup %6193  ;;  %6201 = vrcp.f32 %v549_v52  ;;  %v5653_v52 = vld [vmem:[#allocation8 + $0x30] ss:$8 sps:$4 sm:$0xff]  }
 0x34c   :  { %v5478_v48 = vpop.f32.mrb[12].mxu0 }
 0x34d   :  { %v6728_v50 = vadd.f32 %v5478_v48, %v603_v46  ;;  %v669_v51 = vpop.f32.mrb[13].mxu0  ;;  %v5652_v48 = vld [vmem:[#allocation8 + $0x24] ss:$8 sps:$4 sm:$0xff]  }
 0x34e   :  { %v6730_v53 = vadd.f32 %v669_v51, %v603_v46  ;;  %v5479_v54 = vpop.f32.mrb[14].mxu0  ;;  %v5655_v51 = vld [vmem:[#allocation8 + $0x34] ss:$8 sps:$4 sm:$0xff]  }
 0x34f   :  { %v672_v56 = vpop.f32.mrb[15].mxu0  ;;  %v685_v62 = vmax.f32 %v6728_v50, 0.0  ;;  %v5658_v54 = vld [vmem:[#allocation8 + $0x44] ss:$8 sps:$4 sm:$0xff]  }
 0x350   :  { %v6196_v57 = vpop.eup %6195  ;;  %v6732_v59 = vadd.f32 %v672_v56, %v603_v46  ;;  %v683_v0 = vmax.f32 %v6730_v53, 0.0  ;;  %v5649_v46 = vld [vmem:[#allocation8 + $0x14] ss:$8 sps:$4 sm:$0xff]  }
 0x351   :  { %v6198_v60 = vpop.eup %6197  ;;  %v555_v61 = vmul.f32 %v6196_v57, %v6194_v55  ;;  %v705_v4 = vsel %vm569_vm5, %v685_v62, 0.0  ;;  %v5656_v55 = vld [vmem:[#allocation8 + $0x40] ss:$8 sps:$4 sm:$0xff]   ;;  %v5661_v56 = vld [vmem:[#allocation8 + $0x54] ss:$8 sps:$4 sm:$0xff]  }
 0x352   :  { %v6200_v63 = vpop.eup %6199  ;;  %v684_v1 = vmax.f32 %v6732_v59, 0.0  ;;  %v5659_v57 = vld [vmem:[#allocation8 + $0x50] ss:$8 sps:$4 sm:$0xff]   ;;  %v962_v59 = vld [vmem:[#allocation2] sm:$0xc0] }
 0x353   :  { %6203 = vtanh.f32 %v555_v61  ;;  %v556_v2 = vmul.f32 %v6200_v63, %v6198_v60  ;;  %v6202_v11 = vpop.eup %6201  ;;  %v5662_v60 = vld [vmem:[#allocation8 + $0x60] ss:$8 sps:$4 sm:$0xff]   ;;  %v5667_v61 = vld [vmem:[#allocation8 + $0x74] ss:$8 sps:$4 sm:$0xff]   ;;  %v5665_v63 = vld [vmem:[#allocation8 + $0x70] ss:$8 sps:$4 sm:$0xff]  }
 0x354   :  { %6205 = vrcp.f32 %v550_v58  ;;  %v704_v3 = vadd.f32 %v684_v1, %v683_v0  ;;  %v5664_v58 = vld [vmem:[#allocation8 + $0x64] ss:$8 sps:$4 sm:$0xff]  }
 0x355   :  { %6207 = vtanh.f32 %v556_v2  ;;  %v5670_v2 = vld [vmem:[#allocation8 + $0x84] ss:$8 sps:$4 sm:$0xff]  }
 0x356   :  { %v706_v5 = vadd.f32 %v705_v4, %v704_v3  ;;  %v5668_v3 = vld [vmem:[#allocation8 + $0x80] ss:$8 sps:$4 sm:$0xff]   ;;  %v5673_v4 = vld [vmem:[#allocation8 + $0x94] ss:$8 sps:$4 sm:$0xff]  }
 0x358   :  { %v707_v6 = vrot.slane %v706_v5, 4 }
 0x35a   :  { %v708_v9 = vadd.f32 %v707_v6, %v706_v5  ;;  %v5671_v5 = vld [vmem:[#allocation8 + $0x90] ss:$8 sps:$4 sm:$0xff]   ;;  %v5676_v6 = vld [vmem:[#allocation8 + $0xa4] ss:$8 sps:$4 sm:$0xff]  }
 0x35c   :  { %v709_v12 = vrot.slane %v708_v9, 2 }
 0x35d   :  { %v6204_v14 = vpop.eup %6203 }
 0x35e   :  { %v6206_v15 = vpop.eup %6205  ;;  %v710_v16 = vadd.f32 %v709_v12, %v708_v9  ;;  %v559_v18 = vmul.f32 %v6204_v14, %v6202_v11  ;;  %v5679_v9 = vld [vmem:[#allocation8 + $0xb4] ss:$8 sps:$4 sm:$0xff]   ;;  %v5682_v11 = vld [vmem:[#allocation8 + $0xc4] ss:$8 sps:$4 sm:$0xff]   ;;  %v5680_v12 = vld [vmem:[#allocation8 + $0xc0] ss:$8 sps:$4 sm:$0xff]  }
 0x35f   :  { %v6208_v20 = vpop.eup %6207  ;;  %v5683_v14 = vld [vmem:[#allocation8 + $0xd0] ss:$8 sps:$4 sm:$0xff]  }
 0x360   :  { %v560_v21 = vmul.f32 %v6208_v20, %v6206_v15  ;;  %v567_v22 = vmul.f32 %v563_v13, %v559_v18  ;;  %v711_v23 = vrot.slane %v710_v16, 1  ;;  %v5685_v13 = vld [vmem:[#allocation8 + $0xd4] ss:$8 sps:$4 sm:$0xff]   ;;  %v5688_v15 = vld [vmem:[#allocation8 + $0xe4] ss:$8 sps:$4 sm:$0xff]  }
 0x361   :  { %v5691_v18 = vld [vmem:[#allocation8 + $0xf4] ss:$8 sps:$4 sm:$0xff]   ;;  %v5694_v20 = vld [vmem:[#allocation8 + $0x104] ss:$8 sps:$4 sm:$0xff]  }
 0x362   :  { %v568_v24 = vmul.f32 %v564_v19, %v560_v21  ;;  %v570_v25 = vsel %vm569_vm5, %v567_v22, 0.0  ;;  %v712_v26 = vadd.f32 %v711_v23, %v710_v16  ;;  %v5686_v16 = vld [vmem:[#allocation8 + $0xe0] ss:$8 sps:$4 sm:$0xff]   ;;  %v5689_v19 = vld [vmem:[#allocation8 + $0xf0] ss:$8 sps:$4 sm:$0xff]   ;;  %v820_v21 = vrot.slane %v6746_v34, 3 }
 0x364   :  { %v571_v27 = vsel %vm569_vm5, %v568_v24, 0.0  ;;  %v714_v28 = vmul.f32 0.05882353, %v712_v26 }
 0x365   :  { %v572_v29 = vadd.f32 %v571_v27, %v570_v25 }
 0x366   :  { %v715_v30 = vpack.c.bf16 %v714_v28, %v714_v28 }
 0x367   :  { %573 = vadd.xlane.f32.xlu0 %v572_v29 }
 0x368   :  { %5497 = vmatmul.mubr.bf16.vlgmr.msra.gmra.mrb[8].mxu1 %v715_v30  ;;  %v6752_v30 = vsub.s32 0, %v6724_v38 }
 0x43b   :  { %v801_v36 = vpop.f32.mrb[8].mxu1 }
 0x43c   :  { %v802_v37 = vadd.f32 %v801_v36, %v765_v35  ;;  %v5498_v39 = vpop.f32.mrb[9].mxu1 }
 0x43d   :  { %v804_v40 = vpop.f32.mrb[10].mxu1  ;;  %v976_v39 = vrot.slane %v965_v32, 1 }
 0x43e   :  { %v807_v41 = vmax.f32 %v802_v37, 0.0  ;;  %v5499_v42 = vpop.f32.mrb[11].mxu1 }
 0x440   :  { %v808_v45 = vpack.c.bf16 %v807_v41, %v807_v41 }
 0x442   :  { %4933 = vmatmul.mubr.msk.bf16.vlgmr.msra.gmra.mrb[16].mxu0 %vm822_vm6, %v808_v45 }
 0x443   :  { %1470 = vmatpush1.bf16.msra.mxu0 %v5644_v44 }
 0x444   :  { %1471 = vmatprep.subr.bf16.mxu0 %v5649_v46 }
 0x447   :  { %1472 = vmatpush1.bf16.msra.mxu0 %v5647_v47 }
 0x448   :  { %1473 = vmatprep.subr.bf16.mxu0 %v5652_v48 }
 0x44b   :  { %1474 = vmatpush1.bf16.msra.mxu0 %v5650_v49 }
 0x44c   :  { %1475 = vmatprep.subr.bf16.mxu0 %v5655_v51 }
 0x44f   :  { %1476 = vmatpush1.bf16.msra.mxu0 %v5653_v52 }
 0x450   :  { %1477 = vmatprep.subr.bf16.mxu0 %v5658_v54 }
 0x453   :  { %1478 = vmatpush1.bf16.msra.mxu0 %v5656_v55 }
 0x454   :  { %1479 = vmatprep.subr.bf16.mxu0 %v5661_v56 }
 0x457   :  { %1480 = vmatpush1.bf16.msra.mxu0 %v5659_v57 }
 0x458   :  { %1481 = vmatprep.subr.bf16.mxu0 %v5664_v58 }
 0x45b   :  { %1482 = vmatpush1.bf16.msra.mxu0 %v5662_v60 }
 0x45c   :  { %1483 = vmatprep.subr.bf16.mxu0 %v5667_v61 }
 0x45f   :  { %1484 = vmatpush1.bf16.msra.mxu0 %v5665_v63 }
 0x460   :  { %1485 = vmatprep.subr.bf16.mxu0 %v5670_v2 }
 0x463   :  { %1486 = vmatpush1.bf16.msra.mxu0 %v5668_v3 }
 0x464   :  { %1487 = vmatprep.subr.bf16.mxu0 %v5673_v4 }
 0x467   :  { %1488 = vmatpush1.bf16.msra.mxu0 %v5671_v5 }
 0x468   :  { %1489 = vmatprep.subr.bf16.mxu0 %v5676_v6  ;;  %v5692_v6 = vld [vmem:[#allocation8 + $0x100] ss:$8 sps:$4 sm:$0xff]  }
 0x46b   :  { %1490 = vmatpush1.bf16.msra.mxu0 %v5674_v7 }
 0x46c   :  { %1491 = vmatprep.subr.bf16.mxu0 %v5679_v9 }
 0x46f   :  { %1492 = vmatpush1.bf16.msra.mxu0 %v5677_v10 }
 0x470   :  { %1493 = vmatprep.subr.bf16.mxu0 %v5682_v11 }
 0x473   :  { %1494 = vmatpush1.bf16.msra.mxu0 %v5680_v12  ;;  %v5697_v12 = vld [vmem:[#allocation8 + $0x114] ss:$8 sps:$4 sm:$0xff]  }
 0x474   :  { %1495 = vmatprep.subr.bf16.mxu0 %v5685_v13 }
 0x477   :  { %1496 = vmatpush1.bf16.msra.mxu0 %v5683_v14 }
 0x478   :  { %1497 = vmatprep.subr.bf16.mxu0 %v5688_v15 }
 0x47b   :  { %1498 = vmatpush1.bf16.msra.mxu0 %v5686_v16 }
 0x47c   :  { %1499 = vmatprep.subr.bf16.mxu0 %v5691_v18 }
 0x47f   :  { %1500 = vmatpush1.bf16.msra.mxu0 %v5689_v19 }
 0x480   :  { %1520 = vmatprep.subr.bf16.mxu0 %v5694_v20 }
 0x515   :  { %v860_v22 = vpop.f32.mrb[16].mxu0 }
 0x516   :  { %v861_v23 = vadd.f32 %v860_v22, %v820_v21  ;;  %v862_v24 = vpop.f32.mrb[17].mxu0 }
 0x517   :  { %v863_v25 = vpop.f32.mrb[18].mxu0 }
 0x518   :  { %v4934_v26 = vmul.f32 -1.442695, %v861_v23  ;;  %v864_v27 = vpop.f32.mrb[19].mxu0  ;;  %v5695_v23 = vld [vmem:[#allocation8 + $0x110] ss:$8 sps:$4 sm:$0xff]  }
 0x519   :  { %v5700_v27 = vld [vmem:[#allocation8 + $0x124] ss:$8 sps:$4 sm:$0xff]  }
 0x51a   :  { %6209 = vpow2.f32 %v4934_v26 }
 0x524   :  { %v6210_v28 = vpop.eup %6209 }
 0x525   :  { %v869_v29 = vadd.f32 1.0, %v6210_v28 }
 0x527   :  { %6211 = vrcp.f32 %v869_v29 }
 0x531   :  { %v6212_v31 = vpop.eup %6211 }
 0x532   :  { %v875_v33 = vrot.slane %v6212_v31, %v6752_v30 }
 0x534   :  { %v876_v35 = vmul.f32 %v875_v33, %v683_v0  ;;  %v877_v36 = vmul.f32 %v875_v33, %v684_v1  ;;  %v878_v37 = vmul.f32 %v875_v33, %v685_v62 }
 0x536   :  { %959 = vst [vmem:[#allocation2 + $0x10] sm:$0xff] %v876_v35  ;;  %960 = vst [vmem:[#allocation2 + $0x20] sm:$0xff] %v877_v36  ;;  %v977_v40 = vrot.slane %v876_v35, 1  ;;  %v979_v41 = vrot.slane %v877_v36, 1  ;;  %v986_v42 = vrot.slane %v876_v35, 2  ;;  %v987_v44 = vrot.slane %v877_v36, 2 }
 0x537   :  { %961 = vst [vmem:[#allocation2 + $0x30] sm:$0x1] %v878_v37  ;;  %v1015_v48 = vpack.c.bf16 %v876_v35, %v962_v59  ;;  %v998_v49 = vrot.slane %v877_v36, 3  ;;  %v1008_v5 = vrot.slane %v877_v36, 4  ;;  %v5698_v35 = vld [vmem:[#allocation8 + $0x120] ss:$8 sps:$4 sm:$0xff]  }
 0x538   :  { %v978_v45 = vsel %vm975_vm7, %v976_v39, %v977_v40  ;;  %v980_v53 = vsel %vm975_vm7, %v977_v40, %v979_v41  ;;  %v1021_v0 = vpack.c.bf16 %v979_v41, %v979_v41  ;;  %v988_v50 = vsel %vm985_vm8, %v986_v42, %v987_v44  ;;  %v5703_v36 = vld [vmem:[#allocation8 + $0x134] ss:$8 sps:$4 sm:$0xff]   ;;  %v5701_v39 = vld [vmem:[#allocation8 + $0x130] ss:$8 sps:$4 sm:$0xff]   ;;  %v5706_v40 = vld [vmem:[#allocation8 + $0x144] ss:$8 sps:$4 sm:$0xff]  }
 0x539   :  { %v1016_v1 = vpack.c.bf16 %v980_v53, %v978_v45  ;;  %v1017_v46 = vpack.c.bf16 %v988_v50, %v986_v42  ;;  %v1044_v63 = vrot.slane %v1015_v48, 3  ;;  %v5704_v41 = vld [vmem:[#allocation8 + $0x140] ss:$8 sps:$4 sm:$0xff]   ;;  %v5709_v42 = vld [vmem:[#allocation8 + $0x154] ss:$8 sps:$4 sm:$0xff]  }
 0x53a   :  { %v1048_v62 = vrot.slane %v1021_v0, 3  ;;  %v5712_v45 = vld [vmem:[#allocation8 + $0x164] ss:$8 sps:$4 sm:$0xff]   ;;  %v5710_v53 = vld [vmem:[#allocation8 + $0x160] ss:$8 sps:$4 sm:$0xff]  }
 0x53b   :  { %v1047_v47 = vrot.slane %v1016_v1, 3  ;;  %v1050_v24 = vrot.slane %v1017_v46, 3  ;;  %v5715_v0 = vld [vmem:[#allocation8 + $0x174] ss:$8 sps:$4 sm:$0xff]   ;;  %v5713_v59 = vld [vmem:[#allocation8 + $0x170] ss:$8 sps:$4 sm:$0xff]  }
 0x53c   :  { %v5718_v1 = vld [vmem:[#allocation8 + $0x184] ss:$8 sps:$4 sm:$0xff]   ;;  %v5716_v50 = vld [vmem:[#allocation8 + $0x180] ss:$8 sps:$4 sm:$0xff]   ;;  %v5719_v46 = vld [vmem:[#allocation8 + $0x190] ss:$8 sps:$4 sm:$0xff]  }
 0x53d   :  { %v1049_v51 = vsel %vm996_vm9, %v1047_v47, %v1048_v62  ;;  %v964_v52 = vld [vmem:[#allocation2 + $0x20] sm:$0x7f]  ;;  %v968_v54 = vld [vmem:[#allocation2 + $0x10] sm:$0xfe] }
 0x53e   :  { %v969_v55 = vld [vmem:[#allocation2 + $0x30] sm:$0x3]  ;;  %1501 = vmatprep.mubr.bf16.mxu0 %v1049_v51  ;;  %v1020_v56 = vpack.c.bf16 %v964_v52, %v964_v52  ;;  %v997_v57 = vrot.slane %v968_v54, 3  ;;  %v970_v61 = vld [vmem:[#allocation2 + $0x10] sm:$0xfc] }
 0x53f   :  { %v1000_v58 = vrot.slane %v969_v55, 3  ;;  %v967_v60 = vld [vmem:[#allocation2 + $0x30] sm:$0x1]  ;;  %v1007_v4 = vrot.slane %v970_v61, 4  ;;  %v5724_v47 = vld [vmem:[#allocation8 + $0x1a4] ss:$8 sps:$4 sm:$0xff]  }
 0x540   :  { %v989_v2 = vrot.slane %v967_v60, 2  ;;  %v971_v3 = vld [vmem:[#allocation2 + $0x30] sm:$0x7]  ;;  %v1045_v7 = vrot.slane %v1020_v56, 3  ;;  %v999_v9 = vsel %vm996_vm9, %v997_v57, %v998_v49  ;;  %v5722_v48 = vld [vmem:[#allocation8 + $0x1a0] ss:$8 sps:$4 sm:$0xff]  }
 0x541   :  { %v1001_v10 = vsel %vm996_vm9, %v998_v49, %v1000_v58  ;;  %v1010_v11 = vrot.slane %v971_v3, 4  ;;  %v1009_v14 = vsel %vm266_vm2, %v1007_v4, %v1008_v5  ;;  %v1018_v20 = vpack.c.bf16 %v999_v9, %v997_v57  ;;  %v5727_v49 = vld [vmem:[#allocation8 + $0x1b4] ss:$8 sps:$4 sm:$0xff]   ;;  %v5725_v51 = vld [vmem:[#allocation8 + $0x1b0] ss:$8 sps:$4 sm:$0xff]  }
 0x542   :  { %v990_v13 = vsel %vm985_vm8, %v987_v44, %v989_v2  ;;  %v1046_v15 = vsel %vm996_vm9, %v1044_v63, %v1045_v7  ;;  %v1019_v19 = vpack.c.bf16 %v1009_v14, %v1007_v4  ;;  %v1023_v21 = vpack.c.bf16 %v1001_v10, %v1001_v10  ;;  %v5707_v44 = vld [vmem:[#allocation8 + $0x150] ss:$8 sps:$4 sm:$0xff]   ;;  %v5730_v52 = vld [vmem:[#allocation8 + $0x1c4] ss:$8 sps:$4 sm:$0xff]   ;;  %v5728_v54 = vld [vmem:[#allocation8 + $0x1c0] ss:$8 sps:$4 sm:$0xff]  }
 0x543   :  { %v1022_v16 = vpack.c.bf16 %v990_v13, %v990_v13  ;;  %v1011_v18 = vsel %vm266_vm2, %v1008_v5, %v1010_v11  ;;  %1502 = vmatmul.mubr.bf16.vlgmr.msra.gmra.mrb[20].mxu0 %v1046_v15  ;;  %v1053_v31 = vrot.slane %v1018_v20, 3  ;;  %v5733_v55 = vld [vmem:[#allocation8 + $0x1d4] ss:$8 sps:$4 sm:$0xff]   ;;  %v5731_v56 = vld [vmem:[#allocation8 + $0x1d0] ss:$8 sps:$4 sm:$0xff]   ;;  %v5765_v20 = vld [vmem:[%s7219_s7 + $0x40] sm:$0xff]  }
 0x544   :  { %v1024_v22 = vpack.c.bf16 %v1011_v18, %v1011_v18  ;;  %1521 = vmatpush1.bf16.msra.mxu0 %v5692_v6  ;;  %1511 = vmatprep.mubr.bf16.mxu0 %v1048_v62  ;;  %v1056_v26 = vrot.slane %v1019_v19, 3  ;;  %v6779_v32 = vrot.slane %v1023_v21, 3  ;;  %v5721_v62 = vld [vmem:[#allocation8 + $0x194] ss:$8 sps:$4 sm:$0xff]   ;;  %v5736_v57 = vld [vmem:[#allocation8 + $0x1e4] ss:$8 sps:$4 sm:$0xff]  }
 0x545   :  { %v6771_v25 = vrot.slane %v1022_v16, 3  ;;  %1522 = vmatprep.subr.bf16.mxu0 %v5697_v12  ;;  %v5734_v58 = vld [vmem:[#allocation8 + $0x1e0] ss:$8 sps:$4 sm:$0xff]   ;;  %v5739_v60 = vld [vmem:[#allocation8 + $0x1f4] ss:$8 sps:$4 sm:$0xff]  }
 0x546   :  { %v6773_v28 = vrot.slane %v1024_v22, 3  ;;  %v1055_v37 = vsel %vm996_vm9, %v1053_v31, %v6779_v32  ;;  %v5737_v61 = vld [vmem:[#allocation8 + $0x1f0] ss:$8 sps:$4 sm:$0xff]   ;;  %v5742_v63 = vld [vmem:[#allocation8 + $0x204] ss:$8 sps:$4 sm:$0xff]  }
 0x547   :  { %v6777_v29 = vsel %vm996_vm9, %v1050_v24, %v6771_v25  ;;  %v5740_v2 = vld [vmem:[#allocation8 + $0x200] ss:$8 sps:$4 sm:$0xff]   ;;  %v5745_v3 = vld [vmem:[#allocation8 + $0x214] ss:$8 sps:$4 sm:$0xff]   ;;  %v5743_v4 = vld [vmem:[#allocation8 + $0x210] ss:$8 sps:$4 sm:$0xff]  }
 0x548   :  { %v6783_v33 = vsel %vm996_vm9, %v1056_v26, %v6773_v28  ;;  %1523 = vmatpush1.bf16.msra.mxu0 %v5695_v23  ;;  %v5748_v5 = vld [vmem:[#allocation8 + $0x224] ss:$8 sps:$4 sm:$0xff]   ;;  %v5746_v6 = vld [vmem:[#allocation8 + $0x220] ss:$8 sps:$4 sm:$0xff]   ;;  %v5749_v9 = vld [vmem:[#allocation8 + $0x230] ss:$8 sps:$4 sm:$0xff]  }
 0x549   :  { %1524 = vmatprep.subr.bf16.mxu0 %v5700_v27  ;;  %v5754_v10 = vld [vmem:[#allocation8 + $0x244] ss:$8 sps:$4 sm:$0xff]   ;;  %v5752_v11 = vld [vmem:[#allocation8 + $0x240] ss:$8 sps:$4 sm:$0xff]   ;;  %v5757_v12 = vld [vmem:[#allocation8 + $0x254] ss:$8 sps:$4 sm:$0xff]  }
 0x54a   :  { %v5755_v13 = vld [vmem:[#allocation8 + $0x250] ss:$8 sps:$4 sm:$0xff]   ;;  %v5760_v14 = vld [vmem:[#allocation8 + $0x264] ss:$8 sps:$4 sm:$0xff]   ;;  %v5758_v15 = vld [vmem:[#allocation8 + $0x260] ss:$8 sps:$4 sm:$0xff]  }
 0x54b   :  { %1512 = vmatmul.mubr.bf16.gmra.mrb[24].mxu0 %v1045_v7  ;;  %v5751_v7 = vld [vmem:[#allocation8 + $0x234] ss:$8 sps:$4 sm:$0xff]   ;;  %v5761_v18 = vld [vmem:[#allocation8 + $0x270] ss:$8 sps:$4 sm:$0xff]   ;;  %v5764_v19 = vld [vmem:[%s7219_s7 + $0x80] sm:$0xff]  }
 0x54c   :  { %1525 = vmatpush1.bf16.msra.mxu0 %v5698_v35  ;;  %1552 = vmatprep.mubr.bf16.mxu0 %v1055_v37  ;;  %v5763_v16 = vld [vmem:[#allocation8 + $0x274] ss:$8 sps:$4 sm:$0xff]   ;;  %v5766_v21 = vld [vmem:[%s7219_s7 + $0x88] sm:$0xff]   ;;  %v5772_v27 = vld [vmem:[%s7219_s7 + $0xa0] sm:$0xff]   ;;  %v1027_v37 = vsub.s32 7, %v6724_v38 }
 0x54d   :  { %1526 = vmatprep.subr.bf16.mxu0 %v5703_v36  ;;  %5349 = vmatprep.subr.bf16.mxu1 %v5764_v19  ;;  %v5767_v22 = vld [vmem:[%s7219_s7 + $0x48] sm:$0xff]   ;;  %v5768_v23 = vld [vmem:[%s7219_s7 + $0x90] sm:$0xff]   ;;  %v5771_v26 = vld [vmem:[%s7219_s7 + $0x58] sm:$0xff]  }
 0x54e   :  { %5350 = vmatpush3.bf16.msra.mxu1 %v5765_v20  ;;  %v5769_v24 = vld [vmem:[%s7219_s7 + $0x50] sm:$0xff]   ;;  %v5775_v31 = vld [vmem:[%s7219_s7 + $0x68] sm:$0xff]   ;;  %v5778_v35 = vld [vmem:[%s7219_s7 + $0xb8] sm:$0xff]  }
 0x54f   :  { %5351 = vmatprep.subr.bf16.mxu1 %v5766_v21  ;;  %v5779_v36 = vld [vmem:[%s7219_s7 + $0x78] sm:$0xff]  }
 0x550   :  { %1527 = vmatpush1.bf16.msra.mxu0 %v5701_v39  ;;  %v5782_v20 = vld [vmem:[#allocation9 + $0x14] ss:$8 sps:$4 sm:$0xff]   ;;  %v5780_v21 = vld [vmem:[#allocation9 + $0x10] ss:$8 sps:$4 sm:$0xff]  }
 0x551   :  { %1528 = vmatprep.subr.bf16.mxu0 %v5706_v40 }
 0x552   :  { %5352 = vmatpush3.bf16.msra.mxu1 %v5767_v22  ;;  %v5785_v22 = vld [vmem:[#allocation8 + $0x284] ss:$8 sps:$4 sm:$0xff]  }
 0x553   :  { %5353 = vmatprep.subr.bf16.mxu1 %v5768_v23 }
 0x554   :  { %1529 = vmatpush1.bf16.msra.mxu0 %v5704_v41  ;;  %v1028_v41 = vrot.slane %v6649_v17, %v1027_v37 }
 0x555   :  { %1530 = vmatprep.subr.bf16.mxu0 %v5709_v42 }
 0x556   :  { %5354 = vmatpush3.bf16.msra.mxu1 %v5769_v24  ;;  %v1780_v24 = vrot.slane %v6746_v34, 4 }
 0x558   :  { %1531 = vmatpush1.bf16.msra.mxu0 %v5707_v44  ;;  %v1032_v44 = vrot.slane %v6716_v8, %v1027_v37  ;;  %v5791_v37 = vld [vmem:[#allocation8 + $0x2a4] ss:$8 sps:$4 sm:$0xff]  }
 0x559   :  { %1532 = vmatprep.subr.bf16.mxu0 %v5712_v45 }
 0x55c   :  { %1533 = vmatpush1.bf16.msra.mxu0 %v5710_v53 }
 0x55d   :  { %1534 = vmatprep.subr.bf16.mxu0 %v5715_v0 }
 0x560   :  { %1535 = vmatpush1.bf16.msra.mxu0 %v5713_v59 }
 0x561   :  { %1536 = vmatprep.subr.bf16.mxu0 %v5718_v1 }
 0x564   :  { %1537 = vmatpush1.bf16.msra.mxu0 %v5716_v50 }
 0x565   :  { %1538 = vmatprep.subr.bf16.mxu0 %v5721_v62 }
 0x568   :  { %1539 = vmatpush1.bf16.msra.mxu0 %v5719_v46 }
 0x569   :  { %1540 = vmatprep.subr.bf16.mxu0 %v5724_v47 }
 0x56c   :  { %1541 = vmatpush1.bf16.msra.mxu0 %v5722_v48 }
 0x56d   :  { %1542 = vmatprep.subr.bf16.mxu0 %v5727_v49 }
 0x570   :  { %1543 = vmatpush1.bf16.msra.mxu0 %v5725_v51 }
 0x571   :  { %1544 = vmatprep.subr.bf16.mxu0 %v5730_v52 }
 0x574   :  { %1545 = vmatpush1.bf16.msra.mxu0 %v5728_v54 }
 0x575   :  { %1546 = vmatprep.subr.bf16.mxu0 %v5733_v55 }
 0x578   :  { %1547 = vmatpush1.bf16.msra.mxu0 %v5731_v56 }
 0x579   :  { %1548 = vmatprep.subr.bf16.mxu0 %v5736_v57 }
 0x57c   :  { %1549 = vmatpush1.bf16.msra.mxu0 %v5734_v58 }
 0x57d   :  { %1550 = vmatprep.subr.bf16.mxu0 %v5739_v60 }
 0x580   :  { %1551 = vmatpush1.bf16.msra.mxu0 %v5737_v61 }
 0x581   :  { %1571 = vmatprep.subr.bf16.mxu0 %v5742_v63 }
 0x583   :  { %1553 = vmatmul.mubr.bf16.vlgmr.msra.gmra.mrb[20].mxu0 %v6777_v29  ;;  %v5774_v29 = vld [vmem:[%s7219_s7 + $0xa8] sm:$0xff]  }
 0x584   :  { %1562 = vmatprep.mubr.bf16.mxu0 %v6779_v32  ;;  %1572 = vmatpush1.bf16.msra.mxu0 %v5740_v2  ;;  %v5776_v32 = vld [vmem:[%s7219_s7 + $0xb0] sm:$0xff]  }
 0x585   :  { %1573 = vmatprep.subr.bf16.mxu0 %v5745_v3 }
 0x588   :  { %1574 = vmatpush1.bf16.msra.mxu0 %v5743_v4 }
 0x589   :  { %1575 = vmatprep.subr.bf16.mxu0 %v5748_v5 }
 0x58b   :  { %1563 = vmatmul.mubr.bf16.gmra.mrb[24].mxu0 %v6771_v25  ;;  %v5770_v25 = vld [vmem:[%s7219_s7 + $0x98] sm:$0xff]  }
 0x58c   :  { %1576 = vmatpush1.bf16.msra.mxu0 %v5746_v6  ;;  %1603 = vmatprep.mubr.bf16.mxu0 %v6446_v43 }
 0x58d   :  { %1577 = vmatprep.subr.bf16.mxu0 %v5751_v7  ;;  %5355 = vmatprep.subr.bf16.mxu1 %v5770_v25 }
 0x58e   :  { %5356 = vmatpush3.bf16.msra.mxu1 %v5771_v26 }
 0x58f   :  { %5357 = vmatprep.subr.bf16.mxu1 %v5772_v27 }
 0x590   :  { %1578 = vmatpush1.bf16.msra.mxu0 %v5749_v9 }
 0x591   :  { %1579 = vmatprep.subr.bf16.mxu0 %v5754_v10 }
 0x594   :  { %1580 = vmatpush1.bf16.msra.mxu0 %v5752_v11 }
 0x595   :  { %1581 = vmatprep.subr.bf16.mxu0 %v5757_v12 }
 0x598   :  { %1582 = vmatpush1.bf16.msra.mxu0 %v5755_v13 }
 0x599   :  { %1583 = vmatprep.subr.bf16.mxu0 %v5760_v14 }
 0x59c   :  { %1584 = vmatpush1.bf16.msra.mxu0 %v5758_v15 }
 0x59d   :  { %1585 = vmatprep.subr.bf16.mxu0 %v5763_v16 }
 0x5a0   :  { %1586 = vmatpush1.bf16.msra.mxu0 %v5761_v18 }
 0x5a3   :  { %1604 = vmatmul.mubr.bf16.vlgmr.msra.gmra.mrb[20].mxu0 %v6783_v33  ;;  %v5777_v33 = vld [vmem:[%s7219_s7 + $0x70] sm:$0xff]  }
 0x5a4   :  { %1613 = vmatprep.mubr.bf16.mxu0 %v6446_v43 }
 0x5ab   :  { %1614 = vmatmul.mubr.bf16.gmra.mrb[24].mxu0 %v6773_v28  ;;  %v5773_v28 = vld [vmem:[%s7219_s7 + $0x60] sm:$0xff]  }
 0x5ac   :  { %5358 = vmatpush3.bf16.msra.mxu1 %v5773_v28 }
 0x5ad   :  { %5359 = vmatprep.subr.bf16.mxu1 %v5774_v29 }
 0x5b0   :  { %5360 = vmatpush3.bf16.msra.mxu1 %v5775_v31 }
 0x5b1   :  { %5361 = vmatprep.subr.bf16.mxu1 %v5776_v32  ;;  %v5783_v32 = vld [vmem:[#allocation8 + $0x280] ss:$8 sps:$4 sm:$0xff]  }
 0x5b4   :  { %5362 = vmatpush3.bf16.msra.mxu1 %v5777_v33 }
 0x5b5   :  { %5363 = vmatprep.subr.bf16.mxu1 %v5778_v35  ;;  %v5788_v35 = vld [vmem:[#allocation8 + $0x294] ss:$8 sps:$4 sm:$0xff]  }
 0x5b8   :  { %5364 = vmatpush3.bf16.msra.mxu1 %v5779_v36  ;;  %v5786_v36 = vld [vmem:[#allocation8 + $0x290] ss:$8 sps:$4 sm:$0xff]  }
 0x5b9   :  { %1841 = vmatprep.subr.bf16.mxu1 %v5782_v20 }
 0x676   :  { %v1605_v39 = vpop.f32.mrb[20].mxu0 }
 0x677   :  { %v1607_v40 = vpop.f32.mrb[21].mxu0  ;;  %v6849_v59 = vadd.f32 %v1605_v39, %v1028_v41  ;;  %v5789_v39 = vld [vmem:[#allocation8 + $0x2a0] ss:$8 sps:$4 sm:$0xff]  }
 0x678   :  { %v1609_v42 = vpop.f32.mrb[22].mxu0  ;;  %v6851_v1 = vadd.f32 %v1607_v40, %v1032_v44  ;;  %v5794_v40 = vld [vmem:[#allocation8 + $0x2b4] ss:$8 sps:$4 sm:$0xff]  }
 0x679   :  { %v1611_v45 = vpop.f32.mrb[23].mxu0  ;;  %v6845_v53 = vadd.f32 %v1609_v42, %v1028_v41  ;;  %v1622_v48 = vmax.f32 %v6849_v59, 0.0  ;;  %v5797_v42 = vld [vmem:[#allocation8 + $0x2c4] ss:$8 sps:$4 sm:$0xff]  }
 0x67a   :  { %v6847_v0 = vadd.f32 %v1611_v45, %v1032_v44  ;;  %v1623_v51 = vmax.f32 %v6851_v1, 0.0  ;;  %v5800_v45 = vld [vmem:[#allocation8 + $0x2d4] ss:$8 sps:$4 sm:$0xff]  }
 0x67b   :  { %v1624_v50 = vmax.f32 %v6845_v53, 0.0 }
 0x67c   :  { %v1625_v46 = vmax.f32 %v6847_v0, 0.0 }
 0x67d   :  { %v1662_v55 = vadd.f32 %v1624_v50, %v1622_v48 }
 0x67e   :  { %v1615_v62 = vpop.f32.mrb[24].mxu0  ;;  %v1671_v57 = vadd.f32 %v1625_v46, %v1623_v51 }
 0x67f   :  { %v6855_v47 = vadd.f32 %v1615_v62, %v1028_v41  ;;  %v1617_v17 = vpop.f32.mrb[25].mxu0  ;;  %v5792_v41 = vld [vmem:[#allocation8 + $0x2b0] ss:$8 sps:$4 sm:$0xff]  }
 0x680   :  { %v6858_v8 = vadd.f32 %v1617_v17, %v1032_v44  ;;  %v1619_v49 = vpop.f32.mrb[26].mxu0  ;;  %v5795_v44 = vld [vmem:[#allocation8 + $0x2c0] ss:$8 sps:$4 sm:$0xff]   ;;  %v5798_v62 = vld [vmem:[#allocation8 + $0x2d0] ss:$8 sps:$4 sm:$0xff]  }
 0x681   :  { %v1626_v52 = vmax.f32 %v6855_v47, 0.0  ;;  %v1620_v54 = vpop.f32.mrb[27].mxu0  ;;  %v5803_v17 = vld [vmem:[#allocation8 + $0x2e4] ss:$8 sps:$4 sm:$0xff]   ;;  %v5801_v49 = vld [vmem:[#allocation8 + $0x2e0] ss:$8 sps:$4 sm:$0xff]  }
 0x682   :  { %v1627_v56 = vmax.f32 %v6858_v8, 0.0  ;;  %v5806_v54 = vld [vmem:[#allocation8 + $0x2f4] ss:$8 sps:$4 sm:$0xff]  }
 0x683   :  { %v1663_v58 = vsel %vm569_vm5, %v1626_v52, 0.0 }
 0x684   :  { %v1664_v60 = vadd.f32 %v1663_v58, %v1662_v55  ;;  %v1672_v61 = vsel %vm569_vm5, %v1627_v56, 0.0  ;;  %v5804_v55 = vld [vmem:[#allocation8 + $0x2f0] ss:$8 sps:$4 sm:$0xff]   ;;  %v5807_v58 = vld [vmem:[#allocation8 + $0x300] ss:$8 sps:$4 sm:$0xff]  }
 0x685   :  { %v1673_v63 = vadd.f32 %v1672_v61, %v1671_v57  ;;  %v5809_v57 = vld [vmem:[#allocation8 + $0x304] ss:$8 sps:$4 sm:$0xff]   ;;  %v5810_v61 = vld [vmem:[#allocation8 + $0x310] ss:$8 sps:$4 sm:$0xff]  }
 0x686   :  { %v1665_v2 = vrot.slane %v1664_v60, 4 }
 0x687   :  { %v1674_v3 = vrot.slane %v1673_v63, 4 }
 0x688   :  { %v1666_v4 = vadd.f32 %v1665_v2, %v1664_v60  ;;  %v5812_v60 = vld [vmem:[#allocation8 + $0x314] ss:$8 sps:$4 sm:$0xff]   ;;  %v5813_v2 = vld [vmem:[#allocation8 + $0x320] ss:$8 sps:$4 sm:$0xff]  }
 0x689   :  { %v1675_v5 = vadd.f32 %v1674_v3, %v1673_v63  ;;  %v5815_v63 = vld [vmem:[#allocation8 + $0x324] ss:$8 sps:$4 sm:$0xff]   ;;  %v5818_v3 = vld [vmem:[#allocation8 + $0x334] ss:$8 sps:$4 sm:$0xff]  }
 0x68a   :  { %v1667_v6 = vrot.slane %v1666_v4, 2 }
 0x68b   :  { %v1676_v7 = vrot.slane %v1675_v5, 2 }
 0x68c   :  { %v1668_v9 = vadd.f32 %v1667_v6, %v1666_v4  ;;  %v5816_v4 = vld [vmem:[#allocation8 + $0x330] ss:$8 sps:$4 sm:$0xff]   ;;  %v5819_v6 = vld [vmem:[#allocation8 + $0x340] ss:$8 sps:$4 sm:$0xff]  }
 0x68d   :  { %v1677_v10 = vadd.f32 %v1676_v7, %v1675_v5  ;;  %v5821_v5 = vld [vmem:[#allocation8 + $0x344] ss:$8 sps:$4 sm:$0xff]   ;;  %v5824_v7 = vld [vmem:[#allocation8 + $0x354] ss:$8 sps:$4 sm:$0xff]  }
 0x68e   :  { %v1669_v11 = vrot.slane %v1668_v9, 1 }
 0x68f   :  { %v1678_v12 = vrot.slane %v1677_v10, 1 }
 0x690   :  { %v1670_v13 = vadd.f32 %v1669_v11, %v1668_v9  ;;  %v5822_v9 = vld [vmem:[#allocation8 + $0x350] ss:$8 sps:$4 sm:$0xff]   ;;  %v5827_v11 = vld [vmem:[#allocation8 + $0x364] ss:$8 sps:$4 sm:$0xff]  }
 0x691   :  { %v1679_v14 = vadd.f32 %v1678_v12, %v1677_v10  ;;  %v5825_v10 = vld [vmem:[#allocation8 + $0x360] ss:$8 sps:$4 sm:$0xff]   ;;  %v5830_v12 = vld [vmem:[#allocation8 + $0x374] ss:$8 sps:$4 sm:$0xff]  }
 0x692   :  { %v1680_v15 = vmul.f32 0.05882353, %v1670_v13  ;;  %v5828_v13 = vld [vmem:[#allocation8 + $0x370] ss:$8 sps:$4 sm:$0xff]  }
 0x693   :  { %v1681_v16 = vmul.f32 0.05882353, %v1679_v14  ;;  %v5833_v14 = vld [vmem:[#allocation8 + $0x384] ss:$8 sps:$4 sm:$0xff]  }
 0x694   :  { %v1682_v19 = vpack.c.bf16 %v1680_v15, %v1680_v15  ;;  %v6880_v15 = vld [vmem:[#allocation14 + $0x18] sm:$0xff] }
 0x695   :  { %v1683_v18 = vpack.c.bf16 %v1681_v16, %v1681_v16  ;;  %v1834_v16 = vrot.slane %v6746_v34, 5 }
 0x697   :  { %1814 = vmatprep.mubr.bf16.mxu1 %v1683_v18  ;;  %v1835_v18 = vrot.slane %v6880_v15, 5 }
 0x698   :  { %1815 = vmatmul.mubr.bf16.vlgmr.msra.gmra.mrb[12].mxu1 %v1682_v19 }
 0x699   :  { %1873 = vmatprep.mubr.bf16.mxu1 %v6446_v43  ;;  %1842 = vmatpush1.bf16.msra.mxu1 %v5780_v21 }
 0x69a   :  { %2683 = vmatprep.subr.bf16.mxu1 %v5785_v22 }
 0x76b   :  { %v5365_v23 = vpop.f32.mrb[12].mxu1 }
 0x76c   :  { %v5366_v25 = vpop.f32.mrb[13].mxu1 }
 0x76d   :  { %v5367_v26 = vadd.f32 %v5366_v25, %v5365_v23  ;;  %v5368_v27 = vpop.f32.mrb[14].mxu1 }
 0x76e   :  { %v5369_v28 = vpop.f32.mrb[15].mxu1 }
 0x76f   :  { %v1817_v29 = vadd.f32 %v5367_v26, %v1780_v24 }
 0x771   :  { %v1822_v31 = vmax.f32 %v1817_v29, 0.0 }
 0x773   :  { %v1823_v33 = vpack.c.bf16 %v1822_v31, %v1822_v31 }
 0x775   :  { %5033 = vmatmul.mubr.msk.bf16.vlgmr.msra.gmra.mrb[16].mxu1 %vm822_vm6, %v1823_v33 }
 0x776   :  { %2684 = vmatpush1.bf16.msra.mxu1 %v5783_v32 }
 0x777   :  { %2685 = vmatprep.subr.bf16.mxu1 %v5788_v35 }
 0x77a   :  { %2686 = vmatpush1.bf16.msra.mxu1 %v5786_v36  ;;  %v2010_v36 = vld [vmem:[#allocation2] sm:$0x80] }
 0x77b   :  { %2687 = vmatprep.subr.bf16.mxu1 %v5791_v37 }
 0x77e   :  { %2688 = vmatpush1.bf16.msra.mxu1 %v5789_v39 }
 0x77f   :  { %2689 = vmatprep.subr.bf16.mxu1 %v5794_v40 }
 0x782   :  { %2690 = vmatpush1.bf16.msra.mxu1 %v5792_v41  ;;  %v2011_v41 = vld [vmem:[#allocation2 + $0x8] sm:$0x80] }
 0x783   :  { %2691 = vmatprep.subr.bf16.mxu1 %v5797_v42 }
 0x786   :  { %2692 = vmatpush1.bf16.msra.mxu1 %v5795_v44 }
 0x787   :  { %2693 = vmatprep.subr.bf16.mxu1 %v5800_v45 }
 0x78a   :  { %2694 = vmatpush1.bf16.msra.mxu1 %v5798_v62 }
 0x78b   :  { %2695 = vmatprep.subr.bf16.mxu1 %v5803_v17 }
 0x78e   :  { %2696 = vmatpush1.bf16.msra.mxu1 %v5801_v49 }
 0x78f   :  { %2697 = vmatprep.subr.bf16.mxu1 %v5806_v54 }
 0x792   :  { %2698 = vmatpush1.bf16.msra.mxu1 %v5804_v55 }
 0x793   :  { %2699 = vmatprep.subr.bf16.mxu1 %v5809_v57 }
 0x796   :  { %2700 = vmatpush1.bf16.msra.mxu1 %v5807_v58 }
 0x797   :  { %2701 = vmatprep.subr.bf16.mxu1 %v5812_v60 }
 0x79a   :  { %2702 = vmatpush1.bf16.msra.mxu1 %v5810_v61 }
 0x79b   :  { %2703 = vmatprep.subr.bf16.mxu1 %v5815_v63 }
 0x79e   :  { %2704 = vmatpush1.bf16.msra.mxu1 %v5813_v2 }
 0x79f   :  { %2705 = vmatprep.subr.bf16.mxu1 %v5818_v3 }
 0x7a2   :  { %2706 = vmatpush1.bf16.msra.mxu1 %v5816_v4 }
 0x7a3   :  { %2707 = vmatprep.subr.bf16.mxu1 %v5821_v5 }
 0x7a6   :  { %2708 = vmatpush1.bf16.msra.mxu1 %v5819_v6 }
 0x7a7   :  { %2709 = vmatprep.subr.bf16.mxu1 %v5824_v7 }
 0x7aa   :  { %2710 = vmatpush1.bf16.msra.mxu1 %v5822_v9 }
 0x7ab   :  { %2711 = vmatprep.subr.bf16.mxu1 %v5827_v11 }
 0x7ae   :  { %2712 = vmatpush1.bf16.msra.mxu1 %v5825_v10 }
 0x7af   :  { %2713 = vmatprep.subr.bf16.mxu1 %v5830_v12 }
 0x7b2   :  { %2714 = vmatpush1.bf16.msra.mxu1 %v5828_v13 }
 0x7b3   :  { %2734 = vmatprep.subr.bf16.mxu1 %v5833_v14  ;;  %v5831_v14 = vld [vmem:[#allocation8 + $0x380] ss:$8 sps:$4 sm:$0xff]  }
 0x848   :  { %v1875_v19 = vpop.f32.mrb[16].mxu1 }
 0x849   :  { %v1876_v20 = vadd.f32 %v1875_v19, %v1834_v16  ;;  %v1877_v21 = vpop.f32.mrb[17].mxu1 }
 0x84a   :  { %v1878_v22 = vadd.f32 %v1877_v21, %v1835_v18  ;;  %v1879_v23 = vpop.f32.mrb[18].mxu1  ;;  %v5836_v21 = vld [vmem:[#allocation8 + $0x394] ss:$8 sps:$4 sm:$0xff]  }
 0x84b   :  { %v5034_v24 = vmul.f32 -1.442695, %v1876_v20  ;;  %v1880_v25 = vpop.f32.mrb[19].mxu1 }
 0x84c   :  { %v5035_v26 = vmul.f32 -1.442695, %v1878_v22 }
 0x84d   :  { %6213 = vpow2.f32 %v5034_v24 }
 0x84e   :  { %6215 = vpow2.f32 %v5035_v26 }
 0x857   :  { %v6214_v27 = vpop.eup %6213 }
 0x858   :  { %v6216_v28 = vpop.eup %6215  ;;  %v1888_v29 = vadd.f32 1.0, %v6214_v27 }
 0x859   :  { %v1889_v31 = vadd.f32 1.0, %v6216_v28 }
 0x85a   :  { %6217 = vrcp.f32 %v1888_v29 }
 0x85b   :  { %6219 = vrcp.f32 %v1889_v31  ;;  %v5834_v31 = vld [vmem:[#allocation8 + $0x390] ss:$8 sps:$4 sm:$0xff]  }
 0x864   :  { %v6218_v32 = vpop.eup %6217 }
 0x865   :  { %v6220_v34 = vpop.eup %6219  ;;  %v1897_v33 = vrot.slane %v6218_v32, %v6752_v30 }
 0x866   :  { %v1901_v35 = vrot.slane %v6220_v34, %v6752_v30  ;;  %v5839_v34 = vld [vmem:[#allocation8 + $0x3a4] ss:$8 sps:$4 sm:$0xff]  }
 0x867   :  { %v1902_v37 = vmul.f32 %v1897_v33, %v1622_v48  ;;  %v6890_v39 = vmul.f32 %v1897_v33, %v1624_v50  ;;  %v1906_v40 = vmul.f32 %v1897_v33, %v1626_v52 }
 0x868   :  { %v1903_v42 = vmul.f32 %v1901_v35, %v1623_v51  ;;  %v6898_v44 = vmul.f32 %v1901_v35, %v1625_v46  ;;  %v1907_v45 = vmul.f32 %v1901_v35, %v1627_v56 }
 0x869   :  { %2004 = vst [vmem:[#allocation2 + $0x10] sm:$0xff] %v1902_v37  ;;  %2008 = vst [vmem:[#allocation2 + $0x30] sm:$0x1] %v1906_v40  ;;  %v2068_v53 = vpack.c.bf16 %v1902_v37, %v2010_v36  ;;  %v2074_v59 = vpack.c.bf16 %v6890_v39, %v6890_v39  ;;  %v2032_v50 = vrot.slane %v1902_v37, 1  ;;  %v2034_v47 = vrot.slane %v6890_v39, 1 }
 0x86a   :  { %2005 = vst [vmem:[#allocation2 + $0x18] sm:$0xff] %v1903_v42  ;;  %2009 = vst [vmem:[#allocation2 + $0x38] sm:$0x1] %v1907_v45  ;;  %v2069_v1 = vpack.c.bf16 %v1903_v42, %v2011_v41  ;;  %v2075_v0 = vpack.c.bf16 %v6898_v44, %v6898_v44  ;;  %v2033_v46 = vrot.slane %v1903_v42, 1  ;;  %v2036_v48 = vrot.slane %v6898_v44, 1 }
 0x86b   :  { %v2090_v8 = vshrl.u32 %v2068_v53, 16  ;;  %v2093_v51 = vshll.u32 %v2068_v53, 16  ;;  %v2098_v52 = vshrl.u32 %v2074_v59, 16  ;;  %v2101_v56 = vshll.u32 %v2074_v59, 16 }
 0x86c   :  { %v2107_v62 = vshrl.u32 %v2069_v1, 16  ;;  %v2110_v17 = vshll.u32 %v2069_v1, 16  ;;  %v2115_v49 = vshrl.u32 %v2075_v0, 16  ;;  %v2118_v54 = vshll.u32 %v2075_v0, 16  ;;  %v5842_v0 = vld [vmem:[#allocation8 + $0x3b4] ss:$8 sps:$4 sm:$0xff]  }
 0x86d   :  { %v2092_v55 = vrot.slane %v2090_v8, 3  ;;  %v2095_v57 = vrot.slane %v2093_v51, 4  ;;  %v2100_v58 = vrot.slane %v2098_v52, 3  ;;  %v2103_v60 = vrot.slane %v2101_v56, 4 }
 0x86e   :  { %v2109_v61 = vrot.slane %v2107_v62, 3  ;;  %v2112_v63 = vrot.slane %v2110_v17, 4  ;;  %v2117_v2 = vrot.slane %v2115_v49, 3  ;;  %v2120_v3 = vrot.slane %v2118_v54, 4  ;;  %v5840_v62 = vld [vmem:[#allocation8 + $0x3b0] ss:$8 sps:$4 sm:$0xff]  }
 0x86f   :  { %v2096_v4 = vor.u32 %v2095_v57, %v2092_v55  ;;  %v2104_v5 = vor.u32 %v2103_v60, %v2100_v58  ;;  %v2037_v6 = vsel %vm975_vm7, %v2033_v46, %v2036_v48  ;;  %v2035_v7 = vsel %vm975_vm7, %v2032_v50, %v2034_v47  ;;  %v5845_v17 = vld [vmem:[#allocation8 + $0x3c4] ss:$8 sps:$4 sm:$0xff]   ;;  %v5843_v49 = vld [vmem:[#allocation8 + $0x3c0] ss:$8 sps:$4 sm:$0xff]   ;;  %v5848_v54 = vld [vmem:[#allocation8 + $0x3d4] ss:$8 sps:$4 sm:$0xff]  }
 0x870   :  { %v2113_v9 = vor.u32 %v2112_v63, %v2109_v61  ;;  %v2121_v10 = vor.u32 %v2120_v3, %v2117_v2  ;;  %v2071_v11 = vpack.c.bf16 %v2037_v6, %v2033_v46  ;;  %v2020_v12 = vld [vmem:[#allocation2 + $0x30] sm:$0x1]  ;;  %v2070_v13 = vpack.c.bf16 %v2035_v7, %v2032_v50  ;;  %v5837_v50 = vld [vmem:[#allocation8 + $0x3a0] ss:$8 sps:$4 sm:$0xff]   ;;  %v5851_v57 = vld [vmem:[#allocation8 + $0x3e4] ss:$8 sps:$4 sm:$0xff]  }
 0x871   :  { %v2021_v16 = vld [vmem:[#allocation2 + $0x38] sm:$0x1]  ;;  %v2038_v18 = vrot.slane %v2020_v12, 1  ;;  %v2105_v20 = vsel %vm2088_vm10, %v2096_v4, %v2104_v5  ;;  %v5854_v60 = vld [vmem:[#allocation8 + $0x3f4] ss:$8 sps:$4 sm:$0xff]  }
 0x872   :  { %v2122_v19 = vsel %vm2088_vm10, %v2113_v9, %v2121_v10  ;;  %v2040_v22 = vrot.slane %v2021_v16, 1  ;;  %v2141_v23 = vshrl.u32 %v2071_v11, 16  ;;  %v2144_v24 = vshll.u32 %v2071_v11, 16  ;;  %v5846_v55 = vld [vmem:[#allocation8 + $0x3d0] ss:$8 sps:$4 sm:$0xff]  }
 0x873   :  { %2715 = vmatprep.mubr.bf16.mxu1 %v2122_v19  ;;  %v2039_v25 = vsel %vm975_vm7, %v2034_v47, %v2038_v18  ;;  %v2124_v26 = vshrl.u32 %v2070_v13, 16  ;;  %v2127_v27 = vshll.u32 %v2070_v13, 16  ;;  %v5852_v61 = vld [vmem:[#allocation8 + $0x3f0] ss:$8 sps:$4 sm:$0xff]   ;;  %v5857_v63 = vld [vmem:[#allocation8 + $0x404] ss:$8 sps:$4 sm:$0xff]  }
 0x874   :  { %2716 = vmatmul.mubr.bf16.vlgmr.msra.gmra.mrb[20].mxu1 %v2105_v20  ;;  %v2041_v28 = vsel %vm975_vm7, %v2036_v48, %v2040_v22  ;;  %v2076_v29 = vpack.c.bf16 %v2039_v25, %v2039_v25  ;;  %v2143_v40 = vrot.slane %v2141_v23, 3  ;;  %v2146_v41 = vrot.slane %v2144_v24, 4  ;;  %v5860_v3 = vld [vmem:[#allocation8 + $0x414] ss:$8 sps:$4 sm:$0xff]   ;;  %v5858_v4 = vld [vmem:[#allocation8 + $0x410] ss:$8 sps:$4 sm:$0xff]  }
 0x875   :  { %2735 = vmatpush1.bf16.msra.mxu1 %v5831_v14  ;;  %2725 = vmatprep.mubr.bf16.mxu1 %v2117_v2  ;;  %v2077_v32 = vpack.c.bf16 %v2041_v28, %v2041_v28  ;;  %v2126_v33 = vrot.slane %v2124_v26, 3  ;;  %v2129_v35 = vrot.slane %v2127_v27, 4  ;;  %v5855_v2 = vld [vmem:[#allocation8 + $0x400] ss:$8 sps:$4 sm:$0xff]   ;;  %v5863_v5 = vld [vmem:[#allocation8 + $0x424] ss:$8 sps:$4 sm:$0xff]  }
 0x876   :  { %2736 = vmatprep.subr.bf16.mxu1 %v5836_v21  ;;  %v2132_v36 = vshrl.u32 %v2076_v29, 16  ;;  %v2135_v37 = vshll.u32 %v2076_v29, 16  ;;  %v2147_v8 = vor.u32 %v2146_v41, %v2143_v40  ;;  %v5861_v6 = vld [vmem:[#allocation8 + $0x420] ss:$8 sps:$4 sm:$0xff]   ;;  %v5866_v7 = vld [vmem:[#allocation8 + $0x434] ss:$8 sps:$4 sm:$0xff]  }
 0x877   :  { %v2149_v42 = vshrl.u32 %v2077_v32, 16  ;;  %v2152_v45 = vshll.u32 %v2077_v32, 16  ;;  %v2130_v46 = vor.u32 %v2129_v35, %v2126_v33  ;;  %v5864_v9 = vld [vmem:[#allocation8 + $0x430] ss:$8 sps:$4 sm:$0xff]   ;;  %v5869_v10 = vld [vmem:[#allocation8 + $0x444] ss:$8 sps:$4 sm:$0xff]  }
 0x878   :  { %v6914_v53 = vrot.slane %v2132_v36, 3  ;;  %v2137_v59 = vrot.slane %v2135_v37, 4  ;;  %v5867_v11 = vld [vmem:[#allocation8 + $0x440] ss:$8 sps:$4 sm:$0xff]   ;;  %v5872_v12 = vld [vmem:[#allocation8 + $0x454] ss:$8 sps:$4 sm:$0xff]  }
 0x879   :  { %2737 = vmatpush1.bf16.msra.mxu1 %v5834_v31  ;;  %v6916_v47 = vrot.slane %v2149_v42, 3  ;;  %v2154_v1 = vrot.slane %v2152_v45, 4  ;;  %v2023_v13 = vld [vmem:[#allocation2 + $0x18] sm:$0xfe]  ;;  %v5875_v20 = vld [vmem:[#allocation8 + $0x464] ss:$8 sps:$4 sm:$0xff]  }
 0x87a   :  { %2738 = vmatprep.subr.bf16.mxu1 %v5839_v34  ;;  %v2138_v48 = vor.u32 %v2137_v59, %v6914_v53  ;;  %v2025_v14 = vld [vmem:[#allocation2 + $0x38] sm:$0x3]  ;;  %v2053_v18 = vrot.slane %v2023_v13, 2  ;;  %v2056_v21 = vrot.slane %v6898_v44, 2  ;;  %v5873_v22 = vld [vmem:[#allocation8 + $0x460] ss:$8 sps:$4 sm:$0xff]  }
 0x87b   :  { %v2155_v51 = vor.u32 %v2154_v1, %v6916_v47  ;;  %v5870_v16 = vld [vmem:[#allocation8 + $0x450] ss:$8 sps:$4 sm:$0xff]   ;;  %v2060_v19 = vrot.slane %v2025_v14, 2  ;;  %v5878_v25 = vld [vmem:[#allocation8 + $0x474] ss:$8 sps:$4 sm:$0xff]  }
 0x87c   :  { %2726 = vmatmul.mubr.bf16.gmra.mrb[24].mxu1 %v2100_v58  ;;  %v6921_v52 = vsel %vm2088_vm10, %v2130_v46, %v2138_v48  ;;  %v5849_v58 = vld [vmem:[#allocation8 + $0x3e0] ss:$8 sps:$4 sm:$0xff]   ;;  %v2057_v23 = vsel %vm985_vm8, %v2053_v18, %v2056_v21  ;;  %v5876_v28 = vld [vmem:[#allocation8 + $0x470] ss:$8 sps:$4 sm:$0xff]   ;;  %v5881_v29 = vld [vmem:[#allocation8 + $0x484] ss:$8 sps:$4 sm:$0xff]  }
 0x87d   :  { %2739 = vmatpush1.bf16.msra.mxu1 %v5837_v50  ;;  %v2156_v56 = vsel %vm2088_vm10, %v2147_v8, %v2155_v51  ;;  %v2061_v24 = vsel %vm985_vm8, %v2056_v21, %v2060_v19  ;;  %v2073_v26 = vpack.c.bf16 %v2057_v23, %v2053_v18  ;;  %v5879_v44 = vld [vmem:[#allocation8 + $0x480] ss:$8 sps:$4 sm:$0xff]   ;;  %v5884_v35 = vld [vmem:[#allocation8 + $0x494] ss:$8 sps:$4 sm:$0xff]   ;;  %v5882_v42 = vld [vmem:[#allocation8 + $0x490] ss:$8 sps:$4 sm:$0xff]  }
 0x87e   :  { %2766 = vmatprep.mubr.bf16.mxu1 %v2156_v56  ;;  %2740 = vmatprep.subr.bf16.mxu1 %v5842_v0  ;;  %v2079_v27 = vpack.c.bf16 %v2061_v24, %v2061_v24  ;;  %v5887_v45 = vld [vmem:[#allocation8 + $0x4a4] ss:$8 sps:$4 sm:$0xff]   ;;  %v5885_v1 = vld [vmem:[#allocation8 + $0x4a0] ss:$8 sps:$4 sm:$0xff]   ;;  %v5890_v0 = vld [vmem:[#allocation8 + $0x4b4] ss:$8 sps:$4 sm:$0xff]  }
 0x87f   :  { %v2175_v31 = vshrl.u32 %v2073_v26, 16  ;;  %v2178_v32 = vshll.u32 %v2073_v26, 16  ;;  %v5888_v48 = vld [vmem:[#allocation8 + $0x4b0] ss:$8 sps:$4 sm:$0xff]   ;;  %v5891_v8 = vld [vmem:[#allocation8 + $0x4c0] ss:$8 sps:$4 sm:$0xff]  }
 0x880   :  { %v2183_v34 = vshrl.u32 %v2079_v27, 16  ;;  %v2186_v33 = vshll.u32 %v2079_v27, 16  ;;  %v5896_v51 = vld [vmem:[#allocation8 + $0x4d4] ss:$8 sps:$4 sm:$0xff]   ;;  %v5899_v56 = vld [vmem:[#allocation8 + $0x4e4] ss:$8 sps:$4 sm:$0xff]  }
 0x881   :  { %2741 = vmatpush1.bf16.msra.mxu1 %v5840_v62  ;;  %v2177_v36 = vrot.slane %v2175_v31, 3  ;;  %v2180_v37 = vrot.slane %v2178_v32, 4  ;;  %v5897_v62 = vld [vmem:[#allocation8 + $0x4e0] ss:$8 sps:$4 sm:$0xff]   ;;  %v5923_v18 = vld [vmem:[#allocation8 + $0x564] ss:$8 sps:$4 sm:$0xff]  }
 0x882   :  { %2742 = vmatprep.subr.bf16.mxu1 %v5845_v17  ;;  %v6928_v40 = vrot.slane %v2183_v34, 3  ;;  %v2188_v41 = vrot.slane %v2186_v33, 4  ;;  %v5902_v17 = vld [vmem:[#allocation8 + $0x4f4] ss:$8 sps:$4 sm:$0xff]   ;;  %v5927_v34 = vld [vmem:[%s7219_s7 + $0x100] sm:$0xff]  }
 0x883   :  { %v2181_v59 = vor.u32 %v2180_v37, %v2177_v36  ;;  %v5926_v23 = vld [vmem:[#allocation8 + $0x574] ss:$8 sps:$4 sm:$0xff]   ;;  %v5928_v33 = vld [vmem:[%s7219_s7 + $0xc0] sm:$0xff]   ;;  %5371 = vmatprep.subr.bf16.mxu0 %v5927_v34 }
 0x884   :  { %v2189_v50 = vor.u32 %v2188_v41, %v6928_v40  ;;  %5372 = vmatpush3.bf16.msra.mxu0 %v5928_v33  ;;  %v5931_v36 = vld [vmem:[%s7219_s7 + $0x110] sm:$0xff]   ;;  %v5934_v41 = vld [vmem:[%s7219_s7 + $0xd8] sm:$0xff]   ;;  %v5943_v33 = vld [vmem:[#allocation9 + $0x20] ss:$8 sps:$4 sm:$0xff]  }
 0x885   :  { %2743 = vmatpush1.bf16.msra.mxu1 %v5843_v49  ;;  %v5905_v49 = vld [vmem:[#allocation8 + $0x504] ss:$8 sps:$4 sm:$0xff]   ;;  %v5932_v37 = vld [vmem:[%s7219_s7 + $0xd0] sm:$0xff]  }
 0x886   :  { %2744 = vmatprep.subr.bf16.mxu1 %v5848_v54  ;;  %v2190_v46 = vsel %vm2088_vm10, %v2181_v59, %v2189_v50  ;;  %v5903_v54 = vld [vmem:[#allocation8 + $0x500] ss:$8 sps:$4 sm:$0xff]  }
 0x887   :  { %v5937_v59 = vld [vmem:[%s7219_s7 + $0x128] sm:$0xff]  }
 0x888   :  { %v5938_v50 = vld [vmem:[%s7219_s7 + $0xe8] sm:$0xff]  }
 0x889   :  { %2745 = vmatpush1.bf16.msra.mxu1 %v5846_v55  ;;  %v5908_v55 = vld [vmem:[#allocation8 + $0x514] ss:$8 sps:$4 sm:$0xff]  }
 0x88a   :  { %2746 = vmatprep.subr.bf16.mxu1 %v5851_v57  ;;  %v5906_v57 = vld [vmem:[#allocation8 + $0x510] ss:$8 sps:$4 sm:$0xff]  }
 0x88d   :  { %2747 = vmatpush1.bf16.msra.mxu1 %v5849_v58  ;;  %v5911_v58 = vld [vmem:[#allocation8 + $0x524] ss:$8 sps:$4 sm:$0xff]  }
 0x88e   :  { %2748 = vmatprep.subr.bf16.mxu1 %v5854_v60  ;;  %v5909_v60 = vld [vmem:[#allocation8 + $0x520] ss:$8 sps:$4 sm:$0xff]  }
 0x891   :  { %2749 = vmatpush1.bf16.msra.mxu1 %v5852_v61  ;;  %v2022_v61 = vld [vmem:[#allocation2 + $0x10] sm:$0xfe] }
 0x892   :  { %2750 = vmatprep.subr.bf16.mxu1 %v5857_v63  ;;  %v2024_v63 = vld [vmem:[#allocation2 + $0x30] sm:$0x3] }
 0x895   :  { %2751 = vmatpush1.bf16.msra.mxu1 %v5855_v2  ;;  %v5914_v2 = vld [vmem:[#allocation8 + $0x534] ss:$8 sps:$4 sm:$0xff]  }
 0x896   :  { %2752 = vmatprep.subr.bf16.mxu1 %v5860_v3  ;;  %v2052_v3 = vrot.slane %v2022_v61, 2 }
 0x899   :  { %2753 = vmatpush1.bf16.msra.mxu1 %v5858_v4  ;;  %v2058_v4 = vrot.slane %v2024_v63, 2 }
 0x89a   :  { %2754 = vmatprep.subr.bf16.mxu1 %v5863_v5  ;;  %v5912_v5 = vld [vmem:[#allocation8 + $0x530] ss:$8 sps:$4 sm:$0xff]  }
 0x89d   :  { %2755 = vmatpush1.bf16.msra.mxu1 %v5861_v6  ;;  %v5917_v6 = vld [vmem:[#allocation8 + $0x544] ss:$8 sps:$4 sm:$0xff]  }
 0x89e   :  { %2756 = vmatprep.subr.bf16.mxu1 %v5866_v7  ;;  %v2054_v7 = vrot.slane %v6890_v39, 2  ;;  %v5921_v39 = vld [vmem:[#allocation8 + $0x560] ss:$8 sps:$4 sm:$0xff]  }
 0x8a1   :  { %2757 = vmatpush1.bf16.msra.mxu1 %v5864_v9  ;;  %v2055_v9 = vsel %vm985_vm8, %v2052_v3, %v2054_v7 }
 0x8a2   :  { %2758 = vmatprep.subr.bf16.mxu1 %v5869_v10  ;;  %v2059_v10 = vsel %vm985_vm8, %v2054_v7, %v2058_v4  ;;  %v2072_v13 = vpack.c.bf16 %v2055_v9, %v2052_v3 }
 0x8a3   :  { %v2078_v14 = vpack.c.bf16 %v2059_v10, %v2059_v10 }
 0x8a4   :  { %v2158_v19 = vshrl.u32 %v2072_v13, 16 }
 0x8a5   :  { %2759 = vmatpush1.bf16.msra.mxu1 %v5867_v11  ;;  %v5915_v11 = vld [vmem:[#allocation8 + $0x540] ss:$8 sps:$4 sm:$0xff]   ;;  %v2166_v21 = vshrl.u32 %v2078_v14, 16 }
 0x8a6   :  { %2760 = vmatprep.subr.bf16.mxu1 %v5872_v12  ;;  %v5920_v12 = vld [vmem:[#allocation8 + $0x554] ss:$8 sps:$4 sm:$0xff]   ;;  %v2160_v24 = vrot.slane %v2158_v19, 3 }
 0x8a7   :  { %v2168_v26 = vrot.slane %v2166_v21, 3 }
 0x8a9   :  { %2761 = vmatpush1.bf16.msra.mxu1 %v5870_v16  ;;  %v5918_v16 = vld [vmem:[#allocation8 + $0x550] ss:$8 sps:$4 sm:$0xff]  }
 0x8aa   :  { %2762 = vmatprep.subr.bf16.mxu1 %v5875_v20  ;;  %v2161_v20 = vshll.u32 %v2072_v13, 16 }
 0x8ad   :  { %2763 = vmatpush1.bf16.msra.mxu1 %v5873_v22  ;;  %v2169_v22 = vshll.u32 %v2078_v14, 16 }
 0x8ae   :  { %2764 = vmatprep.subr.bf16.mxu1 %v5878_v25  ;;  %v2163_v25 = vrot.slane %v2161_v20, 4 }
 0x8af   :  { %v2171_v27 = vrot.slane %v2169_v22, 4 }
 0x8b1   :  { %2765 = vmatpush1.bf16.msra.mxu1 %v5876_v28  ;;  %v5924_v28 = vld [vmem:[#allocation8 + $0x570] ss:$8 sps:$4 sm:$0xff]   ;;  %v2172_v31 = vor.u32 %v2171_v27, %v2168_v26 }
 0x8b2   :  { %2785 = vmatprep.subr.bf16.mxu1 %v5881_v29  ;;  %v2164_v29 = vor.u32 %v2163_v25, %v2160_v24 }
 0x8b4   :  { %2767 = vmatmul.mubr.bf16.vlgmr.msra.gmra.mrb[20].mxu1 %v6921_v52  ;;  %v5894_v52 = vld [vmem:[#allocation8 + $0x4d0] ss:$8 sps:$4 sm:$0xff]   ;;  %v2173_v32 = vsel %vm2088_vm10, %v2164_v29, %v2172_v31 }
 0x8b5   :  { %2776 = vmatprep.mubr.bf16.mxu1 %v6916_v47  ;;  %2786 = vmatpush1.bf16.msra.mxu1 %v5879_v44  ;;  %v5893_v47 = vld [vmem:[#allocation8 + $0x4c4] ss:$8 sps:$4 sm:$0xff]  }
 0x8b6   :  { %2787 = vmatprep.subr.bf16.mxu1 %v5884_v35  ;;  %v5929_v44 = vld [vmem:[%s7219_s7 + $0x108] sm:$0xff]  }
 0x8b7   :  { %v5930_v35 = vld [vmem:[%s7219_s7 + $0xc8] sm:$0xff]   ;;  %5373 = vmatprep.subr.bf16.mxu0 %v5929_v44 }
 0x8b8   :  { %5374 = vmatpush3.bf16.msra.mxu0 %v5930_v35  ;;  %v5945_v44 = vld [vmem:[#allocation9 + $0x24] ss:$8 sps:$4 sm:$0xff]  }
 0x8b9   :  { %2788 = vmatpush1.bf16.msra.mxu1 %v5882_v42  ;;  %5375 = vmatprep.subr.bf16.mxu0 %v5931_v36  ;;  %v5935_v42 = vld [vmem:[%s7219_s7 + $0x120] sm:$0xff]  }
 0x8ba   :  { %2789 = vmatprep.subr.bf16.mxu1 %v5887_v45  ;;  %v5936_v45 = vld [vmem:[%s7219_s7 + $0xe0] sm:$0xff]  }
 0x8bb   :  { %v5948_v35 = vld [vmem:[#allocation8 + $0x584] ss:$8 sps:$4 sm:$0xff]  }
 0x8bc   :  { %2777 = vmatmul.mubr.bf16.gmra.mrb[24].mxu1 %v6914_v53  ;;  %v5900_v53 = vld [vmem:[#allocation8 + $0x4f0] ss:$8 sps:$4 sm:$0xff]   ;;  %5376 = vmatpush3.bf16.msra.mxu0 %v5932_v37 }
 0x8bd   :  { %2790 = vmatpush1.bf16.msra.mxu1 %v5885_v1  ;;  %2817 = vmatprep.mubr.bf16.mxu1 %v2190_v46  ;;  %v5939_v1 = vld [vmem:[%s7219_s7 + $0x130] sm:$0xff]   ;;  %v5941_v46 = vld [vmem:[%s7219_s7 + $0x138] sm:$0xff]  }
 0x8be   :  { %2791 = vmatprep.subr.bf16.mxu1 %v5890_v0  ;;  %v5940_v0 = vld [vmem:[%s7219_s7 + $0xf0] sm:$0xff]  }
 0x8c1   :  { %2792 = vmatpush1.bf16.msra.mxu1 %v5888_v48  ;;  %v5942_v48 = vld [vmem:[%s7219_s7 + $0xf8] sm:$0xff]  }
 0x8c2   :  { %2793 = vmatprep.subr.bf16.mxu1 %v5893_v47 }
 0x8c5   :  { %2794 = vmatpush1.bf16.msra.mxu1 %v5891_v8 }
 0x8c6   :  { %2795 = vmatprep.subr.bf16.mxu1 %v5896_v51  ;;  %v6987_v51 = vld [vmem:[#allocation14 + $0x10] sm:$0xff] }
 0x8c7   :  { %v2994_v37 = vrot.slane %v6987_v51, 6 }
 0x8c9   :  { %2796 = vmatpush1.bf16.msra.mxu1 %v5894_v52  ;;  %v2083_v52 = vrot.slane %v6987_v51, %v6752_v30 }
 0x8ca   :  { %2797 = vmatprep.subr.bf16.mxu1 %v5899_v56 }
 0x8cd   :  { %2798 = vmatpush1.bf16.msra.mxu1 %v5897_v62  ;;  %v2087_v62 = vrot.slane %v6880_v15, %v6752_v30 }
 0x8ce   :  { %2799 = vmatprep.subr.bf16.mxu1 %v5902_v17 }
 0x8d1   :  { %2800 = vmatpush1.bf16.msra.mxu1 %v5900_v53 }
 0x8d2   :  { %2801 = vmatprep.subr.bf16.mxu1 %v5905_v49 }
 0x8d5   :  { %2802 = vmatpush1.bf16.msra.mxu1 %v5903_v54 }
 0x8d6   :  { %2803 = vmatprep.subr.bf16.mxu1 %v5908_v55 }
 0x8d9   :  { %2804 = vmatpush1.bf16.msra.mxu1 %v5906_v57 }
 0x8da   :  { %2805 = vmatprep.subr.bf16.mxu1 %v5911_v58 }
 0x8dd   :  { %2806 = vmatpush1.bf16.msra.mxu1 %v5909_v60 }
 0x8de   :  { %2807 = vmatprep.subr.bf16.mxu1 %v5914_v2 }
 0x8e1   :  { %2808 = vmatpush1.bf16.msra.mxu1 %v5912_v5 }
 0x8e2   :  { %2809 = vmatprep.subr.bf16.mxu1 %v5917_v6 }
 0x8e5   :  { %2810 = vmatpush1.bf16.msra.mxu1 %v5915_v11 }
 0x8e6   :  { %2811 = vmatprep.subr.bf16.mxu1 %v5920_v12 }
 0x8e9   :  { %2812 = vmatpush1.bf16.msra.mxu1 %v5918_v16 }
 0x8ea   :  { %2813 = vmatprep.subr.bf16.mxu1 %v5923_v18 }
 0x8ed   :  { %2814 = vmatpush1.bf16.msra.mxu1 %v5921_v39 }
 0x8ee   :  { %2815 = vmatprep.subr.bf16.mxu1 %v5926_v23 }
 0x8f1   :  { %2816 = vmatpush1.bf16.msra.mxu1 %v5924_v28 }
 0x8f4   :  { %2818 = vmatmul.mubr.bf16.vlgmr.msra.gmra.mrb[20].mxu1 %v2173_v32 }
 0x8f5   :  { %2827 = vmatprep.mubr.bf16.mxu1 %v6928_v40  ;;  %v5933_v40 = vld [vmem:[%s7219_s7 + $0x118] sm:$0xff]  }
 0x8f6   :  { %5377 = vmatprep.subr.bf16.mxu0 %v5933_v40 }
 0x8f7   :  { %5378 = vmatpush3.bf16.msra.mxu0 %v5934_v41 }
 0x8f8   :  { %5379 = vmatprep.subr.bf16.mxu0 %v5935_v42 }
 0x8fb   :  { %5380 = vmatpush3.bf16.msra.mxu0 %v5936_v45 }
 0x8fc   :  { %2828 = vmatmul.mubr.bf16.gmra.mrb[24].mxu1 %v2168_v26  ;;  %5381 = vmatprep.subr.bf16.mxu0 %v5937_v59 }
 0x8ff   :  { %5382 = vmatpush3.bf16.msra.mxu0 %v5938_v50 }
 0x900   :  { %5383 = vmatprep.subr.bf16.mxu0 %v5939_v1  ;;  %v5946_v1 = vld [vmem:[#allocation8 + $0x580] ss:$8 sps:$4 sm:$0xff]  }
 0x903   :  { %5384 = vmatpush3.bf16.msra.mxu0 %v5940_v0 }
 0x904   :  { %5385 = vmatprep.subr.bf16.mxu0 %v5941_v46  ;;  %v5951_v46 = vld [vmem:[#allocation8 + $0x594] ss:$8 sps:$4 sm:$0xff]  }
 0x907   :  { %5386 = vmatpush3.bf16.msra.mxu0 %v5942_v48  ;;  %v5949_v48 = vld [vmem:[#allocation8 + $0x590] ss:$8 sps:$4 sm:$0xff]  }
 0x908   :  { %3055 = vmatprep.subr.bf16.mxu0 %v5945_v44 }
 0x9c7   :  { %v2819_v47 = vpop.f32.mrb[20].mxu1 }
 0x9c8   :  { %v2821_v8 = vpop.f32.mrb[21].mxu1  ;;  %v6997_v54 = vadd.f32 %v2819_v47, %v2083_v52  ;;  %v5954_v47 = vld [vmem:[#allocation8 + $0x5a4] ss:$8 sps:$4 sm:$0xff]  }
 0x9c9   :  { %v2823_v56 = vpop.f32.mrb[22].mxu1  ;;  %v6999_v55 = vadd.f32 %v2821_v8, %v2087_v62  ;;  %v5952_v8 = vld [vmem:[#allocation8 + $0x5a0] ss:$8 sps:$4 sm:$0xff]  }
 0x9ca   :  { %v2825_v17 = vpop.f32.mrb[23].mxu1  ;;  %v6993_v53 = vadd.f32 %v2823_v56, %v2083_v52  ;;  %v2836_v2 = vmax.f32 %v6997_v54, 0.0  ;;  %v5955_v56 = vld [vmem:[#allocation8 + $0x5b0] ss:$8 sps:$4 sm:$0xff]  }
 0x9cb   :  { %v6995_v49 = vadd.f32 %v2825_v17, %v2087_v62  ;;  %v2837_v5 = vmax.f32 %v6999_v55, 0.0  ;;  %v5958_v17 = vld [vmem:[#allocation8 + $0x5c0] ss:$8 sps:$4 sm:$0xff]  }
 0x9cc   :  { %v2838_v57 = vmax.f32 %v6993_v53, 0.0 }
 0x9cd   :  { %v2839_v60 = vmax.f32 %v6995_v49, 0.0 }
 0x9ce   :  { %v2876_v9 = vadd.f32 %v2838_v57, %v2836_v2 }
 0x9cf   :  { %v2829_v58 = vpop.f32.mrb[24].mxu1  ;;  %v2885_v11 = vadd.f32 %v2839_v60, %v2837_v5 }
 0x9d0   :  { %v7003_v61 = vadd.f32 %v2829_v58, %v2083_v52  ;;  %v2831_v63 = vpop.f32.mrb[25].mxu1  ;;  %v5957_v52 = vld [vmem:[#allocation8 + $0x5b4] ss:$8 sps:$4 sm:$0xff]  }
 0x9d1   :  { %v7006_v3 = vadd.f32 %v2831_v63, %v2087_v62  ;;  %v2833_v4 = vpop.f32.mrb[26].mxu1  ;;  %v5960_v62 = vld [vmem:[#allocation8 + $0x5c4] ss:$8 sps:$4 sm:$0xff]   ;;  %v5963_v58 = vld [vmem:[#allocation8 + $0x5d4] ss:$8 sps:$4 sm:$0xff]  }
 0x9d2   :  { %v2840_v6 = vmax.f32 %v7003_v61, 0.0  ;;  %v2834_v7 = vpop.f32.mrb[27].mxu1  ;;  %v5961_v63 = vld [vmem:[#allocation8 + $0x5d0] ss:$8 sps:$4 sm:$0xff]   ;;  %v5966_v4 = vld [vmem:[#allocation8 + $0x5e4] ss:$8 sps:$4 sm:$0xff]  }
 0x9d3   :  { %v2841_v10 = vmax.f32 %v7006_v3, 0.0  ;;  %v5964_v7 = vld [vmem:[#allocation8 + $0x5e0] ss:$8 sps:$4 sm:$0xff]  }
 0x9d4   :  { %v2877_v12 = vsel %vm569_vm5, %v2840_v6, 0.0 }
 0x9d5   :  { %v2878_v13 = vadd.f32 %v2877_v12, %v2876_v9  ;;  %v2886_v14 = vsel %vm569_vm5, %v2841_v10, 0.0  ;;  %v5969_v9 = vld [vmem:[#allocation8 + $0x5f4] ss:$8 sps:$4 sm:$0xff]   ;;  %v5972_v12 = vld [vmem:[#allocation8 + $0x604] ss:$8 sps:$4 sm:$0xff]  }
 0x9d6   :  { %v2887_v16 = vadd.f32 %v2886_v14, %v2885_v11  ;;  %v5967_v11 = vld [vmem:[#allocation8 + $0x5f0] ss:$8 sps:$4 sm:$0xff]   ;;  %v5975_v14 = vld [vmem:[#allocation8 + $0x614] ss:$8 sps:$4 sm:$0xff]  }
 0x9d7   :  { %v2879_v18 = vrot.slane %v2878_v13, 4 }
 0x9d8   :  { %v2888_v19 = vrot.slane %v2887_v16, 4 }
 0x9d9   :  { %v2880_v20 = vadd.f32 %v2879_v18, %v2878_v13  ;;  %v5970_v13 = vld [vmem:[#allocation8 + $0x600] ss:$8 sps:$4 sm:$0xff]   ;;  %v5978_v18 = vld [vmem:[#allocation8 + $0x624] ss:$8 sps:$4 sm:$0xff]  }
 0x9da   :  { %v2889_v21 = vadd.f32 %v2888_v19, %v2887_v16  ;;  %v5973_v16 = vld [vmem:[#allocation8 + $0x610] ss:$8 sps:$4 sm:$0xff]   ;;  %v5976_v19 = vld [vmem:[#allocation8 + $0x620] ss:$8 sps:$4 sm:$0xff]  }
 0x9db   :  { %v2881_v22 = vrot.slane %v2880_v20, 2 }
 0x9dc   :  { %v2890_v39 = vrot.slane %v2889_v21, 2 }
 0x9dd   :  { %v2882_v23 = vadd.f32 %v2881_v22, %v2880_v20  ;;  %v5981_v20 = vld [vmem:[#allocation8 + $0x634] ss:$8 sps:$4 sm:$0xff]   ;;  %v5984_v22 = vld [vmem:[#allocation8 + $0x644] ss:$8 sps:$4 sm:$0xff]  }
 0x9de   :  { %v2891_v24 = vadd.f32 %v2890_v39, %v2889_v21  ;;  %v5979_v21 = vld [vmem:[#allocation8 + $0x630] ss:$8 sps:$4 sm:$0xff]   ;;  %v5982_v39 = vld [vmem:[#allocation8 + $0x640] ss:$8 sps:$4 sm:$0xff]  }
 0x9df   :  { %v2883_v25 = vrot.slane %v2882_v23, 1 }
 0x9e0   :  { %v2892_v26 = vrot.slane %v2891_v24, 1 }
 0x9e1   :  { %v2884_v27 = vadd.f32 %v2883_v25, %v2882_v23  ;;  %v5987_v23 = vld [vmem:[#allocation8 + $0x654] ss:$8 sps:$4 sm:$0xff]   ;;  %v5990_v25 = vld [vmem:[#allocation8 + $0x664] ss:$8 sps:$4 sm:$0xff]  }
 0x9e2   :  { %v2893_v28 = vadd.f32 %v2892_v26, %v2891_v24  ;;  %v5985_v24 = vld [vmem:[#allocation8 + $0x650] ss:$8 sps:$4 sm:$0xff]   ;;  %v5988_v26 = vld [vmem:[#allocation8 + $0x660] ss:$8 sps:$4 sm:$0xff]  }
 0x9e3   :  { %v2894_v29 = vmul.f32 0.05882353, %v2884_v27  ;;  %v5993_v27 = vld [vmem:[#allocation8 + $0x674] ss:$8 sps:$4 sm:$0xff]  }
 0x9e4   :  { %v2895_v31 = vmul.f32 0.05882353, %v2893_v28  ;;  %v5991_v28 = vld [vmem:[#allocation8 + $0x670] ss:$8 sps:$4 sm:$0xff]  }
 0x9e5   :  { %v2896_v34 = vpack.c.bf16 %v2894_v29, %v2894_v29  ;;  %v5996_v29 = vld [vmem:[#allocation8 + $0x684] ss:$8 sps:$4 sm:$0xff]  }
 0x9e6   :  { %v2897_v32 = vpack.c.bf16 %v2895_v31, %v2895_v31  ;;  %v3048_v31 = vrot.slane %v6987_v51, 7 }
 0x9e8   :  { %3028 = vmatprep.mubr.bf16.mxu0 %v2897_v32  ;;  %v3049_v32 = vrot.slane %v6880_v15, 7 }
 0x9e9   :  { %3029 = vmatmul.mubr.bf16.vlgmr.msra.gmra.mrb[28].mxu0 %v2896_v34 }
 0x9ea   :  { %3087 = vmatprep.mubr.bf16.mxu0 %v6446_v43  ;;  %3056 = vmatpush1.bf16.msra.mxu0 %v5943_v33 }
 0x9eb   :  { %3896 = vmatprep.subr.bf16.mxu0 %v5948_v35 }
 0xabc   :  { %v5387_v36 = vpop.f32.mrb[28].mxu0 }
 0xabd   :  { %v5388_v40 = vpop.f32.mrb[29].mxu0 }
 0xabe   :  { %v5389_v41 = vadd.f32 %v5388_v40, %v5387_v36  ;;  %v5390_v42 = vpop.f32.mrb[30].mxu0 }
 0xabf   :  { %v5391_v45 = vpop.f32.mrb[31].mxu0 }
 0xac0   :  { %v3031_v59 = vadd.f32 %v5389_v41, %v2994_v37 }
 0xac2   :  { %v3036_v50 = vmax.f32 %v3031_v59, 0.0 }
 0xac4   :  { %v3037_v0 = vpack.c.bf16 %v3036_v50, %v3036_v50 }
 0xac6   :  { %5150 = vmatmul.mubr.msk.bf16.vlgmr.msra.gmra.mrb[32].mxu0 %vm822_vm6, %v3037_v0 }
 0xac7   :  { %3897 = vmatpush1.bf16.msra.mxu0 %v5946_v1 }
 0xac8   :  { %3898 = vmatprep.subr.bf16.mxu0 %v5951_v46 }
 0xacb   :  { %3899 = vmatpush1.bf16.msra.mxu0 %v5949_v48  ;;  %v3224_v48 = vld [vmem:[#allocation2] sm:$0x80] }
 0xacc   :  { %3900 = vmatprep.subr.bf16.mxu0 %v5954_v47 }
 0xacf   :  { %3901 = vmatpush1.bf16.msra.mxu0 %v5952_v8 }
 0xad0   :  { %3902 = vmatprep.subr.bf16.mxu0 %v5957_v52 }
 0xad3   :  { %3903 = vmatpush1.bf16.msra.mxu0 %v5955_v56  ;;  %v3225_v56 = vld [vmem:[#allocation2 + $0x8] sm:$0x80] }
 0xad4   :  { %3904 = vmatprep.subr.bf16.mxu0 %v5960_v62 }
 0xad7   :  { %3905 = vmatpush1.bf16.msra.mxu0 %v5958_v17 }
 0xad8   :  { %3906 = vmatprep.subr.bf16.mxu0 %v5963_v58 }
 0xadb   :  { %3907 = vmatpush1.bf16.msra.mxu0 %v5961_v63 }
 0xadc   :  { %3908 = vmatprep.subr.bf16.mxu0 %v5966_v4 }
 0xadf   :  { %3909 = vmatpush1.bf16.msra.mxu0 %v5964_v7 }
 0xae0   :  { %3910 = vmatprep.subr.bf16.mxu0 %v5969_v9 }
 0xae3   :  { %3911 = vmatpush1.bf16.msra.mxu0 %v5967_v11 }
 0xae4   :  { %3912 = vmatprep.subr.bf16.mxu0 %v5972_v12 }
 0xae7   :  { %3913 = vmatpush1.bf16.msra.mxu0 %v5970_v13 }
 0xae8   :  { %3914 = vmatprep.subr.bf16.mxu0 %v5975_v14 }
 0xaeb   :  { %3915 = vmatpush1.bf16.msra.mxu0 %v5973_v16 }
 0xaec   :  { %3916 = vmatprep.subr.bf16.mxu0 %v5978_v18 }
 0xaef   :  { %3917 = vmatpush1.bf16.msra.mxu0 %v5976_v19 }
 0xaf0   :  { %3918 = vmatprep.subr.bf16.mxu0 %v5981_v20 }
 0xaf3   :  { %3919 = vmatpush1.bf16.msra.mxu0 %v5979_v21 }
 0xaf4   :  { %3920 = vmatprep.subr.bf16.mxu0 %v5984_v22 }
 0xaf7   :  { %3921 = vmatpush1.bf16.msra.mxu0 %v5982_v39 }
 0xaf8   :  { %3922 = vmatprep.subr.bf16.mxu0 %v5987_v23 }
 0xafb   :  { %3923 = vmatpush1.bf16.msra.mxu0 %v5985_v24 }
 0xafc   :  { %3924 = vmatprep.subr.bf16.mxu0 %v5990_v25 }
 0xaff   :  { %3925 = vmatpush1.bf16.msra.mxu0 %v5988_v26 }
 0xb00   :  { %3926 = vmatprep.subr.bf16.mxu0 %v5993_v27 }
 0xb03   :  { %3927 = vmatpush1.bf16.msra.mxu0 %v5991_v28 }
 0xb04   :  { %3947 = vmatprep.subr.bf16.mxu0 %v5996_v29  ;;  %v5994_v29 = vld [vmem:[#allocation8 + $0x680] ss:$8 sps:$4 sm:$0xff]  }
 0xb99   :  { %v3089_v34 = vpop.f32.mrb[32].mxu0 }
 0xb9a   :  { %v3090_v33 = vadd.f32 %v3089_v34, %v3048_v31  ;;  %v3091_v44 = vpop.f32.mrb[33].mxu0 }
 0xb9b   :  { %v3092_v35 = vadd.f32 %v3091_v44, %v3049_v32  ;;  %v3093_v36 = vpop.f32.mrb[34].mxu0  ;;  %v5999_v44 = vld [vmem:[#allocation8 + $0x694] ss:$8 sps:$4 sm:$0xff]  }
 0xb9c   :  { %v5151_v37 = vmul.f32 -1.442695, %v3090_v33  ;;  %v3094_v40 = vpop.f32.mrb[35].mxu0 }
 0xb9d   :  { %v5152_v41 = vmul.f32 -1.442695, %v3092_v35 }
 0xb9e   :  { %6221 = vpow2.f32 %v5151_v37 }
 0xb9f   :  { %6223 = vpow2.f32 %v5152_v41 }
 0xba8   :  { %v6222_v42 = vpop.eup %6221 }
 0xba9   :  { %v6224_v45 = vpop.eup %6223  ;;  %v3102_v59 = vadd.f32 1.0, %v6222_v42 }
 0xbaa   :  { %v3103_v50 = vadd.f32 1.0, %v6224_v45 }
 0xbab   :  { %6225 = vrcp.f32 %v3102_v59 }
 0xbac   :  { %6227 = vrcp.f32 %v3103_v50  ;;  %v5997_v50 = vld [vmem:[#allocation8 + $0x690] ss:$8 sps:$4 sm:$0xff]  }
 0xbb5   :  { %v6226_v1 = vpop.eup %6225 }
 0xbb6   :  { %v6228_v0 = vpop.eup %6227  ;;  %v3111_v15 = vrot.slane %v6226_v1, %v6752_v30 }
 0xbb7   :  { %v3115_v46 = vrot.slane %v6228_v0, %v6752_v30  ;;  %v6002_v0 = vld [vmem:[#allocation8 + $0x6a4] ss:$8 sps:$4 sm:$0xff]  }
 0xbb8   :  { %v3116_v47 = vmul.f32 %v3111_v15, %v2836_v2  ;;  %v7036_v8 = vmul.f32 %v3111_v15, %v2838_v57  ;;  %v3120_v52 = vmul.f32 %v3111_v15, %v2840_v6 }
 0xbb9   :  { %v3117_v62 = vmul.f32 %v3115_v46, %v2837_v5  ;;  %v7044_v17 = vmul.f32 %v3115_v46, %v2839_v60  ;;  %v3121_v58 = vmul.f32 %v3115_v46, %v2841_v10 }
 0xbba   :  { %3220 = vst [vmem:[#allocation2 + $0x20] sm:$0xff] %v7036_v8  ;;  %3218 = vst [vmem:[#allocation2 + $0x10] sm:$0xff] %v3116_v47  ;;  %v3282_v53 = vpack.c.bf16 %v3116_v47, %v3224_v48  ;;  %v3288_v54 = vpack.c.bf16 %v7036_v8, %v7036_v8  ;;  %v3246_v57 = vrot.slane %v3116_v47, 1  ;;  %v3248_v61 = vrot.slane %v7036_v8, 1 }
 0xbbb   :  { %3222 = vst [vmem:[#allocation2 + $0x30] sm:$0x1] %v3120_v52  ;;  %3219 = vst [vmem:[#allocation2 + $0x18] sm:$0xff] %v3117_v62  ;;  %v3283_v55 = vpack.c.bf16 %v3117_v62, %v3225_v56  ;;  %v3289_v49 = vpack.c.bf16 %v7044_v17, %v7044_v17  ;;  %v3247_v60 = vrot.slane %v3117_v62, 1  ;;  %v3250_v2 = vrot.slane %v7044_v17, 1 }
 0xbbc   :  { %3223 = vst [vmem:[#allocation2 + $0x38] sm:$0x1] %v3121_v58  ;;  %v3303_v3 = vshrl.u32 %v3282_v53, 16  ;;  %v3306_v5 = vshll.u32 %v3282_v53, 16  ;;  %v3311_v6 = vshrl.u32 %v3288_v54, 16  ;;  %v3314_v10 = vshll.u32 %v3288_v54, 16 }
 0xbbd   :  { %v3320_v63 = vshrl.u32 %v3283_v55, 16  ;;  %v3323_v4 = vshll.u32 %v3283_v55, 16  ;;  %v3328_v7 = vshrl.u32 %v3289_v49, 16  ;;  %v3331_v9 = vshll.u32 %v3289_v49, 16  ;;  %v6005_v49 = vld [vmem:[#allocation8 + $0x6b4] ss:$8 sps:$4 sm:$0xff]  }
 0xbbe   :  { %v3305_v11 = vrot.slane %v3303_v3, 3  ;;  %v3308_v12 = vrot.slane %v3306_v5, 4  ;;  %v3313_v13 = vrot.slane %v3311_v6, 3  ;;  %v3316_v14 = vrot.slane %v3314_v10, 4 }
 0xbbf   :  { %v3322_v16 = vrot.slane %v3320_v63, 3  ;;  %v3325_v18 = vrot.slane %v3323_v4, 4  ;;  %v3330_v19 = vrot.slane %v3328_v7, 3  ;;  %v3333_v20 = vrot.slane %v3331_v9, 4  ;;  %v6003_v63 = vld [vmem:[#allocation8 + $0x6b0] ss:$8 sps:$4 sm:$0xff]  }
 0xbc0   :  { %v3309_v21 = vor.u32 %v3308_v12, %v3305_v11  ;;  %v3317_v22 = vor.u32 %v3316_v14, %v3313_v13  ;;  %v3251_v39 = vsel %vm975_vm7, %v3247_v60, %v3250_v2  ;;  %v3249_v23 = vsel %vm975_vm7, %v3246_v57, %v3248_v61  ;;  %v6008_v4 = vld [vmem:[#allocation8 + $0x6c4] ss:$8 sps:$4 sm:$0xff]   ;;  %v6006_v7 = vld [vmem:[#allocation8 + $0x6c0] ss:$8 sps:$4 sm:$0xff]   ;;  %v6011_v9 = vld [vmem:[#allocation8 + $0x6d4] ss:$8 sps:$4 sm:$0xff]  }
 0xbc1   :  { %v3326_v24 = vor.u32 %v3325_v18, %v3322_v16  ;;  %v3334_v25 = vor.u32 %v3333_v20, %v3330_v19  ;;  %v3285_v26 = vpack.c.bf16 %v3251_v39, %v3247_v60  ;;  %v3284_v28 = vpack.c.bf16 %v3249_v23, %v3246_v57  ;;  %v6000_v57 = vld [vmem:[#allocation8 + $0x6a0] ss:$8 sps:$4 sm:$0xff]   ;;  %v6009_v11 = vld [vmem:[#allocation8 + $0x6d0] ss:$8 sps:$4 sm:$0xff]   ;;  %v6014_v12 = vld [vmem:[#allocation8 + $0x6e4] ss:$8 sps:$4 sm:$0xff]  }
 0xbc2   :  { %v3234_v27 = vld [vmem:[#allocation2 + $0x30] sm:$0x1]  ;;  %v3318_v33 = vsel %vm2088_vm10, %v3309_v21, %v3317_v22  ;;  %v6017_v14 = vld [vmem:[#allocation8 + $0x6f4] ss:$8 sps:$4 sm:$0xff]   ;;  %v6020_v18 = vld [vmem:[#allocation8 + $0x704] ss:$8 sps:$4 sm:$0xff]  }
 0xbc3   :  { %v3235_v31 = vld [vmem:[#allocation2 + $0x38] sm:$0x1]  ;;  %v3252_v32 = vrot.slane %v3234_v27, 1  ;;  %v3335_v34 = vsel %vm2088_vm10, %v3326_v24, %v3334_v25  ;;  %v3354_v36 = vshrl.u32 %v3285_v26, 16  ;;  %v3357_v37 = vshll.u32 %v3285_v26, 16 }
 0xbc4   :  { %v3254_v35 = vrot.slane %v3235_v31, 1  ;;  %3928 = vmatprep.mubr.bf16.mxu0 %v3335_v34  ;;  %v3337_v41 = vshrl.u32 %v3284_v28, 16  ;;  %v3340_v42 = vshll.u32 %v3284_v28, 16  ;;  %v6015_v16 = vld [vmem:[#allocation8 + $0x6f0] ss:$8 sps:$4 sm:$0xff]  }
 0xbc5   :  { %v3253_v40 = vsel %vm975_vm7, %v3248_v61, %v3252_v32  ;;  %3929 = vmatmul.mubr.bf16.vlgmr.msra.gmra.mrb[36].mxu0 %v3318_v33  ;;  %v3356_v52 = vrot.slane %v3354_v36, 3  ;;  %v3359_v56 = vrot.slane %v3357_v37, 4  ;;  %v6023_v20 = vld [vmem:[#allocation8 + $0x714] ss:$8 sps:$4 sm:$0xff]   ;;  %v6021_v21 = vld [vmem:[#allocation8 + $0x710] ss:$8 sps:$4 sm:$0xff]  }
 0xbc6   :  { %v3255_v45 = vsel %vm975_vm7, %v3250_v2, %v3254_v35  ;;  %v3290_v59 = vpack.c.bf16 %v3253_v40, %v3253_v40  ;;  %3948 = vmatpush1.bf16.msra.mxu0 %v5994_v29  ;;  %3938 = vmatprep.mubr.bf16.mxu0 %v3330_v19  ;;  %v3339_v15 = vrot.slane %v3337_v41, 3  ;;  %v3342_v46 = vrot.slane %v3340_v42, 4  ;;  %v6018_v19 = vld [vmem:[#allocation8 + $0x700] ss:$8 sps:$4 sm:$0xff]   ;;  %v6026_v22 = vld [vmem:[#allocation8 + $0x724] ss:$8 sps:$4 sm:$0xff]  }
 0xbc7   :  { %v3291_v1 = vpack.c.bf16 %v3255_v45, %v3255_v45  ;;  %3949 = vmatprep.subr.bf16.mxu0 %v5999_v44  ;;  %v3360_v3 = vor.u32 %v3359_v56, %v3356_v52  ;;  %v6024_v39 = vld [vmem:[#allocation8 + $0x720] ss:$8 sps:$4 sm:$0xff]   ;;  %v6029_v23 = vld [vmem:[#allocation8 + $0x734] ss:$8 sps:$4 sm:$0xff]   ;;  %v6027_v24 = vld [vmem:[#allocation8 + $0x730] ss:$8 sps:$4 sm:$0xff]  }
 0xbc8   :  { %v3345_v48 = vshrl.u32 %v3290_v59, 16  ;;  %v3348_v47 = vshll.u32 %v3290_v59, 16  ;;  %v3343_v60 = vor.u32 %v3342_v46, %v3339_v15  ;;  %v6032_v25 = vld [vmem:[#allocation8 + $0x744] ss:$8 sps:$4 sm:$0xff]   ;;  %v6030_v26 = vld [vmem:[#allocation8 + $0x740] ss:$8 sps:$4 sm:$0xff]  }
 0xbc9   :  { %v3362_v62 = vshrl.u32 %v3291_v1, 16  ;;  %v3365_v58 = vshll.u32 %v3291_v1, 16  ;;  %v6035_v27 = vld [vmem:[#allocation8 + $0x754] ss:$8 sps:$4 sm:$0xff]   ;;  %v3239_v29 = vld [vmem:[#allocation2 + $0x38] sm:$0x3] }
 0xbca   :  { %v7061_v53 = vrot.slane %v3345_v48, 3  ;;  %v3350_v54 = vrot.slane %v3348_v47, 4  ;;  %3950 = vmatpush1.bf16.msra.mxu0 %v5997_v50  ;;  %v3237_v28 = vld [vmem:[#allocation2 + $0x18] sm:$0xfe]  ;;  %v3274_v34 = vrot.slane %v3239_v29, 2  ;;  %v3270_v44 = vrot.slane %v7044_v17, 2 }
 0xbcb   :  { %v7063_v61 = vrot.slane %v3362_v62, 3  ;;  %v3367_v55 = vrot.slane %v3365_v58, 4  ;;  %3951 = vmatprep.subr.bf16.mxu0 %v6002_v0  ;;  %v6033_v31 = vld [vmem:[#allocation8 + $0x750] ss:$8 sps:$4 sm:$0xff]   ;;  %v3267_v32 = vrot.slane %v3237_v28, 2 }
 0xbcc   :  { %v3351_v2 = vor.u32 %v3350_v54, %v7061_v53  ;;  %v6038_v33 = vld [vmem:[#allocation8 + $0x764] ss:$8 sps:$4 sm:$0xff]   ;;  %v6036_v35 = vld [vmem:[#allocation8 + $0x760] ss:$8 sps:$4 sm:$0xff]   ;;  %v3275_v37 = vsel %vm985_vm8, %v3270_v44, %v3274_v34  ;;  %v6041_v40 = vld [vmem:[#allocation8 + $0x774] ss:$8 sps:$4 sm:$0xff]  }
 0xbcd   :  { %v3368_v5 = vor.u32 %v3367_v55, %v7063_v61  ;;  %3939 = vmatmul.mubr.bf16.gmra.mrb[40].mxu0 %v3313_v13  ;;  %v6012_v13 = vld [vmem:[#allocation8 + $0x6e0] ss:$8 sps:$4 sm:$0xff]   ;;  %v3271_v36 = vsel %vm985_vm8, %v3267_v32, %v3270_v44  ;;  %v3293_v42 = vpack.c.bf16 %v3275_v37, %v3275_v37  ;;  %v6039_v45 = vld [vmem:[#allocation8 + $0x770] ss:$8 sps:$4 sm:$0xff]   ;;  %v6044_v59 = vld [vmem:[#allocation8 + $0x784] ss:$8 sps:$4 sm:$0xff]  }
 0xbce   :  { %v7068_v6 = vsel %vm2088_vm10, %v3343_v60, %v3351_v2  ;;  %3952 = vmatpush1.bf16.msra.mxu0 %v6000_v57  ;;  %v3287_v41 = vpack.c.bf16 %v3271_v36, %v3267_v32  ;;  %v6042_v17 = vld [vmem:[#allocation8 + $0x780] ss:$8 sps:$4 sm:$0xff]   ;;  %v6047_v46 = vld [vmem:[#allocation8 + $0x794] ss:$8 sps:$4 sm:$0xff]   ;;  %v6045_v62 = vld [vmem:[#allocation8 + $0x790] ss:$8 sps:$4 sm:$0xff]  }
 0xbcf   :  { %v3369_v10 = vsel %vm2088_vm10, %v3360_v3, %v3368_v5  ;;  %3953 = vmatprep.subr.bf16.mxu0 %v6005_v49  ;;  %v3396_v0 = vshrl.u32 %v3293_v42, 16  ;;  %v3399_v15 = vshll.u32 %v3293_v42, 16  ;;  %v6050_v58 = vld [vmem:[#allocation8 + $0x7a4] ss:$8 sps:$4 sm:$0xff]   ;;  %v6048_v55 = vld [vmem:[#allocation8 + $0x7a0] ss:$8 sps:$4 sm:$0xff]  }
 0xbd0   :  { %3979 = vmatprep.mubr.bf16.mxu0 %v3369_v10  ;;  %v3388_v50 = vshrl.u32 %v3287_v41, 16  ;;  %v3391_v1 = vshll.u32 %v3287_v41, 16  ;;  %v6053_v49 = vld [vmem:[#allocation8 + $0x7b4] ss:$8 sps:$4 sm:$0xff]   ;;  %v6051_v2 = vld [vmem:[#allocation8 + $0x7b0] ss:$8 sps:$4 sm:$0xff]  }
 0xbd1   :  { %v7075_v52 = vrot.slane %v3396_v0, 3  ;;  %v3401_v56 = vrot.slane %v3399_v15, 4  ;;  %v6054_v3 = vld [vmem:[#allocation8 + $0x7c0] ss:$8 sps:$4 sm:$0xff]   ;;  %v6059_v5 = vld [vmem:[#allocation8 + $0x7d4] ss:$8 sps:$4 sm:$0xff]  }
 0xbd2   :  { %3954 = vmatpush1.bf16.msra.mxu0 %v6003_v63  ;;  %v3390_v48 = vrot.slane %v3388_v50, 3  ;;  %v3393_v47 = vrot.slane %v3391_v1, 4  ;;  %v6062_v10 = vld [vmem:[#allocation8 + $0x7e4] ss:$8 sps:$4 sm:$0xff]   ;;  %v6060_v63 = vld [vmem:[#allocation8 + $0x7e0] ss:$8 sps:$4 sm:$0xff]  }
 0xbd3   :  { %3955 = vmatprep.subr.bf16.mxu0 %v6008_v4  ;;  %v3402_v57 = vor.u32 %v3401_v56, %v7075_v52  ;;  %v6065_v4 = vld [vmem:[#allocation8 + $0x7f4] ss:$8 sps:$4 sm:$0xff]   ;;  %v6086_v32 = vld [vmem:[#allocation8 + $0x864] ss:$8 sps:$4 sm:$0xff]  }
 0xbd4   :  { %v3394_v54 = vor.u32 %v3393_v47, %v3390_v48  ;;  %v6089_v36 = vld [vmem:[#allocation8 + $0x874] ss:$8 sps:$4 sm:$0xff]   ;;  %v6090_v0 = vld [vmem:[%s7219_s7 + $0x180] sm:$0xff]  }
 0xbd5   :  { %v6091_v15 = vld [vmem:[%s7219_s7 + $0x140] sm:$0xff]   ;;  %5393 = vmatprep.subr.bf16.mxu1 %v6090_v0  ;;  %v6094_v48 = vld [vmem:[%s7219_s7 + $0x190] sm:$0xff]   ;;  %v6097_v56 = vld [vmem:[%s7219_s7 + $0x158] sm:$0xff]  }
 0xbd6   :  { %3956 = vmatpush1.bf16.msra.mxu0 %v6006_v7  ;;  %v3403_v60 = vsel %vm2088_vm10, %v3394_v54, %v3402_v57  ;;  %v6068_v7 = vld [vmem:[#allocation8 + $0x804] ss:$8 sps:$4 sm:$0xff]   ;;  %5394 = vmatpush3.bf16.msra.mxu1 %v6091_v15  ;;  %v6095_v47 = vld [vmem:[%s7219_s7 + $0x150] sm:$0xff]  }
 0xbd7   :  { %3957 = vmatprep.subr.bf16.mxu0 %v6011_v9  ;;  %v6066_v9 = vld [vmem:[#allocation8 + $0x800] ss:$8 sps:$4 sm:$0xff]   ;;  %v6106_v0 = vld [vmem:[#allocation9 + $0x30] ss:$8 sps:$4 sm:$0xff]   ;;  %v6108_v15 = vld [vmem:[#allocation9 + $0x34] ss:$8 sps:$4 sm:$0xff]  }
 0xbd8   :  { %v6100_v54 = vld [vmem:[%s7219_s7 + $0x1a8] sm:$0xff]  }
 0xbd9   :  { %v6101_v57 = vld [vmem:[%s7219_s7 + $0x168] sm:$0xff]  }
 0xbda   :  { %3958 = vmatpush1.bf16.msra.mxu0 %v6009_v11  ;;  %v6071_v11 = vld [vmem:[#allocation8 + $0x814] ss:$8 sps:$4 sm:$0xff]  }
 0xbdb   :  { %3959 = vmatprep.subr.bf16.mxu0 %v6014_v12  ;;  %v6069_v12 = vld [vmem:[#allocation8 + $0x810] ss:$8 sps:$4 sm:$0xff]  }
 0xbde   :  { %3960 = vmatpush1.bf16.msra.mxu0 %v6012_v13  ;;  %v6074_v13 = vld [vmem:[#allocation8 + $0x824] ss:$8 sps:$4 sm:$0xff]  }
 0xbdf   :  { %3961 = vmatprep.subr.bf16.mxu0 %v6017_v14  ;;  %v6072_v14 = vld [vmem:[#allocation8 + $0x820] ss:$8 sps:$4 sm:$0xff]  }
 0xbe2   :  { %3962 = vmatpush1.bf16.msra.mxu0 %v6015_v16  ;;  %v3236_v16 = vld [vmem:[#allocation2 + $0x10] sm:$0xfe] }
 0xbe3   :  { %3963 = vmatprep.subr.bf16.mxu0 %v6020_v18  ;;  %v3238_v18 = vld [vmem:[#allocation2 + $0x30] sm:$0x3] }
 0xbe6   :  { %3964 = vmatpush1.bf16.msra.mxu0 %v6018_v19  ;;  %v6077_v19 = vld [vmem:[#allocation8 + $0x834] ss:$8 sps:$4 sm:$0xff]  }
 0xbe7   :  { %3965 = vmatprep.subr.bf16.mxu0 %v6023_v20  ;;  %v3266_v20 = vrot.slane %v3236_v16, 2 }
 0xbea   :  { %3966 = vmatpush1.bf16.msra.mxu0 %v6021_v21  ;;  %v3272_v21 = vrot.slane %v3238_v18, 2 }
 0xbeb   :  { %3967 = vmatprep.subr.bf16.mxu0 %v6026_v22  ;;  %v6075_v22 = vld [vmem:[#allocation8 + $0x830] ss:$8 sps:$4 sm:$0xff]  }
 0xbee   :  { %3968 = vmatpush1.bf16.msra.mxu0 %v6024_v39  ;;  %v6080_v39 = vld [vmem:[#allocation8 + $0x844] ss:$8 sps:$4 sm:$0xff]  }
 0xbef   :  { %3969 = vmatprep.subr.bf16.mxu0 %v6029_v23  ;;  %v3268_v23 = vrot.slane %v7036_v8, 2  ;;  %v6084_v8 = vld [vmem:[#allocation8 + $0x860] ss:$8 sps:$4 sm:$0xff]  }
 0xbf2   :  { %3970 = vmatpush1.bf16.msra.mxu0 %v6027_v24  ;;  %v3269_v24 = vsel %vm985_vm8, %v3266_v20, %v3268_v23 }
 0xbf3   :  { %3971 = vmatprep.subr.bf16.mxu0 %v6032_v25  ;;  %v3273_v25 = vsel %vm985_vm8, %v3268_v23, %v3272_v21  ;;  %v3286_v28 = vpack.c.bf16 %v3269_v24, %v3266_v20 }
 0xbf4   :  { %v3292_v29 = vpack.c.bf16 %v3273_v25, %v3273_v25 }
 0xbf5   :  { %v3371_v34 = vshrl.u32 %v3286_v28, 16 }
 0xbf6   :  { %3972 = vmatpush1.bf16.msra.mxu0 %v6030_v26  ;;  %v6078_v26 = vld [vmem:[#allocation8 + $0x840] ss:$8 sps:$4 sm:$0xff]   ;;  %v3379_v44 = vshrl.u32 %v3292_v29, 16 }
 0xbf7   :  { %3973 = vmatprep.subr.bf16.mxu0 %v6035_v27  ;;  %v6083_v27 = vld [vmem:[#allocation8 + $0x854] ss:$8 sps:$4 sm:$0xff]   ;;  %v3373_v37 = vrot.slane %v3371_v34, 3 }
 0xbf8   :  { %v3381_v41 = vrot.slane %v3379_v44, 3 }
 0xbfa   :  { %3974 = vmatpush1.bf16.msra.mxu0 %v6033_v31  ;;  %v6081_v31 = vld [vmem:[#allocation8 + $0x850] ss:$8 sps:$4 sm:$0xff]  }
 0xbfb   :  { %3975 = vmatprep.subr.bf16.mxu0 %v6038_v33  ;;  %v3374_v33 = vshll.u32 %v3286_v28, 16 }
 0xbfe   :  { %3976 = vmatpush1.bf16.msra.mxu0 %v6036_v35  ;;  %v3382_v35 = vshll.u32 %v3292_v29, 16 }
 0xbff   :  { %3977 = vmatprep.subr.bf16.mxu0 %v6041_v40  ;;  %v3376_v40 = vrot.slane %v3374_v33, 4 }
 0xc00   :  { %v3384_v42 = vrot.slane %v3382_v35, 4 }
 0xc02   :  { %3978 = vmatpush1.bf16.msra.mxu0 %v6039_v45  ;;  %v6087_v45 = vld [vmem:[#allocation8 + $0x870] ss:$8 sps:$4 sm:$0xff]   ;;  %v3385_v50 = vor.u32 %v3384_v42, %v3381_v41 }
 0xc03   :  { %3998 = vmatprep.subr.bf16.mxu0 %v6044_v59  ;;  %v3377_v59 = vor.u32 %v3376_v40, %v3373_v37 }
 0xc05   :  { %3980 = vmatmul.mubr.bf16.vlgmr.msra.gmra.mrb[36].mxu0 %v7068_v6  ;;  %v6057_v6 = vld [vmem:[#allocation8 + $0x7d0] ss:$8 sps:$4 sm:$0xff]   ;;  %v3386_v1 = vsel %vm2088_vm10, %v3377_v59, %v3385_v50 }
 0xc06   :  { %3989 = vmatprep.mubr.bf16.mxu0 %v7063_v61  ;;  %3999 = vmatpush1.bf16.msra.mxu0 %v6042_v17  ;;  %v6056_v61 = vld [vmem:[#allocation8 + $0x7c4] ss:$8 sps:$4 sm:$0xff]  }
 0xc07   :  { %4000 = vmatprep.subr.bf16.mxu0 %v6047_v46  ;;  %v6092_v17 = vld [vmem:[%s7219_s7 + $0x188] sm:$0xff]  }
 0xc08   :  { %v6093_v46 = vld [vmem:[%s7219_s7 + $0x148] sm:$0xff]   ;;  %5395 = vmatprep.subr.bf16.mxu1 %v6092_v17 }
 0xc09   :  { %5396 = vmatpush3.bf16.msra.mxu1 %v6093_v46  ;;  %v6111_v17 = vld [vmem:[#allocation11 + $0x4] ss:$8 sps:$4 sm:$0xff]  }
 0xc0a   :  { %4001 = vmatpush1.bf16.msra.mxu0 %v6045_v62  ;;  %5397 = vmatprep.subr.bf16.mxu1 %v6094_v48  ;;  %v6098_v62 = vld [vmem:[%s7219_s7 + $0x1a0] sm:$0xff]  }
 0xc0b   :  { %4002 = vmatprep.subr.bf16.mxu0 %v6050_v58  ;;  %v6099_v58 = vld [vmem:[%s7219_s7 + $0x160] sm:$0xff]  }
 0xc0d   :  { %3990 = vmatmul.mubr.bf16.gmra.mrb[40].mxu0 %v7061_v53  ;;  %v6063_v53 = vld [vmem:[#allocation8 + $0x7f0] ss:$8 sps:$4 sm:$0xff]   ;;  %5398 = vmatpush3.bf16.msra.mxu1 %v6095_v47 }
 0xc0e   :  { %4003 = vmatpush1.bf16.msra.mxu0 %v6048_v55  ;;  %4030 = vmatprep.mubr.bf16.mxu0 %v3403_v60  ;;  %v6102_v55 = vld [vmem:[%s7219_s7 + $0x1b0] sm:$0xff]   ;;  %v6104_v60 = vld [vmem:[%s7219_s7 + $0x1b8] sm:$0xff]  }
 0xc0f   :  { %4004 = vmatprep.subr.bf16.mxu0 %v6053_v49  ;;  %v6103_v49 = vld [vmem:[%s7219_s7 + $0x170] sm:$0xff]  }
 0xc12   :  { %4005 = vmatpush1.bf16.msra.mxu0 %v6051_v2  ;;  %v6105_v2 = vld [vmem:[%s7219_s7 + $0x178] sm:$0xff]  }
 0xc13   :  { %4006 = vmatprep.subr.bf16.mxu0 %v6056_v61  ;;  %v3296_v61 = vsub.s32 1, %v6724_v38 }
 0xc16   :  { %4007 = vmatpush1.bf16.msra.mxu0 %v6054_v3 }
 0xc17   :  { %4008 = vmatprep.subr.bf16.mxu0 %v6059_v5 }
 0xc1a   :  { %4009 = vmatpush1.bf16.msra.mxu0 %v6057_v6  ;;  %v3297_v6 = vrot.slane %v6987_v51, %v3296_v61 }
 0xc1b   :  { %4010 = vmatprep.subr.bf16.mxu0 %v6062_v10 }
 0xc1e   :  { %4011 = vmatpush1.bf16.msra.mxu0 %v6060_v63  ;;  %v6239_v63 = vld [vmem:[#allocation14 + $0x18] sm:$0xff] }
 0xc1f   :  { %4012 = vmatprep.subr.bf16.mxu0 %v6065_v4  ;;  %v3301_v4 = vrot.slane %v6239_v63, %v3296_v61  ;;  %v6120_v61 = vld [vmem:[#allocation11 + $0x34] ss:$8 sps:$4 sm:$0xff]   ;;  %v6124_v63 = vld [vmem:[#allocation11 + $0x50] ss:$8 sps:$4 sm:$0xff]  }
 0xc22   :  { %4013 = vmatpush1.bf16.msra.mxu0 %v6063_v53 }
 0xc23   :  { %4014 = vmatprep.subr.bf16.mxu0 %v6068_v7 }
 0xc26   :  { %4015 = vmatpush1.bf16.msra.mxu0 %v6066_v9 }
 0xc27   :  { %4016 = vmatprep.subr.bf16.mxu0 %v6071_v11 }
 0xc2a   :  { %4017 = vmatpush1.bf16.msra.mxu0 %v6069_v12 }
 0xc2b   :  { %4018 = vmatprep.subr.bf16.mxu0 %v6074_v13 }
 0xc2e   :  { %4019 = vmatpush1.bf16.msra.mxu0 %v6072_v14 }
 0xc2f   :  { %4020 = vmatprep.subr.bf16.mxu0 %v6077_v19 }
 0xc32   :  { %4021 = vmatpush1.bf16.msra.mxu0 %v6075_v22 }
 0xc33   :  { %4022 = vmatprep.subr.bf16.mxu0 %v6080_v39 }
 0xc36   :  { %4023 = vmatpush1.bf16.msra.mxu0 %v6078_v26 }
 0xc37   :  { %4024 = vmatprep.subr.bf16.mxu0 %v6083_v27 }
 0xc3a   :  { %4025 = vmatpush1.bf16.msra.mxu0 %v6081_v31 }
 0xc3b   :  { %4026 = vmatprep.subr.bf16.mxu0 %v6086_v32 }
 0xc3e   :  { %4027 = vmatpush1.bf16.msra.mxu0 %v6084_v8 }
 0xc3f   :  { %4028 = vmatprep.subr.bf16.mxu0 %v6089_v36 }
 0xc42   :  { %4029 = vmatpush1.bf16.msra.mxu0 %v6087_v45 }
 0xc45   :  { %4031 = vmatmul.mubr.bf16.vlgmr.msra.gmra.mrb[36].mxu0 %v3386_v1 }
 0xc46   :  { %4040 = vmatprep.mubr.bf16.mxu0 %v7075_v52  ;;  %v6096_v52 = vld [vmem:[%s7219_s7 + $0x198] sm:$0xff]   ;;  %s6447_s7 = smov [#allocation15]  }
 0xc47   :  { %5399 = vmatprep.subr.bf16.mxu1 %v6096_v52  ;;  %s4882_s9 = sshll.u32 %s6447_s7, 4  ;;  %s4883_s9 = int_to_ptr.vmem [resolvable:$true] %s4882_s9 }
 0xc48   :  { %5400 = vmatpush3.bf16.msra.mxu1 %v6097_v56  ;;  %s6397_s22 = scalar_lea.vmem %s4883_s9, 16  ;;  %s6401_s29 = scalar_lea.vmem %s4883_s9, 32 }
 0xc49   :  { %5401 = vmatprep.subr.bf16.mxu1 %v6098_v62  ;;  %v7169_v62 = vld [vmem:[#allocation14 + $0x20] sm:$0xff]  ;;  %p6398_p0 = scmp.ne.s32.totalorder %s4883_s9, %s6397_s22  ;;  %p6402_p1 = scmp.lt.s32.totalorder %s4883_s9, %s4883_s9 }
 0xc4a   :  { %p6403_p2 = scmp.lt.s32.totalorder %s6401_s29, %s6397_s22 }
 0xc4c   :  { %5402 = vmatpush3.bf16.msra.mxu1 %v6099_v58  ;;  %p6404_p3 = por %p6403_p2, %p6402_p1 }
 0xc4d   :  { %4041 = vmatmul.mubr.bf16.gmra.mrb[40].mxu0 %v3381_v41  ;;  %5403 = vmatprep.subr.bf16.mxu1 %v6100_v54 }
 0xc4e   :  { %p6405_p4 = pnand %p6404_p3, %p6398_p0 }
 0xc50   :  { %5404 = vmatpush3.bf16.msra.mxu1 %v6101_v57  ;;  %v6109_v57 = vld [vmem:[#allocation11] ss:$8 sps:$4 sm:$0xff]  }
 0xc51   :  { %5405 = vmatprep.subr.bf16.mxu1 %v6102_v55 }
 0xc54   :  { %5406 = vmatpush3.bf16.msra.mxu1 %v6103_v49  ;;  %v6114_v49 = vld [vmem:[#allocation11 + $0x14] ss:$8 sps:$4 sm:$0xff]  }
 0xc55   :  { %5407 = vmatprep.subr.bf16.mxu1 %v6104_v60  ;;  %v6117_v60 = vld [vmem:[#allocation11 + $0x24] ss:$8 sps:$4 sm:$0xff]  }
 0xc58   :  { %5408 = vmatpush3.bf16.msra.mxu1 %v6105_v2  ;;  %v6115_v2 = vld [vmem:[#allocation11 + $0x20] ss:$8 sps:$4 sm:$0xff]  }
 0xc59   :  { %4266 = vmatprep.subr.bf16.mxu1 %v6108_v15 }
 0xd18   :  { %v4032_v3 = vpop.f32.mrb[36].mxu0 }
 0xd19   :  { %v4034_v5 = vpop.f32.mrb[37].mxu0  ;;  %v7140_v11 = vadd.f32 %v4032_v3, %v3297_v6  ;;  %v6118_v3 = vld [vmem:[#allocation11 + $0x30] ss:$8 sps:$4 sm:$0xff]  }
 0xd1a   :  { %v4036_v10 = vpop.f32.mrb[38].mxu0  ;;  %v7142_v12 = vadd.f32 %v4034_v5, %v3301_v4  ;;  %v6123_v5 = vld [vmem:[#allocation11 + $0x44] ss:$8 sps:$4 sm:$0xff]  }
 0xd1b   :  { %v4038_v53 = vpop.f32.mrb[39].mxu0  ;;  %v7136_v7 = vadd.f32 %v4036_v10, %v3297_v6  ;;  %v4049_v18 = vmax.f32 %v7140_v11, 0.0  ;;  %v6126_v10 = vld [vmem:[#allocation11 + $0x54] ss:$8 sps:$4 sm:$0xff]  }
 0xd1c   :  { %v7138_v9 = vadd.f32 %v4038_v53, %v3301_v4  ;;  %v4050_v21 = vmax.f32 %v7142_v12, 0.0  ;;  %v6127_v53 = vld [vmem:[#allocation11 + $0x60] ss:$8 sps:$4 sm:$0xff]  }
 0xd1d   :  { %v4051_v13 = vmax.f32 %v7136_v7, 0.0 }
 0xd1e   :  { %v4052_v38 = vmax.f32 %v7138_v9, 0.0 }
 0xd1f   :  { %v4089_v23 = vadd.f32 %v4051_v13, %v4049_v18 }
 0xd20   :  { %v4042_v14 = vpop.f32.mrb[40].mxu0  ;;  %v4098_v25 = vadd.f32 %v4052_v38, %v4050_v21 }
 0xd21   :  { %v7146_v16 = vadd.f32 %v4042_v14, %v3297_v6  ;;  %v4044_v51 = vpop.f32.mrb[41].mxu0  ;;  %v6121_v6 = vld [vmem:[#allocation11 + $0x40] ss:$8 sps:$4 sm:$0xff]   ;;  %v6132_v14 = vld [vmem:[#allocation11 + $0x74] ss:$8 sps:$4 sm:$0xff]  }
 0xd22   :  { %v7149_v19 = vadd.f32 %v4044_v51, %v3301_v4  ;;  %v4046_v20 = vpop.f32.mrb[42].mxu0  ;;  %v6129_v4 = vld [vmem:[#allocation11 + $0x64] ss:$8 sps:$4 sm:$0xff]   ;;  %v6130_v51 = vld [vmem:[#allocation11 + $0x70] ss:$8 sps:$4 sm:$0xff]  }
 0xd23   :  { %v4053_v22 = vmax.f32 %v7146_v16, 0.0  ;;  %v4047_v39 = vpop.f32.mrb[43].mxu0  ;;  %v6135_v20 = vld [vmem:[#allocation11 + $0x84] ss:$8 sps:$4 sm:$0xff]  }
 0xd24   :  { %v4054_v24 = vmax.f32 %v7149_v19, 0.0  ;;  %v6133_v39 = vld [vmem:[#allocation11 + $0x80] ss:$8 sps:$4 sm:$0xff]  }
 0xd25   :  { %v4090_v26 = vsel %vm569_vm5, %v4053_v22, 0.0 }
 0xd26   :  { %v4091_v27 = vadd.f32 %v4090_v26, %v4089_v23  ;;  %v4099_v28 = vsel %vm569_vm5, %v4054_v24, 0.0  ;;  %v6138_v23 = vld [vmem:[#allocation11 + $0x94] ss:$8 sps:$4 sm:$0xff]   ;;  %v6141_v26 = vld [vmem:[#allocation11 + $0xa4] ss:$8 sps:$4 sm:$0xff]  }
 0xd27   :  { %v4100_v29 = vadd.f32 %v4099_v28, %v4098_v25  ;;  %v6136_v25 = vld [vmem:[#allocation11 + $0x90] ss:$8 sps:$4 sm:$0xff]   ;;  %v6144_v28 = vld [vmem:[#allocation11 + $0xb4] ss:$8 sps:$4 sm:$0xff]  }
 0xd28   :  { %v4092_v31 = vrot.slane %v4091_v27, 4 }
 0xd29   :  { %v4101_v32 = vrot.slane %v4100_v29, 4 }
 0xd2a   :  { %v4093_v34 = vadd.f32 %v4092_v31, %v4091_v27  ;;  %v6139_v27 = vld [vmem:[#allocation11 + $0xa0] ss:$8 sps:$4 sm:$0xff]   ;;  %v6147_v31 = vld [vmem:[#allocation11 + $0xc4] ss:$8 sps:$4 sm:$0xff]  }
 0xd2b   :  { %v4102_v33 = vadd.f32 %v4101_v32, %v4100_v29  ;;  %v6142_v29 = vld [vmem:[#allocation11 + $0xb0] ss:$8 sps:$4 sm:$0xff]   ;;  %v6145_v32 = vld [vmem:[#allocation11 + $0xc0] ss:$8 sps:$4 sm:$0xff]  }
 0xd2c   :  { %v4094_v44 = vrot.slane %v4093_v34, 2 }
 0xd2d   :  { %v4103_v35 = vrot.slane %v4102_v33, 2 }
 0xd2e   :  { %v4095_v8 = vadd.f32 %v4094_v44, %v4093_v34  ;;  %v6150_v34 = vld [vmem:[#allocation11 + $0xd4] ss:$8 sps:$4 sm:$0xff]   ;;  %v6153_v44 = vld [vmem:[#allocation11 + $0xe4] ss:$8 sps:$4 sm:$0xff]  }
 0xd2f   :  { %v4104_v36 = vadd.f32 %v4103_v35, %v4102_v33  ;;  %v6148_v33 = vld [vmem:[#allocation11 + $0xd0] ss:$8 sps:$4 sm:$0xff]   ;;  %v6151_v35 = vld [vmem:[#allocation11 + $0xe0] ss:$8 sps:$4 sm:$0xff]  }
 0xd30   :  { %v4096_v37 = vrot.slane %v4095_v8, 1 }
 0xd31   :  { %v4105_v40 = vrot.slane %v4104_v36, 1 }
 0xd32   :  { %v4097_v41 = vadd.f32 %v4096_v37, %v4095_v8  ;;  %v6156_v8 = vld [vmem:[#allocation11 + $0xf4] ss:$8 sps:$4 sm:$0xff]   ;;  %v6157_v37 = vld [vmem:[#allocation12 + $0x40] sm:$0xff]  }
 0xd33   :  { %v4106_v42 = vadd.f32 %v4105_v40, %v4104_v36  ;;  %v6154_v36 = vld [vmem:[#allocation11 + $0xf0] ss:$8 sps:$4 sm:$0xff]   ;;  %v4259_v40 = vrot.slane %v7169_v62, 1 }
 0xd34   :  { %v4107_v45 = vmul.f32 0.05882353, %v4097_v41  ;;  %v7174_v41 = vld [vmem:[#allocation14 + $0x28] sm:$0xff] }
 0xd35   :  { %v4108_v59 = vmul.f32 0.05882353, %v4106_v42  ;;  %v4260_v42 = vrot.slane %v7174_v41, 1 }
 0xd36   :  { %v4109_v1 = vpack.c.bf16 %v4107_v45, %v4107_v45 }
 0xd37   :  { %v4110_v50 = vpack.c.bf16 %v4108_v59, %v4108_v59 }
 0xd39   :  { %4239 = vmatprep.mubr.bf16.mxu1 %v4110_v50 }
 0xd3a   :  { %4240 = vmatmul.mubr.bf16.vlgmr.msra.gmra.mrb[28].mxu1 %v4109_v1 }
 0xd3b   :  { %4298 = vmatprep.mubr.bf16.mxu1 %v6446_v43  ;;  %4267 = vmatpush1.bf16.msra.mxu1 %v6106_v0  ;;  %v6112_v43 = vld [vmem:[#allocation11 + $0x10] ss:$8 sps:$4 sm:$0xff]  }
 0xd3c   :  { %4547 = vmatprep.subr.bf16.mxu1 %v6111_v17 }
 0xe0d   :  { %v5409_v46 = vpop.f32.mrb[28].mxu1 }
 0xe0e   :  { %v5410_v48 = vpop.f32.mrb[29].mxu1 }
 0xe0f   :  { %v5411_v47 = vadd.f32 %v5410_v48, %v5409_v46  ;;  %v5412_v52 = vpop.f32.mrb[30].mxu1 }
 0xe10   :  { %v5413_v56 = vpop.f32.mrb[31].mxu1 }
 0xe11   :  { %v4242_v58 = vadd.f32 %v7169_v62, %v5411_v47 }
 0xe13   :  { %v4247_v54 = vmax.f32 %v4242_v58, 0.0 }
 0xe15   :  { %v4248_v55 = vpack.c.bf16 %v4247_v54, %v4247_v54 }
 0xe17   :  { %5267 = vmatmul.mubr.msk.bf16.vlgmr.msra.gmra.mrb[32].mxu1 %vm822_vm6, %v4248_v55 }
 0xe18   :  { %4548 = vmatpush1.bf16.msra.mxu1 %v6109_v57 }
 0xe19   :  { %4549 = vmatprep.subr.bf16.mxu1 %v6114_v49 }
 0xe1c   :  { %4550 = vmatpush1.bf16.msra.mxu1 %v6112_v43 }
 0xe1d   :  { %4551 = vmatprep.subr.bf16.mxu1 %v6117_v60 }
 0xe20   :  { %4552 = vmatpush1.bf16.msra.mxu1 %v6115_v2 }
 0xe21   :  { %4553 = vmatprep.subr.bf16.mxu1 %v6120_v61 }
 0xe24   :  { %4554 = vmatpush1.bf16.msra.mxu1 %v6118_v3 }
 0xe25   :  { %4555 = vmatprep.subr.bf16.mxu1 %v6123_v5 }
 0xe28   :  { %4556 = vmatpush1.bf16.msra.mxu1 %v6121_v6 }
 0xe29   :  { %4557 = vmatprep.subr.bf16.mxu1 %v6126_v10 }
 0xe2c   :  { %4558 = vmatpush1.bf16.msra.mxu1 %v6124_v63 }
 0xe2d   :  { %4559 = vmatprep.subr.bf16.mxu1 %v6129_v4 }
 0xe30   :  { %4560 = vmatpush1.bf16.msra.mxu1 %v6127_v53 }
 0xe31   :  { %4561 = vmatprep.subr.bf16.mxu1 %v6132_v14 }
 0xe34   :  { %4562 = vmatpush1.bf16.msra.mxu1 %v6130_v51 }
 0xe35   :  { %4563 = vmatprep.subr.bf16.mxu1 %v6135_v20  ;;  %v6158_v20 = vld [vmem:[#allocation12] sm:$0xff]  }
 0xe38   :  { %4564 = vmatpush1.bf16.msra.mxu1 %v6133_v39 }
 0xe39   :  { %4565 = vmatprep.subr.bf16.mxu1 %v6138_v23  ;;  %v6159_v23 = vld [vmem:[#allocation12 + $0x48] sm:$0xff]  }
 0xe3c   :  { %4566 = vmatpush1.bf16.msra.mxu1 %v6136_v25  ;;  %v6160_v25 = vld [vmem:[#allocation12 + $0x8] sm:$0xff]  }
 0xe3d   :  { %4567 = vmatprep.subr.bf16.mxu1 %v6141_v26  ;;  %v6161_v26 = vld [vmem:[#allocation12 + $0x50] sm:$0xff]  }
 0xe40   :  { %4568 = vmatpush1.bf16.msra.mxu1 %v6139_v27  ;;  %v6162_v27 = vld [vmem:[#allocation12 + $0x10] sm:$0xff]  }
 0xe41   :  { %4569 = vmatprep.subr.bf16.mxu1 %v6144_v28  ;;  %v6163_v28 = vld [vmem:[#allocation12 + $0x58] sm:$0xff]  }
 0xe44   :  { %4570 = vmatpush1.bf16.msra.mxu1 %v6142_v29  ;;  %v6164_v29 = vld [vmem:[#allocation12 + $0x18] sm:$0xff]  }
 0xe45   :  { %4571 = vmatprep.subr.bf16.mxu1 %v6147_v31  ;;  %v6165_v31 = vld [vmem:[#allocation12 + $0x60] sm:$0xff]  }
 0xe48   :  { %4572 = vmatpush1.bf16.msra.mxu1 %v6145_v32  ;;  %v6166_v32 = vld [vmem:[#allocation12 + $0x20] sm:$0xff]  }
 0xe49   :  { %4573 = vmatprep.subr.bf16.mxu1 %v6150_v34  ;;  %v6167_v34 = vld [vmem:[#allocation12 + $0x68] sm:$0xff]  }
 0xe4c   :  { %4574 = vmatpush1.bf16.msra.mxu1 %v6148_v33  ;;  %v6168_v33 = vld [vmem:[#allocation12 + $0x28] sm:$0xff]  }
 0xe4d   :  { %4575 = vmatprep.subr.bf16.mxu1 %v6153_v44  ;;  %v6169_v44 = vld [vmem:[#allocation12 + $0x70] sm:$0xff]  }
 0xe50   :  { %4576 = vmatpush1.bf16.msra.mxu1 %v6151_v35  ;;  %v6170_v35 = vld [vmem:[#allocation12 + $0x30] sm:$0xff]  }
 0xe51   :  { %4577 = vmatprep.subr.bf16.mxu1 %v6156_v8  ;;  %v6171_v8 = vld [vmem:[#allocation12 + $0x78] sm:$0xff]  }
 0xe54   :  { %4578 = vmatpush1.bf16.msra.mxu1 %v6154_v36  ;;  %v6172_v36 = vld [vmem:[#allocation12 + $0x38] sm:$0xff]  }
 0xe55   :  { %5415 = vmatprep.subr.bf16.mxu1 %v6157_v37  ;;  %v6242_v37 = vld [vmem:[#allocation2] sm:$0xff] }
 0xeea   :  { %v4300_v45 = vpop.f32.mrb[32].mxu1 }
 0xeeb   :  { %v4301_v59 = vadd.f32 %v4300_v45, %v4259_v40  ;;  %v4302_v50 = vpop.f32.mrb[33].mxu1  ;;  %v575_v40 = vrot.slane %v7169_v62, 6  ;;  %v576_v45 = vrot.slane %v7174_v41, 6 }
 0xeec   :  { %v4303_v1 = vadd.f32 %v4302_v50, %v4260_v42  ;;  %v4304_v0 = vpop.f32.mrb[34].mxu1  ;;  %v574_v42 = vpop.xlane.xlu0 %573  ;;  %v4590_v50 = vrot.slane %v7169_v62, 2 }
 0xeed   :  { %v5268_v15 = vmul.f32 -1.442695, %v4301_v59  ;;  %v4305_v17 = vpop.f32.mrb[35].mxu1  ;;  %v579_v59 = vmul.f32 %v575_v40, %v574_v42 }
 0xeee   :  { %v5269_v46 = vmul.f32 -1.442695, %v4303_v1  ;;  %v580_v1 = vmul.f32 %v576_v45, %v574_v42 }
 0xeef   :  { %6229 = vpow2.f32 %v5268_v15  ;;  %v4591_v15 = vrot.slane %v7174_v41, 2  ;;  %v6176_v41 = vld [vmem:[#allocation12 + $0x98] sm:$0xff]  }
 0xef0   :  { %6231 = vpow2.f32 %v5269_v46 }
 0xef9   :  { %v6230_v48 = vpop.eup %6229 }
 0xefa   :  { %v6232_v47 = vpop.eup %6231  ;;  %v4313_v52 = vadd.f32 1.0, %v6230_v48 }
 0xefb   :  { %v4314_v56 = vadd.f32 1.0, %v6232_v47 }
 0xefc   :  { %6233 = vrcp.f32 %v4313_v52 }
 0xefd   :  { %6235 = vrcp.f32 %v4314_v56 }
 0xf06   :  { %v6234_v58 = vpop.eup %6233 }
 0xf07   :  { %v6236_v54 = vpop.eup %6235  ;;  %v4322_v57 = vrot.slane %v6234_v58, %v6752_v30 }
 0xf08   :  { %v4326_v55 = vrot.slane %v6236_v54, %v6752_v30 }
 0xf09   :  { %v4327_v49 = vmul.f32 %v4322_v57, %v4049_v18  ;;  %v4329_v43 = vmul.f32 %v4322_v57, %v4051_v13  ;;  %v4331_v60 = vmul.f32 %v4322_v57, %v4053_v22  ;;  %v6173_v57 = vld [vmem:[#allocation12 + $0x80] sm:$0xff]  }
 0xf0a   :  { %v4328_v2 = vmul.f32 %v4326_v55, %v4050_v21  ;;  %v4330_v61 = vmul.f32 %v4326_v55, %v4052_v38  ;;  %v4332_v3 = vmul.f32 %v4326_v55, %v4054_v24 }
 0xf0b   :  { %v4333_v5 = vadd.f32 %v4329_v43, %v4327_v49  ;;  %v4334_v30 = vsel %vm569_vm5, %v4331_v60, 0.0  ;;  %v6174_v49 = vld [vmem:[#allocation12 + $0x88] sm:$0xff]   ;;  %v6175_v43 = vld [vmem:[#allocation12 + $0x90] sm:$0xff]   ;;  %v6177_v60 = vld [vmem:[#allocation12 + $0xa0] sm:$0xff]  }
 0xf0c   :  { %v4342_v11 = vadd.f32 %v4330_v61, %v4328_v2  ;;  %v4343_v18 = vsel %vm569_vm5, %v4332_v3, 0.0  ;;  %v6178_v2 = vld [vmem:[#allocation12 + $0xa8] sm:$0xff]   ;;  %v6179_v61 = vld [vmem:[#allocation12 + $0xb0] sm:$0xff]   ;;  %v6180_v3 = vld [vmem:[#allocation12 + $0xb8] sm:$0xff]  }
 0xf0d   :  { %v4335_v7 = vadd.f32 %v4334_v30, %v4333_v5  ;;  %v4726_v30 = vrot.slane %v7169_v62, 3 }
 0xf0e   :  { %v4344_v13 = vadd.f32 %v4343_v18, %v4342_v11 }
 0xf0f   :  { %v4336_v6 = vrot.slane %v4335_v7, 4 }
 0xf10   :  { %v4345_v16 = vrot.slane %v4344_v13, 4 }
 0xf11   :  { %v4337_v22 = vadd.f32 %v4336_v6, %v4335_v7 }
 0xf12   :  { %v4346_v10 = vadd.f32 %v4345_v16, %v4344_v13 }
 0xf13   :  { %v4338_v12 = vrot.slane %v4337_v22, 2 }
 0xf14   :  { %v4347_v21 = vrot.slane %v4346_v10, 2 }
 0xf15   :  { %v4339_v63 = vadd.f32 %v4338_v12, %v4337_v22  ;;  %v4833_v22 = vrot.slane %v7169_v62, 4 }
 0xf16   :  { %v4348_v9 = vadd.f32 %v4347_v21, %v4346_v10 }
 0xf17   :  { %v4340_v38 = vrot.slane %v4339_v63, 1 }
 0xf18   :  { %v4349_v4 = vrot.slane %v4348_v9, 1 }
 0xf19   :  { %v4341_v19 = vadd.f32 %v4340_v38, %v4339_v63 }
 0xf1a   :  { %v4350_v24 = vadd.f32 %v4349_v4, %v4348_v9 }
 0xf1b   :  { %v4351_v53 = vmul.f32 0.05882353, %v4341_v19 }
 0xf1c   :  { %v4352_v14 = vmul.f32 0.05882353, %v4350_v24 }
 0xf1d   :  { %v4385_v39 = vpack.c.bf16 %v4351_v53, %v4351_v53 }
 0xf1e   :  { %v4386_v51 = vpack.c.bf16 %v4352_v14, %v4352_v14 }
 0xf20   :  { %4579 = vmatprep.mubr.bf16.mxu1 %v4386_v51 }
 0xf21   :  { %4580 = vmatmul.mubr.bf16.vlgmr.msra.gmra.mrb[36].mxu1 %v4385_v39 }
 0xf22   :  { %5416 = vmatpush3.bf16.msra.mxu1 %v6158_v20 }
 0xf23   :  { %5417 = vmatprep.subr.bf16.mxu1 %v6159_v23 }
 0xf26   :  { %5418 = vmatpush3.bf16.msra.mxu1 %v6160_v25 }
 0xf27   :  { %5419 = vmatprep.subr.bf16.mxu1 %v6161_v26 }
 0xf2a   :  { %5420 = vmatpush3.bf16.msra.mxu1 %v6162_v27 }
 0xf2b   :  { %5421 = vmatprep.subr.bf16.mxu1 %v6163_v28 }
 0xf2e   :  { %5422 = vmatpush3.bf16.msra.mxu1 %v6164_v29 }
 0xf2f   :  { %5423 = vmatprep.subr.bf16.mxu1 %v6165_v31 }
 0xf32   :  { %5424 = vmatpush3.bf16.msra.mxu1 %v6166_v32 }
 0xf33   :  { %5425 = vmatprep.subr.bf16.mxu1 %v6167_v34 }
 0xf36   :  { %5426 = vmatpush3.bf16.msra.mxu1 %v6168_v33 }
 0xf37   :  { %5427 = vmatprep.subr.bf16.mxu1 %v6169_v44 }
 0xf3a   :  { %5428 = vmatpush3.bf16.msra.mxu1 %v6170_v35 }
 0xf3b   :  { %5429 = vmatprep.subr.bf16.mxu1 %v6171_v8 }
 0xf3e   :  { %5430 = vmatpush3.bf16.msra.mxu1 %v6172_v36 }
 0xf3f   :  { %5500 = vmatprep.subr.bf16.mxu1 %v6242_v37 }
 0xff4   :  { %v4581_v0 = vpop.f32.mrb[36].mxu1 }
 0xff5   :  { %v4588_v17 = vadd.f32 %v4581_v0, %v579_v59  ;;  %v4583_v46 = vpop.f32.mrb[37].mxu1 }
 0xff6   :  { %v4589_v48 = vadd.f32 %v4583_v46, %v580_v1  ;;  %v4585_v47 = vpop.f32.mrb[38].mxu1 }
 0xff7   :  { %v4594_v52 = vadd.f32 %v4590_v50, %v4588_v17  ;;  %v4586_v56 = vpop.f32.mrb[39].mxu1 }
 0xff8   :  { %v4595_v58 = vadd.f32 %v4591_v15, %v4589_v48 }
 0xff9   :  { %v4628_v55 = vpack.c.bf16 %v4594_v52, %v4594_v52 }
 0xffa   :  { %v4629_v54 = vpack.c.bf16 %v4595_v58, %v4595_v58 }
 0xffc   :  { %4760 = vmatprep.mubr.bf16.mxu1 %v4629_v54 }
 0xffd   :  { %4761 = vmatmul.mubr.bf16.vlgmr.msra.gmra.mrb[40].mxu1 %v4628_v55 }
 0xffe   :  { %5501 = vmatpush3.bf16.msra.mxu1 %v6173_v57  ;;  %5516 = vmatprep.mubr.msk.bf16.mxu1 %vm6445_vm0, %v6242_v37 }
 0xfff   :  { %5502 = vmatprep.subr.bf16.mxu1 %v6242_v37 }
0x1002   :  { %5503 = vmatpush3.bf16.msra.mxu1 %v6174_v49 }
0x1003   :  { %5504 = vmatprep.subr.bf16.mxu1 %v6242_v37 }
0x1006   :  { %5505 = vmatpush3.bf16.msra.mxu1 %v6175_v43 }
0x1007   :  { %5506 = vmatprep.subr.bf16.mxu1 %v6242_v37 }
0x100a   :  { %5507 = vmatpush3.bf16.msra.mxu1 %v6176_v41 }
0x100b   :  { %5508 = vmatprep.subr.bf16.mxu1 %v6242_v37 }
0x100e   :  { %5509 = vmatpush3.bf16.msra.mxu1 %v6177_v60 }
0x100f   :  { %5510 = vmatprep.subr.bf16.mxu1 %v6242_v37 }
0x1012   :  { %5511 = vmatpush3.bf16.msra.mxu1 %v6178_v2 }
0x1013   :  { %5512 = vmatprep.subr.bf16.mxu1 %v6242_v37 }
0x1016   :  { %5513 = vmatpush3.bf16.msra.mxu1 %v6179_v61 }
0x1017   :  { %5514 = vmatprep.subr.bf16.mxu1 %v6242_v37 }
0x101a   :  { %5515 = vmatpush3.bf16.msra.mxu1 %v6180_v3 }
0x10d0   :  { %v5431_v5 = vpop.f32.mrb[40].mxu1 }
0x10d1   :  { %v5432_v11 = vpop.f32.mrb[41].mxu1 }
0x10d2   :  { %v5433_v18 = vadd.f32 %v5432_v11, %v5431_v5  ;;  %v5434_v7 = vpop.f32.mrb[42].mxu1 }
0x10d3   :  { %v5435_v13 = vpop.f32.mrb[43].mxu1 }
0x10d4   :  { %v4763_v6 = vadd.f32 %v5433_v18, %v4726_v30 }
0x10d6   :  { %v4784_v16 = vpack.c.bf16 %v4763_v6, %v4763_v6 }
0x10d8   :  { %5517 = vmatmul.mubr.bf16.vlgmr.msra.gmra.mrb[44].mxu1 %v4784_v16 }
0x11ab   :  { %v4869_v10 = vpop.f32.mrb[44].mxu1 }
0x11ac   :  { %v4870_v12 = vadd.f32 %v4869_v10, %v4833_v22  ;;  %v5518_v21 = vpop.f32.mrb[45].mxu1 }
0x11ad   :  { %v4872_v63 = vpop.f32.mrb[46].mxu1 }
0x11ae   :  { %4875 = vst [vmem:[#allocation15] sm:$0x1] %v4870_v12  ;;  %v5519_v9 = vpop.f32.mrb[47].mxu1 }
0x11af   :  { %6408 = shalt.err (!%p6405_p4)
}
0x11b0   :  { %s6409_s21 = scalar_lea.hbm %s7224_s12, 16 }
0x11b1   :  { %p6410_p5 = scmp.ne.s32.totalorder %s7224_s12, %s6409_s21  ;;  %p6413_p6 = scmp.lt.u32.totalorder %s6409_s21, %s7224_s12 }
0x11b3   :  { %p6415_p7 = pnand %p6413_p6, %p6410_p5 }
0x11b5   :  { %6418 = shalt.err (!%p6415_p7)
}
0x11b6   :  { %4885 = dma.vmem_to_hbm [thread:$0]  %s4883_s9, 16, %s7224_s12, [#allocation5]  }
0x11b7   :  { %6427 = dma.done.wait [#allocation5], 16  }
0x11b8   :  { %6428 = vsyncadd [#allocation5], 4294967280 }
0x11b9   :  { %4889 = vsyncpa [#allocation4], 1 }
0x11ba   :  { %4890 = vsyncpa [#allocation7], 1 }
0x11bb   :  { %4891 = vsyncpa [#allocation10], 1 }
0x11bc   :  { %4892 = vsyncpa [#allocation13], 1 }
0x11bd   :  { %4893 = vsyncpa [#allocation5], 1 }

</bundles_post_ra>
